<compile_context>
chip_gen: v6e
topology: v6e:2x2x1
jax: 0.10.0
libtpu: 0.0.40
codegen_flags: <defaults>
</compile_context>

<pallas_src>
import functools

import jax
import jax.numpy as jnp
import numpy as np
from jax import lax
from jax.experimental import pallas as pl
from jax.experimental.pallas import tpu as pltpu


def _round_up(x, m):
    return ((x + m - 1) // m) * m


def _stft_loss_kernel(pc_ref, pn_ref, tc_ref, tn_ref, basis_ref, out_ref, *,
                      tm, k_pad, n_chunks, n_frames):
    """One grid step = one batch row x one tile of tm frames.

    Inputs (VMEM blocks):
      pc/tc : (tm, hop)  bf16  hop-sized signal rows for this tile   (pred/true)
      pn/tn : (tm, hop)  bf16  the next tile's rows (frame overlap)  (pred/true)
      basis : (n_chunks, hop, 2*k_pad) bf16 fused [cos | -sin] real-DFT basis
    Output (VMEM block): (8, 3*k_pad) f32 = [sum (|T|-|P|)^2 | sum |T|^2 | sum |log|T|-log|P||]
    folded over the tile's frames (8-sublane partials, reduced in JAX afterwards).
    """
    ti = pl.program_id(1)

    if n_chunks > 1:
        p_rows = jnp.concatenate([pc_ref[...], pn_ref[...]], axis=0)  # (2*tm, hop)
        t_rows = jnp.concatenate([tc_ref[...], tn_ref[...]], axis=0)
    else:
        p_rows = pc_ref[...]
        t_rows = tc_ref[...]

    # Chunked STFT matmul: frame f, window sample m = c*hop + j  ->  row f+c, col j.
    acc = jnp.zeros((2 * tm, 2 * k_pad), jnp.float32)
    for c in range(n_chunks):
        rows = jnp.concatenate([p_rows[c:c + tm], t_rows[c:c + tm]], axis=0)
        acc = acc + jnp.dot(rows, basis_ref[c],
                            preferred_element_type=jnp.float32)

    # Per-row validity (frames beyond n_frames overlap real samples -> mask).
    frame0 = ti * tm
    row_ids = lax.broadcasted_iota(jnp.int32, (tm, 1), 0) + frame0
    valid = (row_ids < n_frames).astype(jnp.float32)                  # (tm, 1)

    # Fused epilogue + sublane fold: accumulate straight into (8, k_pad) partials.
    d2 = jnp.zeros((8, k_pad), jnp.float32)
    sqt = jnp.zeros((8, k_pad), jnp.float32)
    lg = jnp.zeros((8, k_pad), jnp.float32)
    for g in range(tm // 8):
        r = g * 8
        op = acc[r:r + 8]                    # pred rows of this group
        ot = acc[tm + r:tm + r + 8]          # true rows of this group
        m = valid[r:r + 8]
        re_p, im_p = op[:, :k_pad], op[:, k_pad:]
        re_t, im_t = ot[:, :k_pad], ot[:, k_pad:]
        sq_p = (re_p * re_p + im_p * im_p) * m
        sq_t = (re_t * re_t + im_t * im_t) * m
        sq_p_c = jnp.maximum(sq_p, 1e-14)    # clamp(|X|,1e-7)^2, matches torch
        sq_t_c = jnp.maximum(sq_t, 1e-14)
        # (|T|-|P|)^2 with a single sqrt.
        d2 = d2 + (sq_t_c + sq_p_c - 2.0 * jnp.sqrt(sq_t_c * sq_p_c))
        # Un-clamped |T|^2 -> padded rows/cols contribute exactly 0.
        sqt = sqt + sq_t
        # |log|T| - log|P|| with a single log + exact divide.
        lg = lg + 0.5 * jnp.abs(jnp.log(sq_t_c / sq_p_c))

    out_ref[...] = jnp.concatenate([d2, sqt, lg], axis=1)


def _dft_basis_chunks(n_fft, win_len, hop, n_chunks, k_pad):
    """Fused one-sided real-DFT basis [cos | -sin], shape (n_chunks, hop, 2*k_pad).

    Row m = c*hop + j carries phase (m + left)*k mod n_fft (the centered
    rectangular window's offset folded in); rows >= win_len and columns >= n_bins
    are zero.  Built with exact integer phase reduction in float64.
    """
    n_bins = n_fft // 2 + 1
    left = (n_fft - win_len) // 2
    wp = n_chunks * hop
    m_idx = np.arange(wp, dtype=np.int64) + left
    k_idx = np.arange(k_pad, dtype=np.int64)
    phase = (m_idx[:, None] * k_idx[None, :]) % n_fft
    ang = (2.0 * np.pi / n_fft) * phase.astype(np.float64)
    valid = (np.arange(wp) < win_len)[:, None] & (k_idx < n_bins)[None, :]
    basis = np.zeros((wp, 2 * k_pad), np.float32)
    basis[:, :k_pad] = np.where(valid, np.cos(ang), 0.0)
    basis[:, k_pad:] = np.where(valid, -np.sin(ang), 0.0)
    return basis.reshape(n_chunks, hop, 2 * k_pad)


@functools.partial(jax.jit, static_argnums=(2, 3, 4))
def single_resolution_stft_loss(y_pred, y_true, n_fft, win_len, hop):
    """Returns (spectral_convergence_loss, log_magnitude_loss) as scalars,
    matching SingleResolutionSTFTLoss.forward (torch.stft: center=True, reflect
    pad, rectangular win_len window centered inside the n_fft frame)."""
    y_pred = jnp.squeeze(y_pred).astype(jnp.float32)
    y_true = jnp.squeeze(y_true).astype(jnp.float32)
    if y_pred.ndim == 1:
        y_pred = y_pred[None, :]
        y_true = y_true[None, :]
    b, t = y_pred.shape

    pad = n_fft // 2                       # requires t > n_fft // 2 (as torch.stft)
    left = (n_fft - win_len) // 2
    n_frames = 1 + t // hop
    n_bins = n_fft // 2 + 1
    k_pad = _round_up(n_bins, 128)         # one-sided bins padded to lane multiple
    n_chunks = -(-win_len // hop)          # hop-sized window chunks
    # TODO(synk): for extreme win_len/hop ratios (> ~16) the unrolled chunk loop
    # and small per-chunk contraction degrade; a frames-gather path would win there.

    tm = 256 if n_fft <= 512 else 128      # frames per tile (resolution dependent)
    nt = -(-n_frames // tm)
    if (b * nt) % 2 == 1:                  # even total steps -> v7x 2-TC split
        nt += 1
    n_rows = (nt + 1) * tm                 # +1 tile so the "next" block exists

    # Reshape the reflect-padded signal into hop-sized rows (no gather, ~1x copy).
    xp_p = jnp.pad(y_pred, ((0, 0), (pad, pad)), mode="reflect")
    xp_t = jnp.pad(y_true, ((0, 0), (pad, pad)), mode="reflect")
    target = n_rows * hop

    def to_rows(xp):
        avail = xp.shape[1] - left
        if avail >= target:
            s = xp[:, left:left + target]
        else:
            s = jnp.pad(xp[:, left:], ((0, 0), (0, target - avail)))
        return s.reshape(b, n_rows, hop).astype(jnp.bfloat16)

    p_rows = to_rows(xp_p)
    t_rows = to_rows(xp_t)
    basis = jnp.asarray(_dft_basis_chunks(n_fft, win_len, hop, n_chunks, k_pad),
                        jnp.bfloat16)

    # Per-resolution VMEM budget (basis single-buffered, inputs double-buffered,
    # one f32 matmul accumulator) + headroom; never the fixed 48 MiB of before.
    need = (n_chunks * hop * 2 * k_pad * 2          # basis (bf16, 1 buffer)
            + 4 * 2 * tm * hop * 2                  # 4 signal blocks, 2 buffers
            + 2 * 8 * 3 * k_pad * 4                 # output block, 2 buffers
            + 2 * tm * 2 * k_pad * 4                # f32 matmul accumulator
            + 2 * 2 * tm * hop * 2                  # stacked row values
            + 16 * 8 * k_pad * 4)                   # epilogue group temporaries
    vmem_limit = min(40 << 20, max(16 << 20, int(need * 1.5) + (4 << 20)))

    kernel = functools.partial(_stft_loss_kernel, tm=tm, k_pad=k_pad,
                               n_chunks=n_chunks, n_frames=n_frames)

    out = pl.pallas_call(
        kernel,
        out_shape=jax.ShapeDtypeStruct((b, nt * 8, 3 * k_pad), jnp.float32),
        grid_spec=pltpu.PrefetchScalarGridSpec(
            num_scalar_prefetch=0,
            grid=(b, nt),
            in_specs=[
                pl.BlockSpec((None, tm, hop), lambda bi, ti: (bi, ti, 0)),
                pl.BlockSpec((None, tm, hop), lambda bi, ti: (bi, ti + 1, 0)),
                pl.BlockSpec((None, tm, hop), lambda bi, ti: (bi, ti, 0)),
                pl.BlockSpec((None, tm, hop), lambda bi, ti: (bi, ti + 1, 0)),
                pl.BlockSpec((n_chunks, hop, 2 * k_pad),
                             lambda bi, ti: (0, 0, 0),
                             pipeline_mode=pl.Buffered(1)),   # grid-invariant
            ],
            out_specs=pl.BlockSpec((None, 8, 3 * k_pad),
                                   lambda bi, ti: (bi, ti, 0)),
        ),
        compiler_params=pltpu.CompilerParams(
            dimension_semantics=("parallel", "parallel"),
            vmem_limit_bytes=vmem_limit),
    )(p_rows, p_rows, t_rows, t_rows, basis)

    sqd = out[:, :, :k_pad]
    sqt = out[:, :, k_pad:2 * k_pad]
    ld = out[:, :, 2 * k_pad:]
    sc_loss = jnp.sqrt(jnp.sum(sqd)) / jnp.sqrt(jnp.sum(sqt))
    log_loss = jnp.sum(ld) / jnp.float32(b * n_bins * n_frames)
    return sc_loss, log_loss


# ----------------------------- reference (pure JAX) -------------------------
def _frames_full(x, n_fft, win_len, hop):
    b, t = x.shape
    pad = n_fft // 2
    xp = jnp.pad(x, ((0, 0), (pad, pad)), mode="reflect")
    n_frames = 1 + t // hop
    idx = jnp.arange(n_frames)[:, None] * hop + jnp.arange(n_fft)[None, :]
    fr = xp[:, idx]
    left = (n_fft - win_len) // 2
    win = jnp.zeros((n_fft,), jnp.float32).at[left:left + win_len].set(1.0)
    fr = fr * win[None, None, :]
    return fr.reshape(b * n_frames, n_fft), n_frames


def _ref_single(y_pred, y_true, n_fft, win_len, hop):
    y_pred = jnp.squeeze(y_pred).astype(jnp.float32)
    y_true = jnp.squeeze(y_true).astype(jnp.float32)
    if y_pred.ndim == 1:
        y_pred = y_pred[None, :]
        y_true = y_true[None, :]
    fp, _ = _frames_full(y_pred, n_fft, win_len, hop)
    ft, _ = _frames_full(y_true, n_fft, win_len, hop)
    mp = jnp.maximum(jnp.abs(jnp.fft.rfft(fp, axis=-1)), 1e-7)
    mt = jnp.maximum(jnp.abs(jnp.fft.rfft(ft, axis=-1)), 1e-7)
    sc = jnp.linalg.norm(mt - mp) / jnp.linalg.norm(mt)
    lm = jnp.mean(jnp.abs(jnp.log(mt) - jnp.log(mp)))
    return sc, lm


if __name__ == "__main__":
    key = jax.random.PRNGKey(0)
    k1, k2 = jax.random.split(key)
    B, C, T = 2, 1, 1024
    y_true = jax.random.normal(k1, (B, C, T), dtype=jnp.float32)
    y_pred = y_true + 0.1 * jax.random.normal(k2, (B, C, T), dtype=jnp.float32)

    # Small (fft_size, win_len, hop) configs consistent with the constructor.
    configs = ((128, 64, 16), (256, 120, 32), (512, 240, 64))
    for n_fft, wlen, hop in configs:
        sc, lm = single_resolution_stft_loss(y_pred, y_true, n_fft, wlen, hop)
        sc = jax.block_until_ready(sc)
        lm = jax.block_until_ready(lm)
        sc_ref, lm_ref = _ref_single(y_pred, y_true, n_fft, wlen, hop)
        np.testing.assert_allclose(np.asarray(sc), np.asarray(sc_ref),
                                   rtol=2e-2, atol=1e-3)
        np.testing.assert_allclose(np.asarray(lm), np.asarray(lm_ref),
                                   rtol=2e-2, atol=1e-3)

    print("KERNEL_OK")
</pallas_src>

<mosaic_0001>
module attributes {stable_mosaic.version = 11 : i64} {
  func.func @_stft_loss_kernel(%arg0: i32, %arg1: i32, %arg2: memref<1x256x16xbf16, #tpu.memory_space<vmem>>, %arg3: memref<1x256x16xbf16, #tpu.memory_space<vmem>>, %arg4: memref<1x256x16xbf16, #tpu.memory_space<vmem>>, %arg5: memref<1x256x16xbf16, #tpu.memory_space<vmem>>, %arg6: memref<4x16x256xbf16, #tpu.memory_space<vmem>>, %arg7: memref<1x8x384xf32, #tpu.memory_space<vmem>>) attributes {dimension_semantics = [#tpu.dimension_semantics<parallel>, #tpu.dimension_semantics<parallel>], iteration_bounds = array<i64: 2, 1>, scalar_prefetch = 0 : i64, scratch_operands = 0 : i64, tpu.core_type = #tpu.core_type<tc>, window_params = [{transform_indices = @transform_0, window_bounds = array<i64: 1, 256, 16>}, {transform_indices = @transform_1, window_bounds = array<i64: 1, 256, 16>}, {transform_indices = @transform_2, window_bounds = array<i64: 1, 256, 16>}, {transform_indices = @transform_3, window_bounds = array<i64: 1, 256, 16>}, {pipeline_mode = #tpu.pipeline_mode<synchronous>, transform_indices = @transform_4, window_bounds = array<i64: 4, 16, 256>}, {transform_indices = @transform_5, window_bounds = array<i64: 1, 8, 384>}]} {
    %c0 = arith.constant 0 : index
    %c0_0 = arith.constant 0 : index
    %c0_1 = arith.constant 0 : index
    %0 = vector.load %arg2[%c0, %c0_0, %c0_1] : memref<1x256x16xbf16, #tpu.memory_space<vmem>>, vector<1x256x16xbf16>
    %1 = vector.shape_cast %0 : vector<1x256x16xbf16> to vector<256x16xbf16>
    %c0_2 = arith.constant 0 : index
    %c0_3 = arith.constant 0 : index
    %c0_4 = arith.constant 0 : index
    %2 = vector.load %arg3[%c0_2, %c0_3, %c0_4] : memref<1x256x16xbf16, #tpu.memory_space<vmem>>, vector<1x256x16xbf16>
    %3 = vector.shape_cast %2 : vector<1x256x16xbf16> to vector<256x16xbf16>
    %4 = tpu.concatenate %1, %3 in 0 : vector<256x16xbf16>, vector<256x16xbf16> -> vector<512x16xbf16>
    %c0_5 = arith.constant 0 : index
    %c0_6 = arith.constant 0 : index
    %c0_7 = arith.constant 0 : index
    %5 = vector.load %arg4[%c0_5, %c0_6, %c0_7] : memref<1x256x16xbf16, #tpu.memory_space<vmem>>, vector<1x256x16xbf16>
    %6 = vector.shape_cast %5 : vector<1x256x16xbf16> to vector<256x16xbf16>
    %c0_8 = arith.constant 0 : index
    %c0_9 = arith.constant 0 : index
    %c0_10 = arith.constant 0 : index
    %7 = vector.load %arg5[%c0_8, %c0_9, %c0_10] : memref<1x256x16xbf16, #tpu.memory_space<vmem>>, vector<1x256x16xbf16>
    %8 = vector.shape_cast %7 : vector<1x256x16xbf16> to vector<256x16xbf16>
    %9 = tpu.concatenate %6, %8 in 0 : vector<256x16xbf16>, vector<256x16xbf16> -> vector<512x16xbf16>
    %cst = arith.constant 0.000000e+00 : f32
    %10 = vector.broadcast %cst : f32 to vector<512x256xf32>
    %11 = vector.extract_strided_slice %4 {offsets = [0, 0], sizes = [256, 16], strides = [1, 1]} : vector<512x16xbf16> to vector<256x16xbf16>
    %12 = vector.extract_strided_slice %9 {offsets = [0, 0], sizes = [256, 16], strides = [1, 1]} : vector<512x16xbf16> to vector<256x16xbf16>
    %13 = tpu.concatenate %11, %12 in 0 : vector<256x16xbf16>, vector<256x16xbf16> -> vector<512x16xbf16>
    %c0_11 = arith.constant 0 : index
    %c0_12 = arith.constant 0 : index
    %c0_13 = arith.constant 0 : index
    %14 = vector.load %arg6[%c0_11, %c0_12, %c0_13] : memref<4x16x256xbf16, #tpu.memory_space<vmem>>, vector<1x16x256xbf16>
    %15 = vector.shape_cast %14 : vector<1x16x256xbf16> to vector<16x256xbf16>
    %cst_14 = arith.constant dense<0.000000e+00> : vector<512x256xf32>
    %16 = tpu.matmul %13, %15, %cst_14 {dimension_numbers = #tpu.dot_dimension_numbers<[1], [0], [0], [1], [0, 0, 1, 1], [], []>} : vector<512x16xbf16>, vector<16x256xbf16>, vector<512x256xf32> -> vector<512x256xf32>
    %17 = arith.addf %10, %16 : vector<512x256xf32>
    %18 = vector.extract_strided_slice %4 {offsets = [1, 0], sizes = [256, 16], strides = [1, 1]} : vector<512x16xbf16> to vector<256x16xbf16>
    %19 = vector.extract_strided_slice %9 {offsets = [1, 0], sizes = [256, 16], strides = [1, 1]} : vector<512x16xbf16> to vector<256x16xbf16>
    %20 = tpu.concatenate %18, %19 in 0 : vector<256x16xbf16>, vector<256x16xbf16> -> vector<512x16xbf16>
    %c1 = arith.constant 1 : index
    %c0_15 = arith.constant 0 : index
    %c0_16 = arith.constant 0 : index
    %21 = vector.load %arg6[%c1, %c0_15, %c0_16] : memref<4x16x256xbf16, #tpu.memory_space<vmem>>, vector<1x16x256xbf16>
    %22 = vector.shape_cast %21 : vector<1x16x256xbf16> to vector<16x256xbf16>
    %cst_17 = arith.constant dense<0.000000e+00> : vector<512x256xf32>
    %23 = tpu.matmul %20, %22, %cst_17 {dimension_numbers = #tpu.dot_dimension_numbers<[1], [0], [0], [1], [0, 0, 1, 1], [], []>} : vector<512x16xbf16>, vector<16x256xbf16>, vector<512x256xf32> -> vector<512x256xf32>
    %24 = arith.addf %17, %23 : vector<512x256xf32>
    %25 = vector.extract_strided_slice %4 {offsets = [2, 0], sizes = [256, 16], strides = [1, 1]} : vector<512x16xbf16> to vector<256x16xbf16>
    %26 = vector.extract_strided_slice %9 {offsets = [2, 0], sizes = [256, 16], strides = [1, 1]} : vector<512x16xbf16> to vector<256x16xbf16>
    %27 = tpu.concatenate %25, %26 in 0 : vector<256x16xbf16>, vector<256x16xbf16> -> vector<512x16xbf16>
    %c2 = arith.constant 2 : index
    %c0_18 = arith.constant 0 : index
    %c0_19 = arith.constant 0 : index
    %28 = vector.load %arg6[%c2, %c0_18, %c0_19] : memref<4x16x256xbf16, #tpu.memory_space<vmem>>, vector<1x16x256xbf16>
    %29 = vector.shape_cast %28 : vector<1x16x256xbf16> to vector<16x256xbf16>
    %cst_20 = arith.constant dense<0.000000e+00> : vector<512x256xf32>
    %30 = tpu.matmul %27, %29, %cst_20 {dimension_numbers = #tpu.dot_dimension_numbers<[1], [0], [0], [1], [0, 0, 1, 1], [], []>} : vector<512x16xbf16>, vector<16x256xbf16>, vector<512x256xf32> -> vector<512x256xf32>
    %31 = arith.addf %24, %30 : vector<512x256xf32>
    %32 = vector.extract_strided_slice %4 {offsets = [3, 0], sizes = [256, 16], strides = [1, 1]} : vector<512x16xbf16> to vector<256x16xbf16>
    %33 = vector.extract_strided_slice %9 {offsets = [3, 0], sizes = [256, 16], strides = [1, 1]} : vector<512x16xbf16> to vector<256x16xbf16>
    %34 = tpu.concatenate %32, %33 in 0 : vector<256x16xbf16>, vector<256x16xbf16> -> vector<512x16xbf16>
    %c3 = arith.constant 3 : index
    %c0_21 = arith.constant 0 : index
    %c0_22 = arith.constant 0 : index
    %35 = vector.load %arg6[%c3, %c0_21, %c0_22] : memref<4x16x256xbf16, #tpu.memory_space<vmem>>, vector<1x16x256xbf16>
    %36 = vector.shape_cast %35 : vector<1x16x256xbf16> to vector<16x256xbf16>
    %cst_23 = arith.constant dense<0.000000e+00> : vector<512x256xf32>
    %37 = tpu.matmul %34, %36, %cst_23 {dimension_numbers = #tpu.dot_dimension_numbers<[1], [0], [0], [1], [0, 0, 1, 1], [], []>} : vector<512x16xbf16>, vector<16x256xbf16>, vector<512x256xf32> -> vector<512x256xf32>
    %38 = arith.addf %31, %37 : vector<512x256xf32>
    %c256_i32 = arith.constant 256 : i32
    %39 = arith.muli %arg1, %c256_i32 : i32
    %40 = tpu.iota {dimensions = array<i32: 0>} : vector<256x1xi32>
    %41 = vector.broadcast %39 : i32 to vector<256x1xi32>
    %42 = arith.addi %40, %41 : vector<256x1xi32>
    %c65_i32 = arith.constant 65 : i32
    %43 = vector.broadcast %c65_i32 : i32 to vector<256x1xi32>
    %44 = arith.cmpi slt, %42, %43 : vector<256x1xi32>
    %45 = arith.extui %44 : vector<256x1xi1> to vector<256x1xi32>
    %46 = arith.sitofp %45 : vector<256x1xi32> to vector<256x1xf32>
    %cst_24 = arith.constant 0.000000e+00 : f32
    %47 = vector.broadcast %cst_24 : f32 to vector<8x128xf32>
    %cst_25 = arith.constant 0.000000e+00 : f32
    %48 = vector.broadcast %cst_25 : f32 to vector<8x128xf32>
    %cst_26 = arith.constant 0.000000e+00 : f32
    %49 = vector.broadcast %cst_26 : f32 to vector<8x128xf32>
    %50 = vector.extract_strided_slice %38 {offsets = [0, 0], sizes = [8, 256], strides = [1, 1]} : vector<512x256xf32> to vector<8x256xf32>
    %51 = vector.extract_strided_slice %38 {offsets = [256, 0], sizes = [8, 256], strides = [1, 1]} : vector<512x256xf32> to vector<8x256xf32>
    %52 = vector.extract_strided_slice %46 {offsets = [0, 0], sizes = [8, 1], strides = [1, 1]} : vector<256x1xf32> to vector<8x1xf32>
    %53 = vector.extract_strided_slice %50 {offsets = [0, 0], sizes = [8, 128], strides = [1, 1]} : vector<8x256xf32> to vector<8x128xf32>
    %54 = vector.extract_strided_slice %50 {offsets = [0, 128], sizes = [8, 128], strides = [1, 1]} : vector<8x256xf32> to vector<8x128xf32>
    %55 = vector.extract_strided_slice %51 {offsets = [0, 0], sizes = [8, 128], strides = [1, 1]} : vector<8x256xf32> to vector<8x128xf32>
    %56 = vector.extract_strided_slice %51 {offsets = [0, 128], sizes = [8, 128], strides = [1, 1]} : vector<8x256xf32> to vector<8x128xf32>
    %57 = arith.mulf %53, %53 : vector<8x128xf32>
    %58 = arith.mulf %54, %54 : vector<8x128xf32>
    %59 = arith.addf %57, %58 : vector<8x128xf32>
    %60 = vector.broadcast %52 : vector<8x1xf32> to vector<8x128xf32>
    %61 = arith.mulf %59, %60 : vector<8x128xf32>
    %62 = arith.mulf %55, %55 : vector<8x128xf32>
    %63 = arith.mulf %56, %56 : vector<8x128xf32>
    %64 = arith.addf %62, %63 : vector<8x128xf32>
    %65 = vector.broadcast %52 : vector<8x1xf32> to vector<8x128xf32>
    %66 = arith.mulf %64, %65 : vector<8x128xf32>
    %cst_27 = arith.constant 9.99999982E-15 : f32
    %67 = vector.broadcast %cst_27 : f32 to vector<8x128xf32>
    %68 = arith.maximumf %61, %67 : vector<8x128xf32>
    %cst_28 = arith.constant 9.99999982E-15 : f32
    %69 = vector.broadcast %cst_28 : f32 to vector<8x128xf32>
    %70 = arith.maximumf %66, %69 : vector<8x128xf32>
    %71 = arith.addf %70, %68 : vector<8x128xf32>
    %72 = arith.mulf %70, %68 : vector<8x128xf32>
    %73 = math.sqrt %72 : vector<8x128xf32>
    %cst_29 = arith.constant 2.000000e+00 : f32
    %74 = vector.broadcast %cst_29 : f32 to vector<8x128xf32>
    %75 = arith.mulf %74, %73 : vector<8x128xf32>
    %76 = arith.subf %71, %75 : vector<8x128xf32>
    %77 = arith.addf %47, %76 : vector<8x128xf32>
    %78 = arith.addf %48, %66 : vector<8x128xf32>
    %79 = arith.divf %70, %68 : vector<8x128xf32>
    %80 = math.log %79 : vector<8x128xf32>
    %81 = math.absf %80 : vector<8x128xf32>
    %cst_30 = arith.constant 5.000000e-01 : f32
    %82 = vector.broadcast %cst_30 : f32 to vector<8x128xf32>
    %83 = arith.mulf %82, %81 : vector<8x128xf32>
    %84 = arith.addf %49, %83 : vector<8x128xf32>
    %85 = vector.extract_strided_slice %38 {offsets = [8, 0], sizes = [8, 256], strides = [1, 1]} : vector<512x256xf32> to vector<8x256xf32>
    %86 = vector.extract_strided_slice %38 {offsets = [264, 0], sizes = [8, 256], strides = [1, 1]} : vector<512x256xf32> to vector<8x256xf32>
    %87 = vector.extract_strided_slice %46 {offsets = [8, 0], sizes = [8, 1], strides = [1, 1]} : vector<256x1xf32> to vector<8x1xf32>
    %88 = vector.extract_strided_slice %85 {offsets = [0, 0], sizes = [8, 128], strides = [1, 1]} : vector<8x256xf32> to vector<8x128xf32>
    %89 = vector.extract_strided_slice %85 {offsets = [0, 128], sizes = [8, 128], strides = [1, 1]} : vector<8x256xf32> to vector<8x128xf32>
    %90 = vector.extract_strided_slice %86 {offsets = [0, 0], sizes = [8, 128], strides = [1, 1]} : vector<8x256xf32> to vector<8x128xf32>
    %91 = vector.extract_strided_slice %86 {offsets = [0, 128], sizes = [8, 128], strides = [1, 1]} : vector<8x256xf32> to vector<8x128xf32>
    %92 = arith.mulf %88, %88 : vector<8x128xf32>
    %93 = arith.mulf %89, %89 : vector<8x128xf32>
    %94 = arith.addf %92, %93 : vector<8x128xf32>
    %95 = vector.broadcast %87 : vector<8x1xf32> to vector<8x128xf32>
    %96 = arith.mulf %94, %95 : vector<8x128xf32>
    %97 = arith.mulf %90, %90 : vector<8x128xf32>
    %98 = arith.mulf %91, %91 : vector<8x128xf32>
    %99 = arith.addf %97, %98 : vector<8x128xf32>
    %100 = vector.broadcast %87 : vector<8x1xf32> to vector<8x128xf32>
    %101 = arith.mulf %99, %100 : vector<8x128xf32>
    %cst_31 = arith.constant 9.99999982E-15 : f32
    %102 = vector.broadcast %cst_31 : f32 to vector<8x128xf32>
    %103 = arith.maximumf %96, %102 : vector<8x128xf32>
    %cst_32 = arith.constant 9.99999982E-15 : f32
    %104 = vector.broadcast %cst_32 : f32 to vector<8x128xf32>
    %105 = arith.maximumf %101, %104 : vector<8x128xf32>
    %106 = arith.addf %105, %103 : vector<8x128xf32>
    %107 = arith.mulf %105, %103 : vector<8x128xf32>
    %108 = math.sqrt %107 : vector<8x128xf32>
    %cst_33 = arith.constant 2.000000e+00 : f32
    %109 = vector.broadcast %cst_33 : f32 to vector<8x128xf32>
    %110 = arith.mulf %109, %108 : vector<8x128xf32>
    %111 = arith.subf %106, %110 : vector<8x128xf32>
    %112 = arith.addf %77, %111 : vector<8x128xf32>
    %113 = arith.addf %78, %101 : vector<8x128xf32>
    %114 = arith.divf %105, %103 : vector<8x128xf32>
    %115 = math.log %114 : vector<8x128xf32>
    %116 = math.absf %115 : vector<8x128xf32>
    %cst_34 = arith.constant 5.000000e-01 : f32
    %117 = vector.broadcast %cst_34 : f32 to vector<8x128xf32>
    %118 = arith.mulf %117, %116 : vector<8x128xf32>
    %119 = arith.addf %84, %118 : vector<8x128xf32>
    %120 = vector.extract_strided_slice %38 {offsets = [16, 0], sizes = [8, 256], strides = [1, 1]} : vector<512x256xf32> to vector<8x256xf32>
    %121 = vector.extract_strided_slice %38 {offsets = [272, 0], sizes = [8, 256], strides = [1, 1]} : vector<512x256xf32> to vector<8x256xf32>
    %122 = vector.extract_strided_slice %46 {offsets = [16, 0], sizes = [8, 1], strides = [1, 1]} : vector<256x1xf32> to vector<8x1xf32>
    %123 = vector.extract_strided_slice %120 {offsets = [0, 0], sizes = [8, 128], strides = [1, 1]} : vector<8x256xf32> to vector<8x128xf32>
    %124 = vector.extract_strided_slice %120 {offsets = [0, 128], sizes = [8, 128], strides = [1, 1]} : vector<8x256xf32> to vector<8x128xf32>
    %125 = vector.extract_strided_slice %121 {offsets = [0, 0], sizes = [8, 128], strides = [1, 1]} : vector<8x256xf32> to vector<8x128xf32>
    %126 = vector.extract_strided_slice %121 {offsets = [0, 128], sizes = [8, 128], strides = [1, 1]} : vector<8x256xf32> to vector<8x128xf32>
    %127 = arith.mulf %123, %123 : vector<8x128xf32>
    %128 = arith.mulf %124, %124 : vector<8x128xf32>
    %129 = arith.addf %127, %128 : vector<8x128xf32>
    %130 = vector.broadcast %122 : vector<8x1xf32> to vector<8x128xf32>
    %131 = arith.mulf %129, %130 : vector<8x128xf32>
    %132 = arith.mulf %125, %125 : vector<8x128xf32>
    %133 = arith.mulf %126, %126 : vector<8x128xf32>
    %134 = arith.addf %132, %133 : vector<8x128xf32>
    %135 = vector.broadcast %122 : vector<8x1xf32> to vector<8x128xf32>
    %136 = arith.mulf %134, %135 : vector<8x128xf32>
    %cst_35 = arith.constant 9.99999982E-15 : f32
    %137 = vector.broadcast %cst_35 : f32 to vector<8x128xf32>
    %138 = arith.maximumf %131, %137 : vector<8x128xf32>
    %cst_36 = arith.constant 9.99999982E-15 : f32
    %139 = vector.broadcast %cst_36 : f32 to vector<8x128xf32>
    %140 = arith.maximumf %136, %139 : vector<8x128xf32>
    %141 = arith.addf %140, %138 : vector<8x128xf32>
    %142 = arith.mulf %140, %138 : vector<8x128xf32>
    %143 = math.sqrt %142 : vector<8x128xf32>
    %cst_37 = arith.constant 2.000000e+00 : f32
    %144 = vector.broadcast %cst_37 : f32 to vector<8x128xf32>
    %145 = arith.mulf %144, %143 : vector<8x128xf32>
    %146 = arith.subf %141, %145 : vector<8x128xf32>
    %147 = arith.addf %112, %146 : vector<8x128xf32>
    %148 = arith.addf %113, %136 : vector<8x128xf32>
    %149 = arith.divf %140, %138 : vector<8x128xf32>
    %150 = math.log %149 : vector<8x128xf32>
    %151 = math.absf %150 : vector<8x128xf32>
    %cst_38 = arith.constant 5.000000e-01 : f32
    %152 = vector.broadcast %cst_38 : f32 to vector<8x128xf32>
    %153 = arith.mulf %152, %151 : vector<8x128xf32>
    %154 = arith.addf %119, %153 : vector<8x128xf32>
    %155 = vector.extract_strided_slice %38 {offsets = [24, 0], sizes = [8, 256], strides = [1, 1]} : vector<512x256xf32> to vector<8x256xf32>
    %156 = vector.extract_strided_slice %38 {offsets = [280, 0], sizes = [8, 256], strides = [1, 1]} : vector<512x256xf32> to vector<8x256xf32>
    %157 = vector.extract_strided_slice %46 {offsets = [24, 0], sizes = [8, 1], strides = [1, 1]} : vector<256x1xf32> to vector<8x1xf32>
    %158 = vector.extract_strided_slice %155 {offsets = [0, 0], sizes = [8, 128], strides = [1, 1]} : vector<8x256xf32> to vector<8x128xf32>
    %159 = vector.extract_strided_slice %155 {offsets = [0, 128], sizes = [8, 128], strides = [1, 1]} : vector<8x256xf32> to vector<8x128xf32>
    %160 = vector.extract_strided_slice %156 {offsets = [0, 0], sizes = [8, 128], strides = [1, 1]} : vector<8x256xf32> to vector<8x128xf32>
    %161 = vector.extract_strided_slice %156 {offsets = [0, 128], sizes = [8, 128], strides = [1, 1]} : vector<8x256xf32> to vector<8x128xf32>
    %162 = arith.mulf %158, %158 : vector<8x128xf32>
    %163 = arith.mulf %159, %159 : vector<8x128xf32>
    %164 = arith.addf %162, %163 : vector<8x128xf32>
    %165 = vector.broadcast %157 : vector<8x1xf32> to vector<8x128xf32>
    %166 = arith.mulf %164, %165 : vector<8x128xf32>
    %167 = arith.mulf %160, %160 : vector<8x128xf32>
    %168 = arith.mulf %161, %161 : vector<8x128xf32>
    %169 = arith.addf %167, %168 : vector<8x128xf32>
    %170 = vector.broadcast %157 : vector<8x1xf32> to vector<8x128xf32>
    %171 = arith.mulf %169, %170 : vector<8x128xf32>
    %cst_39 = arith.constant 9.99999982E-15 : f32
    %172 = vector.broadcast %cst_39 : f32 to vector<8x128xf32>
    %173 = arith.maximumf %166, %172 : vector<8x128xf32>
    %cst_40 = arith.constant 9.99999982E-15 : f32
    %174 = vector.broadcast %cst_40 : f32 to vector<8x128xf32>
    %175 = arith.maximumf %171, %174 : vector<8x128xf32>
    %176 = arith.addf %175, %173 : vector<8x128xf32>
    %177 = arith.mulf %175, %173 : vector<8x128xf32>
    %178 = math.sqrt %177 : vector<8x128xf32>
    %cst_41 = arith.constant 2.000000e+00 : f32
    %179 = vector.broadcast %cst_41 : f32 to vector<8x128xf32>
    %180 = arith.mulf %179, %178 : vector<8x128xf32>
    %181 = arith.subf %176, %180 : vector<8x128xf32>
    %182 = arith.addf %147, %181 : vector<8x128xf32>
    %183 = arith.addf %148, %171 : vector<8x128xf32>
    %184 = arith.divf %175, %173 : vector<8x128xf32>
    %185 = math.log %184 : vector<8x128xf32>
    %186 = math.absf %185 : vector<8x128xf32>
    %cst_42 = arith.constant 5.000000e-01 : f32
    %187 = vector.broadcast %cst_42 : f32 to vector<8x128xf32>
    %188 = arith.mulf %187, %186 : vector<8x128xf32>
    %189 = arith.addf %154, %188 : vector<8x128xf32>
    %190 = vector.extract_strided_slice %38 {offsets = [32, 0], sizes = [8, 256], strides = [1, 1]} : vector<512x256xf32> to vector<8x256xf32>
    %191 = vector.extract_strided_slice %38 {offsets = [288, 0], sizes = [8, 256], strides = [1, 1]} : vector<512x256xf32> to vector<8x256xf32>
    %192 = vector.extract_strided_slice %46 {offsets = [32, 0], sizes = [8, 1], strides = [1, 1]} : vector<256x1xf32> to vector<8x1xf32>
    %193 = vector.extract_strided_slice %190 {offsets = [0, 0], sizes = [8, 128], strides = [1, 1]} : vector<8x256xf32> to vector<8x128xf32>
    %194 = vector.extract_strided_slice %190 {offsets = [0, 128], sizes = [8, 128], strides = [1, 1]} : vector<8x256xf32> to vector<8x128xf32>
    %195 = vector.extract_strided_slice %191 {offsets = [0, 0], sizes = [8, 128], strides = [1, 1]} : vector<8x256xf32> to vector<8x128xf32>
    %196 = vector.extract_strided_slice %191 {offsets = [0, 128], sizes = [8, 128], strides = [1, 1]} : vector<8x256xf32> to vector<8x128xf32>
    %197 = arith.mulf %193, %193 : vector<8x128xf32>
    %198 = arith.mulf %194, %194 : vector<8x128xf32>
    %199 = arith.addf %197, %198 : vector<8x128xf32>
    %200 = vector.broadcast %192 : vector<8x1xf32> to vector<8x128xf32>
    %201 = arith.mulf %199, %200 : vector<8x128xf32>
    %202 = arith.mulf %195, %195 : vector<8x128xf32>
    %203 = arith.mulf %196, %196 : vector<8x128xf32>
    %204 = arith.addf %202, %203 : vector<8x128xf32>
    %205 = vector.broadcast %192 : vector<8x1xf32> to vector<8x128xf32>
    %206 = arith.mulf %204, %205 : vector<8x128xf32>
    %cst_43 = arith.constant 9.99999982E-15 : f32
    %207 = vector.broadcast %cst_43 : f32 to vector<8x128xf32>
    %208 = arith.maximumf %201, %207 : vector<8x128xf32>
    %cst_44 = arith.constant 9.99999982E-15 : f32
    %209 = vector.broadcast %cst_44 : f32 to vector<8x128xf32>
    %210 = arith.maximumf %206, %209 : vector<8x128xf32>
    %211 = arith.addf %210, %208 : vector<8x128xf32>
    %212 = arith.mulf %210, %208 : vector<8x128xf32>
    %213 = math.sqrt %212 : vector<8x128xf32>
    %cst_45 = arith.constant 2.000000e+00 : f32
    %214 = vector.broadcast %cst_45 : f32 to vector<8x128xf32>
    %215 = arith.mulf %214, %213 : vector<8x128xf32>
    %216 = arith.subf %211, %215 : vector<8x128xf32>
    %217 = arith.addf %182, %216 : vector<8x128xf32>
    %218 = arith.addf %183, %206 : vector<8x128xf32>
    %219 = arith.divf %210, %208 : vector<8x128xf32>
    %220 = math.log %219 : vector<8x128xf32>
    %221 = math.absf %220 : vector<8x128xf32>
    %cst_46 = arith.constant 5.000000e-01 : f32
    %222 = vector.broadcast %cst_46 : f32 to vector<8x128xf32>
    %223 = arith.mulf %222, %221 : vector<8x128xf32>
    %224 = arith.addf %189, %223 : vector<8x128xf32>
    %225 = vector.extract_strided_slice %38 {offsets = [40, 0], sizes = [8, 256], strides = [1, 1]} : vector<512x256xf32> to vector<8x256xf32>
    %226 = vector.extract_strided_slice %38 {offsets = [296, 0], sizes = [8, 256], strides = [1, 1]} : vector<512x256xf32> to vector<8x256xf32>
    %227 = vector.extract_strided_slice %46 {offsets = [40, 0], sizes = [8, 1], strides = [1, 1]} : vector<256x1xf32> to vector<8x1xf32>
    %228 = vector.extract_strided_slice %225 {offsets = [0, 0], sizes = [8, 128], strides = [1, 1]} : vector<8x256xf32> to vector<8x128xf32>
    %229 = vector.extract_strided_slice %225 {offsets = [0, 128], sizes = [8, 128], strides = [1, 1]} : vector<8x256xf32> to vector<8x128xf32>
    %230 = vector.extract_strided_slice %226 {offsets = [0, 0], sizes = [8, 128], strides = [1, 1]} : vector<8x256xf32> to vector<8x128xf32>
    %231 = vector.extract_strided_slice %226 {offsets = [0, 128], sizes = [8, 128], strides = [1, 1]} : vector<8x256xf32> to vector<8x128xf32>
    %232 = arith.mulf %228, %228 : vector<8x128xf32>
    %233 = arith.mulf %229, %229 : vector<8x128xf32>
    %234 = arith.addf %232, %233 : vector<8x128xf32>
    %235 = vector.broadcast %227 : vector<8x1xf32> to vector<8x128xf32>
    %236 = arith.mulf %234, %235 : vector<8x128xf32>
    %237 = arith.mulf %230, %230 : vector<8x128xf32>
    %238 = arith.mulf %231, %231 : vector<8x128xf32>
    %239 = arith.addf %237, %238 : vector<8x128xf32>
    %240 = vector.broadcast %227 : vector<8x1xf32> to vector<8x128xf32>
    %241 = arith.mulf %239, %240 : vector<8x128xf32>
    %cst_47 = arith.constant 9.99999982E-15 : f32
    %242 = vector.broadcast %cst_47 : f32 to vector<8x128xf32>
    %243 = arith.maximumf %236, %242 : vector<8x128xf32>
    %cst_48 = arith.constant 9.99999982E-15 : f32
    %244 = vector.broadcast %cst_48 : f32 to vector<8x128xf32>
    %245 = arith.maximumf %241, %244 : vector<8x128xf32>
    %246 = arith.addf %245, %243 : vector<8x128xf32>
    %247 = arith.mulf %245, %243 : vector<8x128xf32>
    %248 = math.sqrt %247 : vector<8x128xf32>
    %cst_49 = arith.constant 2.000000e+00 : f32
    %249 = vector.broadcast %cst_49 : f32 to vector<8x128xf32>
    %250 = arith.mulf %249, %248 : vector<8x128xf32>
    %251 = arith.subf %246, %250 : vector<8x128xf32>
    %252 = arith.addf %217, %251 : vector<8x128xf32>
    %253 = arith.addf %218, %241 : vector<8x128xf32>
    %254 = arith.divf %245, %243 : vector<8x128xf32>
    %255 = math.log %254 : vector<8x128xf32>
    %256 = math.absf %255 : vector<8x128xf32>
    %cst_50 = arith.constant 5.000000e-01 : f32
    %257 = vector.broadcast %cst_50 : f32 to vector<8x128xf32>
    %258 = arith.mulf %257, %256 : vector<8x128xf32>
    %259 = arith.addf %224, %258 : vector<8x128xf32>
    %260 = vector.extract_strided_slice %38 {offsets = [48, 0], sizes = [8, 256], strides = [1, 1]} : vector<512x256xf32> to vector<8x256xf32>
    %261 = vector.extract_strided_slice %38 {offsets = [304, 0], sizes = [8, 256], strides = [1, 1]} : vector<512x256xf32> to vector<8x256xf32>
    %262 = vector.extract_strided_slice %46 {offsets = [48, 0], sizes = [8, 1], strides = [1, 1]} : vector<256x1xf32> to vector<8x1xf32>
    %263 = vector.extract_strided_slice %260 {offsets = [0, 0], sizes = [8, 128], strides = [1, 1]} : vector<8x256xf32> to vector<8x128xf32>
    %264 = vector.extract_strided_slice %260 {offsets = [0, 128], sizes = [8, 128], strides = [1, 1]} : vector<8x256xf32> to vector<8x128xf32>
    %265 = vector.extract_strided_slice %261 {offsets = [0, 0], sizes = [8, 128], strides = [1, 1]} : vector<8x256xf32> to vector<8x128xf32>
    %266 = vector.extract_strided_slice %261 {offsets = [0, 128], sizes = [8, 128], strides = [1, 1]} : vector<8x256xf32> to vector<8x128xf32>
    %267 = arith.mulf %263, %263 : vector<8x128xf32>
    %268 = arith.mulf %264, %264 : vector<8x128xf32>
    %269 = arith.addf %267, %268 : vector<8x128xf32>
    %270 = vector.broadcast %262 : vector<8x1xf32> to vector<8x128xf32>
    %271 = arith.mulf %269, %270 : vector<8x128xf32>
    %272 = arith.mulf %265, %265 : vector<8x128xf32>
    %273 = arith.mulf %266, %266 : vector<8x128xf32>
    %274 = arith.addf %272, %273 : vector<8x128xf32>
    %275 = vector.broadcast %262 : vector<8x1xf32> to vector<8x128xf32>
    %276 = arith.mulf %274, %275 : vector<8x128xf32>
    %cst_51 = arith.constant 9.99999982E-15 : f32
    %277 = vector.broadcast %cst_51 : f32 to vector<8x128xf32>
    %278 = arith.maximumf %271, %277 : vector<8x128xf32>
    %cst_52 = arith.constant 9.99999982E-15 : f32
    %279 = vector.broadcast %cst_52 : f32 to vector<8x128xf32>
    %280 = arith.maximumf %276, %279 : vector<8x128xf32>
    %281 = arith.addf %280, %278 : vector<8x128xf32>
    %282 = arith.mulf %280, %278 : vector<8x128xf32>
    %283 = math.sqrt %282 : vector<8x128xf32>
    %cst_53 = arith.constant 2.000000e+00 : f32
    %284 = vector.broadcast %cst_53 : f32 to vector<8x128xf32>
    %285 = arith.mulf %284, %283 : vector<8x128xf32>
    %286 = arith.subf %281, %285 : vector<8x128xf32>
    %287 = arith.addf %252, %286 : vector<8x128xf32>
    %288 = arith.addf %253, %276 : vector<8x128xf32>
    %289 = arith.divf %280, %278 : vector<8x128xf32>
    %290 = math.log %289 : vector<8x128xf32>
    %291 = math.absf %290 : vector<8x128xf32>
    %cst_54 = arith.constant 5.000000e-01 : f32
    %292 = vector.broadcast %cst_54 : f32 to vector<8x128xf32>
    %293 = arith.mulf %292, %291 : vector<8x128xf32>
    %294 = arith.addf %259, %293 : vector<8x128xf32>
    %295 = vector.extract_strided_slice %38 {offsets = [56, 0], sizes = [8, 256], strides = [1, 1]} : vector<512x256xf32> to vector<8x256xf32>
    %296 = vector.extract_strided_slice %38 {offsets = [312, 0], sizes = [8, 256], strides = [1, 1]} : vector<512x256xf32> to vector<8x256xf32>
    %297 = vector.extract_strided_slice %46 {offsets = [56, 0], sizes = [8, 1], strides = [1, 1]} : vector<256x1xf32> to vector<8x1xf32>
    %298 = vector.extract_strided_slice %295 {offsets = [0, 0], sizes = [8, 128], strides = [1, 1]} : vector<8x256xf32> to vector<8x128xf32>
    %299 = vector.extract_strided_slice %295 {offsets = [0, 128], sizes = [8, 128], strides = [1, 1]} : vector<8x256xf32> to vector<8x128xf32>
    %300 = vector.extract_strided_slice %296 {offsets = [0, 0], sizes = [8, 128], strides = [1, 1]} : vector<8x256xf32> to vector<8x128xf32>
    %301 = vector.extract_strided_slice %296 {offsets = [0, 128], sizes = [8, 128], strides = [1, 1]} : vector<8x256xf32> to vector<8x128xf32>
    %302 = arith.mulf %298, %298 : vector<8x128xf32>
    %303 = arith.mulf %299, %299 : vector<8x128xf32>
    %304 = arith.addf %302, %303 : vector<8x128xf32>
    %305 = vector.broadcast %297 : vector<8x1xf32> to vector<8x128xf32>
    %306 = arith.mulf %304, %305 : vector<8x128xf32>
    %307 = arith.mulf %300, %300 : vector<8x128xf32>
    %308 = arith.mulf %301, %301 : vector<8x128xf32>
    %309 = arith.addf %307, %308 : vector<8x128xf32>
    %310 = vector.broadcast %297 : vector<8x1xf32> to vector<8x128xf32>
    %311 = arith.mulf %309, %310 : vector<8x128xf32>
    %cst_55 = arith.constant 9.99999982E-15 : f32
    %312 = vector.broadcast %cst_55 : f32 to vector<8x128xf32>
    %313 = arith.maximumf %306, %312 : vector<8x128xf32>
    %cst_56 = arith.constant 9.99999982E-15 : f32
    %314 = vector.broadcast %cst_56 : f32 to vector<8x128xf32>
    %315 = arith.maximumf %311, %314 : vector<8x128xf32>
    %316 = arith.addf %315, %313 : vector<8x128xf32>
    %317 = arith.mulf %315, %313 : vector<8x128xf32>
    %318 = math.sqrt %317 : vector<8x128xf32>
    %cst_57 = arith.constant 2.000000e+00 : f32
    %319 = vector.broadcast %cst_57 : f32 to vector<8x128xf32>
    %320 = arith.mulf %319, %318 : vector<8x128xf32>
    %321 = arith.subf %316, %320 : vector<8x128xf32>
    %322 = arith.addf %287, %321 : vector<8x128xf32>
    %323 = arith.addf %288, %311 : vector<8x128xf32>
    %324 = arith.divf %315, %313 : vector<8x128xf32>
    %325 = math.log %324 : vector<8x128xf32>
    %326 = math.absf %325 : vector<8x128xf32>
    %cst_58 = arith.constant 5.000000e-01 : f32
    %327 = vector.broadcast %cst_58 : f32 to vector<8x128xf32>
    %328 = arith.mulf %327, %326 : vector<8x128xf32>
    %329 = arith.addf %294, %328 : vector<8x128xf32>
    %330 = vector.extract_strided_slice %38 {offsets = [64, 0], sizes = [8, 256], strides = [1, 1]} : vector<512x256xf32> to vector<8x256xf32>
    %331 = vector.extract_strided_slice %38 {offsets = [320, 0], sizes = [8, 256], strides = [1, 1]} : vector<512x256xf32> to vector<8x256xf32>
    %332 = vector.extract_strided_slice %46 {offsets = [64, 0], sizes = [8, 1], strides = [1, 1]} : vector<256x1xf32> to vector<8x1xf32>
    %333 = vector.extract_strided_slice %330 {offsets = [0, 0], sizes = [8, 128], strides = [1, 1]} : vector<8x256xf32> to vector<8x128xf32>
    %334 = vector.extract_strided_slice %330 {offsets = [0, 128], sizes = [8, 128], strides = [1, 1]} : vector<8x256xf32> to vector<8x128xf32>
    %335 = vector.extract_strided_slice %331 {offsets = [0, 0], sizes = [8, 128], strides = [1, 1]} : vector<8x256xf32> to vector<8x128xf32>
    %336 = vector.extract_strided_slice %331 {offsets = [0, 128], sizes = [8, 128], strides = [1, 1]} : vector<8x256xf32> to vector<8x128xf32>
    %337 = arith.mulf %333, %333 : vector<8x128xf32>
    %338 = arith.mulf %334, %334 : vector<8x128xf32>
    %339 = arith.addf %337, %338 : vector<8x128xf32>
    %340 = vector.broadcast %332 : vector<8x1xf32> to vector<8x128xf32>
    %341 = arith.mulf %339, %340 : vector<8x128xf32>
    %342 = arith.mulf %335, %335 : vector<8x128xf32>
    %343 = arith.mulf %336, %336 : vector<8x128xf32>
    %344 = arith.addf %342, %343 : vector<8x128xf32>
    %345 = vector.broadcast %332 : vector<8x1xf32> to vector<8x128xf32>
    %346 = arith.mulf %344, %345 : vector<8x128xf32>
    %cst_59 = arith.constant 9.99999982E-15 : f32
    %347 = vector.broadcast %cst_59 : f32 to vector<8x128xf32>
    %348 = arith.maximumf %341, %347 : vector<8x128xf32>
    %cst_60 = arith.constant 9.99999982E-15 : f32
    %349 = vector.broadcast %cst_60 : f32 to vector<8x128xf32>
    %350 = arith.maximumf %346, %349 : vector<8x128xf32>
    %351 = arith.addf %350, %348 : vector<8x128xf32>
    %352 = arith.mulf %350, %348 : vector<8x128xf32>
    %353 = math.sqrt %352 : vector<8x128xf32>
    %cst_61 = arith.constant 2.000000e+00 : f32
    %354 = vector.broadcast %cst_61 : f32 to vector<8x128xf32>
    %355 = arith.mulf %354, %353 : vector<8x128xf32>
    %356 = arith.subf %351, %355 : vector<8x128xf32>
    %357 = arith.addf %322, %356 : vector<8x128xf32>
    %358 = arith.addf %323, %346 : vector<8x128xf32>
    %359 = arith.divf %350, %348 : vector<8x128xf32>
    %360 = math.log %359 : vector<8x128xf32>
    %361 = math.absf %360 : vector<8x128xf32>
    %cst_62 = arith.constant 5.000000e-01 : f32
    %362 = vector.broadcast %cst_62 : f32 to vector<8x128xf32>
    %363 = arith.mulf %362, %361 : vector<8x128xf32>
    %364 = arith.addf %329, %363 : vector<8x128xf32>
    %365 = vector.extract_strided_slice %38 {offsets = [72, 0], sizes = [8, 256], strides = [1, 1]} : vector<512x256xf32> to vector<8x256xf32>
    %366 = vector.extract_strided_slice %38 {offsets = [328, 0], sizes = [8, 256], strides = [1, 1]} : vector<512x256xf32> to vector<8x256xf32>
    %367 = vector.extract_strided_slice %46 {offsets = [72, 0], sizes = [8, 1], strides = [1, 1]} : vector<256x1xf32> to vector<8x1xf32>
    %368 = vector.extract_strided_slice %365 {offsets = [0, 0], sizes = [8, 128], strides = [1, 1]} : vector<8x256xf32> to vector<8x128xf32>
    %369 = vector.extract_strided_slice %365 {offsets = [0, 128], sizes = [8, 128], strides = [1, 1]} : vector<8x256xf32> to vector<8x128xf32>
    %370 = vector.extract_strided_slice %366 {offsets = [0, 0], sizes = [8, 128], strides = [1, 1]} : vector<8x256xf32> to vector<8x128xf32>
    %371 = vector.extract_strided_slice %366 {offsets = [0, 128], sizes = [8, 128], strides = [1, 1]} : vector<8x256xf32> to vector<8x128xf32>
    %372 = arith.mulf %368, %368 : vector<8x128xf32>
    %373 = arith.mulf %369, %369 : vector<8x128xf32>
    %374 = arith.addf %372, %373 : vector<8x128xf32>
    %375 = vector.broadcast %367 : vector<8x1xf32> to vector<8x128xf32>
    %376 = arith.mulf %374, %375 : vector<8x128xf32>
    %377 = arith.mulf %370, %370 : vector<8x128xf32>
    %378 = arith.mulf %371, %371 : vector<8x128xf32>
    %379 = arith.addf %377, %378 : vector<8x128xf32>
    %380 = vector.broadcast %367 : vector<8x1xf32> to vector<8x128xf32>
    %381 = arith.mulf %379, %380 : vector<8x128xf32>
    %cst_63 = arith.constant 9.99999982E-15 : f32
    %382 = vector.broadcast %cst_63 : f32 to vector<8x128xf32>
    %383 = arith.maximumf %376, %382 : vector<8x128xf32>
    %cst_64 = arith.constant 9.99999982E-15 : f32
    %384 = vector.broadcast %cst_64 : f32 to vector<8x128xf32>
    %385 = arith.maximumf %381, %384 : vector<8x128xf32>
    %386 = arith.addf %385, %383 : vector<8x128xf32>
    %387 = arith.mulf %385, %383 : vector<8x128xf32>
    %388 = math.sqrt %387 : vector<8x128xf32>
    %cst_65 = arith.constant 2.000000e+00 : f32
    %389 = vector.broadcast %cst_65 : f32 to vector<8x128xf32>
    %390 = arith.mulf %389, %388 : vector<8x128xf32>
    %391 = arith.subf %386, %390 : vector<8x128xf32>
    %392 = arith.addf %357, %391 : vector<8x128xf32>
    %393 = arith.addf %358, %381 : vector<8x128xf32>
    %394 = arith.divf %385, %383 : vector<8x128xf32>
    %395 = math.log %394 : vector<8x128xf32>
    %396 = math.absf %395 : vector<8x128xf32>
    %cst_66 = arith.constant 5.000000e-01 : f32
    %397 = vector.broadcast %cst_66 : f32 to vector<8x128xf32>
    %398 = arith.mulf %397, %396 : vector<8x128xf32>
    %399 = arith.addf %364, %398 : vector<8x128xf32>
    %400 = vector.extract_strided_slice %38 {offsets = [80, 0], sizes = [8, 256], strides = [1, 1]} : vector<512x256xf32> to vector<8x256xf32>
    %401 = vector.extract_strided_slice %38 {offsets = [336, 0], sizes = [8, 256], strides = [1, 1]} : vector<512x256xf32> to vector<8x256xf32>
    %402 = vector.extract_strided_slice %46 {offsets = [80, 0], sizes = [8, 1], strides = [1, 1]} : vector<256x1xf32> to vector<8x1xf32>
    %403 = vector.extract_strided_slice %400 {offsets = [0, 0], sizes = [8, 128], strides = [1, 1]} : vector<8x256xf32> to vector<8x128xf32>
    %404 = vector.extract_strided_slice %400 {offsets = [0, 128], sizes = [8, 128], strides = [1, 1]} : vector<8x256xf32> to vector<8x128xf32>
    %405 = vector.extract_strided_slice %401 {offsets = [0, 0], sizes = [8, 128], strides = [1, 1]} : vector<8x256xf32> to vector<8x128xf32>
    %406 = vector.extract_strided_slice %401 {offsets = [0, 128], sizes = [8, 128], strides = [1, 1]} : vector<8x256xf32> to vector<8x128xf32>
    %407 = arith.mulf %403, %403 : vector<8x128xf32>
    %408 = arith.mulf %404, %404 : vector<8x128xf32>
    %409 = arith.addf %407, %408 : vector<8x128xf32>
    %410 = vector.broadcast %402 : vector<8x1xf32> to vector<8x128xf32>
    %411 = arith.mulf %409, %410 : vector<8x128xf32>
    %412 = arith.mulf %405, %405 : vector<8x128xf32>
    %413 = arith.mulf %406, %406 : vector<8x128xf32>
    %414 = arith.addf %412, %413 : vector<8x128xf32>
    %415 = vector.broadcast %402 : vector<8x1xf32> to vector<8x128xf32>
    %416 = arith.mulf %414, %415 : vector<8x128xf32>
    %cst_67 = arith.constant 9.99999982E-15 : f32
    %417 = vector.broadcast %cst_67 : f32 to vector<8x128xf32>
    %418 = arith.maximumf %411, %417 : vector<8x128xf32>
    %cst_68 = arith.constant 9.99999982E-15 : f32
    %419 = vector.broadcast %cst_68 : f32 to vector<8x128xf32>
    %420 = arith.maximumf %416, %419 : vector<8x128xf32>
    %421 = arith.addf %420, %418 : vector<8x128xf32>
    %422 = arith.mulf %420, %418 : vector<8x128xf32>
    %423 = math.sqrt %422 : vector<8x128xf32>
    %cst_69 = arith.constant 2.000000e+00 : f32
    %424 = vector.broadcast %cst_69 : f32 to vector<8x128xf32>
    %425 = arith.mulf %424, %423 : vector<8x128xf32>
    %426 = arith.subf %421, %425 : vector<8x128xf32>
    %427 = arith.addf %392, %426 : vector<8x128xf32>
    %428 = arith.addf %393, %416 : vector<8x128xf32>
    %429 = arith.divf %420, %418 : vector<8x128xf32>
    %430 = math.log %429 : vector<8x128xf32>
    %431 = math.absf %430 : vector<8x128xf32>
    %cst_70 = arith.constant 5.000000e-01 : f32
    %432 = vector.broadcast %cst_70 : f32 to vector<8x128xf32>
    %433 = arith.mulf %432, %431 : vector<8x128xf32>
    %434 = arith.addf %399, %433 : vector<8x128xf32>
    %435 = vector.extract_strided_slice %38 {offsets = [88, 0], sizes = [8, 256], strides = [1, 1]} : vector<512x256xf32> to vector<8x256xf32>
    %436 = vector.extract_strided_slice %38 {offsets = [344, 0], sizes = [8, 256], strides = [1, 1]} : vector<512x256xf32> to vector<8x256xf32>
    %437 = vector.extract_strided_slice %46 {offsets = [88, 0], sizes = [8, 1], strides = [1, 1]} : vector<256x1xf32> to vector<8x1xf32>
    %438 = vector.extract_strided_slice %435 {offsets = [0, 0], sizes = [8, 128], strides = [1, 1]} : vector<8x256xf32> to vector<8x128xf32>
    %439 = vector.extract_strided_slice %435 {offsets = [0, 128], sizes = [8, 128], strides = [1, 1]} : vector<8x256xf32> to vector<8x128xf32>
    %440 = vector.extract_strided_slice %436 {offsets = [0, 0], sizes = [8, 128], strides = [1, 1]} : vector<8x256xf32> to vector<8x128xf32>
    %441 = vector.extract_strided_slice %436 {offsets = [0, 128], sizes = [8, 128], strides = [1, 1]} : vector<8x256xf32> to vector<8x128xf32>
    %442 = arith.mulf %438, %438 : vector<8x128xf32>
    %443 = arith.mulf %439, %439 : vector<8x128xf32>
    %444 = arith.addf %442, %443 : vector<8x128xf32>
    %445 = vector.broadcast %437 : vector<8x1xf32> to vector<8x128xf32>
    %446 = arith.mulf %444, %445 : vector<8x128xf32>
    %447 = arith.mulf %440, %440 : vector<8x128xf32>
    %448 = arith.mulf %441, %441 : vector<8x128xf32>
    %449 = arith.addf %447, %448 : vector<8x128xf32>
    %450 = vector.broadcast %437 : vector<8x1xf32> to vector<8x128xf32>
    %451 = arith.mulf %449, %450 : vector<8x128xf32>
    %cst_71 = arith.constant 9.99999982E-15 : f32
    %452 = vector.broadcast %cst_71 : f32 to vector<8x128xf32>
    %453 = arith.maximumf %446, %452 : vector<8x128xf32>
    %cst_72 = arith.constant 9.99999982E-15 : f32
    %454 = vector.broadcast %cst_72 : f32 to vector<8x128xf32>
    %455 = arith.maximumf %451, %454 : vector<8x128xf32>
    %456 = arith.addf %455, %453 : vector<8x128xf32>
    %457 = arith.mulf %455, %453 : vector<8x128xf32>
    %458 = math.sqrt %457 : vector<8x128xf32>
    %cst_73 = arith.constant 2.000000e+00 : f32
    %459 = vector.broadcast %cst_73 : f32 to vector<8x128xf32>
    %460 = arith.mulf %459, %458 : vector<8x128xf32>
    %461 = arith.subf %456, %460 : vector<8x128xf32>
    %462 = arith.addf %427, %461 : vector<8x128xf32>
    %463 = arith.addf %428, %451 : vector<8x128xf32>
    %464 = arith.divf %455, %453 : vector<8x128xf32>
    %465 = math.log %464 : vector<8x128xf32>
    %466 = math.absf %465 : vector<8x128xf32>
    %cst_74 = arith.constant 5.000000e-01 : f32
    %467 = vector.broadcast %cst_74 : f32 to vector<8x128xf32>
    %468 = arith.mulf %467, %466 : vector<8x128xf32>
    %469 = arith.addf %434, %468 : vector<8x128xf32>
    %470 = vector.extract_strided_slice %38 {offsets = [96, 0], sizes = [8, 256], strides = [1, 1]} : vector<512x256xf32> to vector<8x256xf32>
    %471 = vector.extract_strided_slice %38 {offsets = [352, 0], sizes = [8, 256], strides = [1, 1]} : vector<512x256xf32> to vector<8x256xf32>
    %472 = vector.extract_strided_slice %46 {offsets = [96, 0], sizes = [8, 1], strides = [1, 1]} : vector<256x1xf32> to vector<8x1xf32>
    %473 = vector.extract_strided_slice %470 {offsets = [0, 0], sizes = [8, 128], strides = [1, 1]} : vector<8x256xf32> to vector<8x128xf32>
    %474 = vector.extract_strided_slice %470 {offsets = [0, 128], sizes = [8, 128], strides = [1, 1]} : vector<8x256xf32> to vector<8x128xf32>
    %475 = vector.extract_strided_slice %471 {offsets = [0, 0], sizes = [8, 128], strides = [1, 1]} : vector<8x256xf32> to vector<8x128xf32>
    %476 = vector.extract_strided_slice %471 {offsets = [0, 128], sizes = [8, 128], strides = [1, 1]} : vector<8x256xf32> to vector<8x128xf32>
    %477 = arith.mulf %473, %473 : vector<8x128xf32>
    %478 = arith.mulf %474, %474 : vector<8x128xf32>
    %479 = arith.addf %477, %478 : vector<8x128xf32>
    %480 = vector.broadcast %472 : vector<8x1xf32> to vector<8x128xf32>
    %481 = arith.mulf %479, %480 : vector<8x128xf32>
    %482 = arith.mulf %475, %475 : vector<8x128xf32>
    %483 = arith.mulf %476, %476 : vector<8x128xf32>
    %484 = arith.addf %482, %483 : vector<8x128xf32>
    %485 = vector.broadcast %472 : vector<8x1xf32> to vector<8x128xf32>
    %486 = arith.mulf %484, %485 : vector<8x128xf32>
    %cst_75 = arith.constant 9.99999982E-15 : f32
    %487 = vector.broadcast %cst_75 : f32 to vector<8x128xf32>
    %488 = arith.maximumf %481, %487 : vector<8x128xf32>
    %cst_76 = arith.constant 9.99999982E-15 : f32
    %489 = vector.broadcast %cst_76 : f32 to vector<8x128xf32>
    %490 = arith.maximumf %486, %489 : vector<8x128xf32>
    %491 = arith.addf %490, %488 : vector<8x128xf32>
    %492 = arith.mulf %490, %488 : vector<8x128xf32>
    %493 = math.sqrt %492 : vector<8x128xf32>
    %cst_77 = arith.constant 2.000000e+00 : f32
    %494 = vector.broadcast %cst_77 : f32 to vector<8x128xf32>
    %495 = arith.mulf %494, %493 : vector<8x128xf32>
    %496 = arith.subf %491, %495 : vector<8x128xf32>
    %497 = arith.addf %462, %496 : vector<8x128xf32>
    %498 = arith.addf %463, %486 : vector<8x128xf32>
    %499 = arith.divf %490, %488 : vector<8x128xf32>
    %500 = math.log %499 : vector<8x128xf32>
    %501 = math.absf %500 : vector<8x128xf32>
    %cst_78 = arith.constant 5.000000e-01 : f32
    %502 = vector.broadcast %cst_78 : f32 to vector<8x128xf32>
    %503 = arith.mulf %502, %501 : vector<8x128xf32>
    %504 = arith.addf %469, %503 : vector<8x128xf32>
    %505 = vector.extract_strided_slice %38 {offsets = [104, 0], sizes = [8, 256], strides = [1, 1]} : vector<512x256xf32> to vector<8x256xf32>
    %506 = vector.extract_strided_slice %38 {offsets = [360, 0], sizes = [8, 256], strides = [1, 1]} : vector<512x256xf32> to vector<8x256xf32>
    %507 = vector.extract_strided_slice %46 {offsets = [104, 0], sizes = [8, 1], strides = [1, 1]} : vector<256x1xf32> to vector<8x1xf32>
    %508 = vector.extract_strided_slice %505 {offsets = [0, 0], sizes = [8, 128], strides = [1, 1]} : vector<8x256xf32> to vector<8x128xf32>
    %509 = vector.extract_strided_slice %505 {offsets = [0, 128], sizes = [8, 128], strides = [1, 1]} : vector<8x256xf32> to vector<8x128xf32>
    %510 = vector.extract_strided_slice %506 {offsets = [0, 0], sizes = [8, 128], strides = [1, 1]} : vector<8x256xf32> to vector<8x128xf32>
    %511 = vector.extract_strided_slice %506 {offsets = [0, 128], sizes = [8, 128], strides = [1, 1]} : vector<8x256xf32> to vector<8x128xf32>
    %512 = arith.mulf %508, %508 : vector<8x128xf32>
    %513 = arith.mulf %509, %509 : vector<8x128xf32>
    %514 = arith.addf %512, %513 : vector<8x128xf32>
    %515 = vector.broadcast %507 : vector<8x1xf32> to vector<8x128xf32>
    %516 = arith.mulf %514, %515 : vector<8x128xf32>
    %517 = arith.mulf %510, %510 : vector<8x128xf32>
    %518 = arith.mulf %511, %511 : vector<8x128xf32>
    %519 = arith.addf %517, %518 : vector<8x128xf32>
    %520 = vector.broadcast %507 : vector<8x1xf32> to vector<8x128xf32>
    %521 = arith.mulf %519, %520 : vector<8x128xf32>
    %cst_79 = arith.constant 9.99999982E-15 : f32
    %522 = vector.broadcast %cst_79 : f32 to vector<8x128xf32>
    %523 = arith.maximumf %516, %522 : vector<8x128xf32>
    %cst_80 = arith.constant 9.99999982E-15 : f32
    %524 = vector.broadcast %cst_80 : f32 to vector<8x128xf32>
    %525 = arith.maximumf %521, %524 : vector<8x128xf32>
    %526 = arith.addf %525, %523 : vector<8x128xf32>
    %527 = arith.mulf %525, %523 : vector<8x128xf32>
    %528 = math.sqrt %527 : vector<8x128xf32>
    %cst_81 = arith.constant 2.000000e+00 : f32
    %529 = vector.broadcast %cst_81 : f32 to vector<8x128xf32>
    %530 = arith.mulf %529, %528 : vector<8x128xf32>
    %531 = arith.subf %526, %530 : vector<8x128xf32>
    %532 = arith.addf %497, %531 : vector<8x128xf32>
    %533 = arith.addf %498, %521 : vector<8x128xf32>
    %534 = arith.divf %525, %523 : vector<8x128xf32>
    %535 = math.log %534 : vector<8x128xf32>
    %536 = math.absf %535 : vector<8x128xf32>
    %cst_82 = arith.constant 5.000000e-01 : f32
    %537 = vector.broadcast %cst_82 : f32 to vector<8x128xf32>
    %538 = arith.mulf %537, %536 : vector<8x128xf32>
    %539 = arith.addf %504, %538 : vector<8x128xf32>
    %540 = vector.extract_strided_slice %38 {offsets = [112, 0], sizes = [8, 256], strides = [1, 1]} : vector<512x256xf32> to vector<8x256xf32>
    %541 = vector.extract_strided_slice %38 {offsets = [368, 0], sizes = [8, 256], strides = [1, 1]} : vector<512x256xf32> to vector<8x256xf32>
    %542 = vector.extract_strided_slice %46 {offsets = [112, 0], sizes = [8, 1], strides = [1, 1]} : vector<256x1xf32> to vector<8x1xf32>
    %543 = vector.extract_strided_slice %540 {offsets = [0, 0], sizes = [8, 128], strides = [1, 1]} : vector<8x256xf32> to vector<8x128xf32>
    %544 = vector.extract_strided_slice %540 {offsets = [0, 128], sizes = [8, 128], strides = [1, 1]} : vector<8x256xf32> to vector<8x128xf32>
    %545 = vector.extract_strided_slice %541 {offsets = [0, 0], sizes = [8, 128], strides = [1, 1]} : vector<8x256xf32> to vector<8x128xf32>
    %546 = vector.extract_strided_slice %541 {offsets = [0, 128], sizes = [8, 128], strides = [1, 1]} : vector<8x256xf32> to vector<8x128xf32>
    %547 = arith.mulf %543, %543 : vector<8x128xf32>
    %548 = arith.mulf %544, %544 : vector<8x128xf32>
    %549 = arith.addf %547, %548 : vector<8x128xf32>
    %550 = vector.broadcast %542 : vector<8x1xf32> to vector<8x128xf32>
    %551 = arith.mulf %549, %550 : vector<8x128xf32>
    %552 = arith.mulf %545, %545 : vector<8x128xf32>
    %553 = arith.mulf %546, %546 : vector<8x128xf32>
    %554 = arith.addf %552, %553 : vector<8x128xf32>
    %555 = vector.broadcast %542 : vector<8x1xf32> to vector<8x128xf32>
    %556 = arith.mulf %554, %555 : vector<8x128xf32>
    %cst_83 = arith.constant 9.99999982E-15 : f32
    %557 = vector.broadcast %cst_83 : f32 to vector<8x128xf32>
    %558 = arith.maximumf %551, %557 : vector<8x128xf32>
    %cst_84 = arith.constant 9.99999982E-15 : f32
    %559 = vector.broadcast %cst_84 : f32 to vector<8x128xf32>
    %560 = arith.maximumf %556, %559 : vector<8x128xf32>
    %561 = arith.addf %560, %558 : vector<8x128xf32>
    %562 = arith.mulf %560, %558 : vector<8x128xf32>
    %563 = math.sqrt %562 : vector<8x128xf32>
    %cst_85 = arith.constant 2.000000e+00 : f32
    %564 = vector.broadcast %cst_85 : f32 to vector<8x128xf32>
    %565 = arith.mulf %564, %563 : vector<8x128xf32>
    %566 = arith.subf %561, %565 : vector<8x128xf32>
    %567 = arith.addf %532, %566 : vector<8x128xf32>
    %568 = arith.addf %533, %556 : vector<8x128xf32>
    %569 = arith.divf %560, %558 : vector<8x128xf32>
    %570 = math.log %569 : vector<8x128xf32>
    %571 = math.absf %570 : vector<8x128xf32>
    %cst_86 = arith.constant 5.000000e-01 : f32
    %572 = vector.broadcast %cst_86 : f32 to vector<8x128xf32>
    %573 = arith.mulf %572, %571 : vector<8x128xf32>
    %574 = arith.addf %539, %573 : vector<8x128xf32>
    %575 = vector.extract_strided_slice %38 {offsets = [120, 0], sizes = [8, 256], strides = [1, 1]} : vector<512x256xf32> to vector<8x256xf32>
    %576 = vector.extract_strided_slice %38 {offsets = [376, 0], sizes = [8, 256], strides = [1, 1]} : vector<512x256xf32> to vector<8x256xf32>
    %577 = vector.extract_strided_slice %46 {offsets = [120, 0], sizes = [8, 1], strides = [1, 1]} : vector<256x1xf32> to vector<8x1xf32>
    %578 = vector.extract_strided_slice %575 {offsets = [0, 0], sizes = [8, 128], strides = [1, 1]} : vector<8x256xf32> to vector<8x128xf32>
    %579 = vector.extract_strided_slice %575 {offsets = [0, 128], sizes = [8, 128], strides = [1, 1]} : vector<8x256xf32> to vector<8x128xf32>
    %580 = vector.extract_strided_slice %576 {offsets = [0, 0], sizes = [8, 128], strides = [1, 1]} : vector<8x256xf32> to vector<8x128xf32>
    %581 = vector.extract_strided_slice %576 {offsets = [0, 128], sizes = [8, 128], strides = [1, 1]} : vector<8x256xf32> to vector<8x128xf32>
    %582 = arith.mulf %578, %578 : vector<8x128xf32>
    %583 = arith.mulf %579, %579 : vector<8x128xf32>
    %584 = arith.addf %582, %583 : vector<8x128xf32>
    %585 = vector.broadcast %577 : vector<8x1xf32> to vector<8x128xf32>
    %586 = arith.mulf %584, %585 : vector<8x128xf32>
    %587 = arith.mulf %580, %580 : vector<8x128xf32>
    %588 = arith.mulf %581, %581 : vector<8x128xf32>
    %589 = arith.addf %587, %588 : vector<8x128xf32>
    %590 = vector.broadcast %577 : vector<8x1xf32> to vector<8x128xf32>
    %591 = arith.mulf %589, %590 : vector<8x128xf32>
    %cst_87 = arith.constant 9.99999982E-15 : f32
    %592 = vector.broadcast %cst_87 : f32 to vector<8x128xf32>
    %593 = arith.maximumf %586, %592 : vector<8x128xf32>
    %cst_88 = arith.constant 9.99999982E-15 : f32
    %594 = vector.broadcast %cst_88 : f32 to vector<8x128xf32>
    %595 = arith.maximumf %591, %594 : vector<8x128xf32>
    %596 = arith.addf %595, %593 : vector<8x128xf32>
    %597 = arith.mulf %595, %593 : vector<8x128xf32>
    %598 = math.sqrt %597 : vector<8x128xf32>
    %cst_89 = arith.constant 2.000000e+00 : f32
    %599 = vector.broadcast %cst_89 : f32 to vector<8x128xf32>
    %600 = arith.mulf %599, %598 : vector<8x128xf32>
    %601 = arith.subf %596, %600 : vector<8x128xf32>
    %602 = arith.addf %567, %601 : vector<8x128xf32>
    %603 = arith.addf %568, %591 : vector<8x128xf32>
    %604 = arith.divf %595, %593 : vector<8x128xf32>
    %605 = math.log %604 : vector<8x128xf32>
    %606 = math.absf %605 : vector<8x128xf32>
    %cst_90 = arith.constant 5.000000e-01 : f32
    %607 = vector.broadcast %cst_90 : f32 to vector<8x128xf32>
    %608 = arith.mulf %607, %606 : vector<8x128xf32>
    %609 = arith.addf %574, %608 : vector<8x128xf32>
    %610 = vector.extract_strided_slice %38 {offsets = [128, 0], sizes = [8, 256], strides = [1, 1]} : vector<512x256xf32> to vector<8x256xf32>
    %611 = vector.extract_strided_slice %38 {offsets = [384, 0], sizes = [8, 256], strides = [1, 1]} : vector<512x256xf32> to vector<8x256xf32>
    %612 = vector.extract_strided_slice %46 {offsets = [128, 0], sizes = [8, 1], strides = [1, 1]} : vector<256x1xf32> to vector<8x1xf32>
    %613 = vector.extract_strided_slice %610 {offsets = [0, 0], sizes = [8, 128], strides = [1, 1]} : vector<8x256xf32> to vector<8x128xf32>
    %614 = vector.extract_strided_slice %610 {offsets = [0, 128], sizes = [8, 128], strides = [1, 1]} : vector<8x256xf32> to vector<8x128xf32>
    %615 = vector.extract_strided_slice %611 {offsets = [0, 0], sizes = [8, 128], strides = [1, 1]} : vector<8x256xf32> to vector<8x128xf32>
    %616 = vector.extract_strided_slice %611 {offsets = [0, 128], sizes = [8, 128], strides = [1, 1]} : vector<8x256xf32> to vector<8x128xf32>
    %617 = arith.mulf %613, %613 : vector<8x128xf32>
    %618 = arith.mulf %614, %614 : vector<8x128xf32>
    %619 = arith.addf %617, %618 : vector<8x128xf32>
    %620 = vector.broadcast %612 : vector<8x1xf32> to vector<8x128xf32>
    %621 = arith.mulf %619, %620 : vector<8x128xf32>
    %622 = arith.mulf %615, %615 : vector<8x128xf32>
    %623 = arith.mulf %616, %616 : vector<8x128xf32>
    %624 = arith.addf %622, %623 : vector<8x128xf32>
    %625 = vector.broadcast %612 : vector<8x1xf32> to vector<8x128xf32>
    %626 = arith.mulf %624, %625 : vector<8x128xf32>
    %cst_91 = arith.constant 9.99999982E-15 : f32
    %627 = vector.broadcast %cst_91 : f32 to vector<8x128xf32>
    %628 = arith.maximumf %621, %627 : vector<8x128xf32>
    %cst_92 = arith.constant 9.99999982E-15 : f32
    %629 = vector.broadcast %cst_92 : f32 to vector<8x128xf32>
    %630 = arith.maximumf %626, %629 : vector<8x128xf32>
    %631 = arith.addf %630, %628 : vector<8x128xf32>
    %632 = arith.mulf %630, %628 : vector<8x128xf32>
    %633 = math.sqrt %632 : vector<8x128xf32>
    %cst_93 = arith.constant 2.000000e+00 : f32
    %634 = vector.broadcast %cst_93 : f32 to vector<8x128xf32>
    %635 = arith.mulf %634, %633 : vector<8x128xf32>
    %636 = arith.subf %631, %635 : vector<8x128xf32>
    %637 = arith.addf %602, %636 : vector<8x128xf32>
    %638 = arith.addf %603, %626 : vector<8x128xf32>
    %639 = arith.divf %630, %628 : vector<8x128xf32>
    %640 = math.log %639 : vector<8x128xf32>
    %641 = math.absf %640 : vector<8x128xf32>
    %cst_94 = arith.constant 5.000000e-01 : f32
    %642 = vector.broadcast %cst_94 : f32 to vector<8x128xf32>
    %643 = arith.mulf %642, %641 : vector<8x128xf32>
    %644 = arith.addf %609, %643 : vector<8x128xf32>
    %645 = vector.extract_strided_slice %38 {offsets = [136, 0], sizes = [8, 256], strides = [1, 1]} : vector<512x256xf32> to vector<8x256xf32>
    %646 = vector.extract_strided_slice %38 {offsets = [392, 0], sizes = [8, 256], strides = [1, 1]} : vector<512x256xf32> to vector<8x256xf32>
    %647 = vector.extract_strided_slice %46 {offsets = [136, 0], sizes = [8, 1], strides = [1, 1]} : vector<256x1xf32> to vector<8x1xf32>
    %648 = vector.extract_strided_slice %645 {offsets = [0, 0], sizes = [8, 128], strides = [1, 1]} : vector<8x256xf32> to vector<8x128xf32>
    %649 = vector.extract_strided_slice %645 {offsets = [0, 128], sizes = [8, 128], strides = [1, 1]} : vector<8x256xf32> to vector<8x128xf32>
    %650 = vector.extract_strided_slice %646 {offsets = [0, 0], sizes = [8, 128], strides = [1, 1]} : vector<8x256xf32> to vector<8x128xf32>
    %651 = vector.extract_strided_slice %646 {offsets = [0, 128], sizes = [8, 128], strides = [1, 1]} : vector<8x256xf32> to vector<8x128xf32>
    %652 = arith.mulf %648, %648 : vector<8x128xf32>
    %653 = arith.mulf %649, %649 : vector<8x128xf32>
    %654 = arith.addf %652, %653 : vector<8x128xf32>
    %655 = vector.broadcast %647 : vector<8x1xf32> to vector<8x128xf32>
    %656 = arith.mulf %654, %655 : vector<8x128xf32>
    %657 = arith.mulf %650, %650 : vector<8x128xf32>
    %658 = arith.mulf %651, %651 : vector<8x128xf32>
    %659 = arith.addf %657, %658 : vector<8x128xf32>
    %660 = vector.broadcast %647 : vector<8x1xf32> to vector<8x128xf32>
    %661 = arith.mulf %659, %660 : vector<8x128xf32>
    %cst_95 = arith.constant 9.99999982E-15 : f32
    %662 = vector.broadcast %cst_95 : f32 to vector<8x128xf32>
    %663 = arith.maximumf %656, %662 : vector<8x128xf32>
    %cst_96 = arith.constant 9.99999982E-15 : f32
    %664 = vector.broadcast %cst_96 : f32 to vector<8x128xf32>
    %665 = arith.maximumf %661, %664 : vector<8x128xf32>
    %666 = arith.addf %665, %663 : vector<8x128xf32>
    %667 = arith.mulf %665, %663 : vector<8x128xf32>
    %668 = math.sqrt %667 : vector<8x128xf32>
    %cst_97 = arith.constant 2.000000e+00 : f32
    %669 = vector.broadcast %cst_97 : f32 to vector<8x128xf32>
    %670 = arith.mulf %669, %668 : vector<8x128xf32>
    %671 = arith.subf %666, %670 : vector<8x128xf32>
    %672 = arith.addf %637, %671 : vector<8x128xf32>
    %673 = arith.addf %638, %661 : vector<8x128xf32>
    %674 = arith.divf %665, %663 : vector<8x128xf32>
    %675 = math.log %674 : vector<8x128xf32>
    %676 = math.absf %675 : vector<8x128xf32>
    %cst_98 = arith.constant 5.000000e-01 : f32
    %677 = vector.broadcast %cst_98 : f32 to vector<8x128xf32>
    %678 = arith.mulf %677, %676 : vector<8x128xf32>
    %679 = arith.addf %644, %678 : vector<8x128xf32>
    %680 = vector.extract_strided_slice %38 {offsets = [144, 0], sizes = [8, 256], strides = [1, 1]} : vector<512x256xf32> to vector<8x256xf32>
    %681 = vector.extract_strided_slice %38 {offsets = [400, 0], sizes = [8, 256], strides = [1, 1]} : vector<512x256xf32> to vector<8x256xf32>
    %682 = vector.extract_strided_slice %46 {offsets = [144, 0], sizes = [8, 1], strides = [1, 1]} : vector<256x1xf32> to vector<8x1xf32>
    %683 = vector.extract_strided_slice %680 {offsets = [0, 0], sizes = [8, 128], strides = [1, 1]} : vector<8x256xf32> to vector<8x128xf32>
    %684 = vector.extract_strided_slice %680 {offsets = [0, 128], sizes = [8, 128], strides = [1, 1]} : vector<8x256xf32> to vector<8x128xf32>
    %685 = vector.extract_strided_slice %681 {offsets = [0, 0], sizes = [8, 128], strides = [1, 1]} : vector<8x256xf32> to vector<8x128xf32>
    %686 = vector.extract_strided_slice %681 {offsets = [0, 128], sizes = [8, 128], strides = [1, 1]} : vector<8x256xf32> to vector<8x128xf32>
    %687 = arith.mulf %683, %683 : vector<8x128xf32>
    %688 = arith.mulf %684, %684 : vector<8x128xf32>
    %689 = arith.addf %687, %688 : vector<8x128xf32>
    %690 = vector.broadcast %682 : vector<8x1xf32> to vector<8x128xf32>
    %691 = arith.mulf %689, %690 : vector<8x128xf32>
    %692 = arith.mulf %685, %685 : vector<8x128xf32>
    %693 = arith.mulf %686, %686 : vector<8x128xf32>
    %694 = arith.addf %692, %693 : vector<8x128xf32>
    %695 = vector.broadcast %682 : vector<8x1xf32> to vector<8x128xf32>
    %696 = arith.mulf %694, %695 : vector<8x128xf32>
    %cst_99 = arith.constant 9.99999982E-15 : f32
    %697 = vector.broadcast %cst_99 : f32 to vector<8x128xf32>
    %698 = arith.maximumf %691, %697 : vector<8x128xf32>
    %cst_100 = arith.constant 9.99999982E-15 : f32
    %699 = vector.broadcast %cst_100 : f32 to vector<8x128xf32>
    %700 = arith.maximumf %696, %699 : vector<8x128xf32>
    %701 = arith.addf %700, %698 : vector<8x128xf32>
    %702 = arith.mulf %700, %698 : vector<8x128xf32>
    %703 = math.sqrt %702 : vector<8x128xf32>
    %cst_101 = arith.constant 2.000000e+00 : f32
    %704 = vector.broadcast %cst_101 : f32 to vector<8x128xf32>
    %705 = arith.mulf %704, %703 : vector<8x128xf32>
    %706 = arith.subf %701, %705 : vector<8x128xf32>
    %707 = arith.addf %672, %706 : vector<8x128xf32>
    %708 = arith.addf %673, %696 : vector<8x128xf32>
    %709 = arith.divf %700, %698 : vector<8x128xf32>
    %710 = math.log %709 : vector<8x128xf32>
    %711 = math.absf %710 : vector<8x128xf32>
    %cst_102 = arith.constant 5.000000e-01 : f32
    %712 = vector.broadcast %cst_102 : f32 to vector<8x128xf32>
    %713 = arith.mulf %712, %711 : vector<8x128xf32>
    %714 = arith.addf %679, %713 : vector<8x128xf32>
    %715 = vector.extract_strided_slice %38 {offsets = [152, 0], sizes = [8, 256], strides = [1, 1]} : vector<512x256xf32> to vector<8x256xf32>
    %716 = vector.extract_strided_slice %38 {offsets = [408, 0], sizes = [8, 256], strides = [1, 1]} : vector<512x256xf32> to vector<8x256xf32>
    %717 = vector.extract_strided_slice %46 {offsets = [152, 0], sizes = [8, 1], strides = [1, 1]} : vector<256x1xf32> to vector<8x1xf32>
    %718 = vector.extract_strided_slice %715 {offsets = [0, 0], sizes = [8, 128], strides = [1, 1]} : vector<8x256xf32> to vector<8x128xf32>
    %719 = vector.extract_strided_slice %715 {offsets = [0, 128], sizes = [8, 128], strides = [1, 1]} : vector<8x256xf32> to vector<8x128xf32>
    %720 = vector.extract_strided_slice %716 {offsets = [0, 0], sizes = [8, 128], strides = [1, 1]} : vector<8x256xf32> to vector<8x128xf32>
    %721 = vector.extract_strided_slice %716 {offsets = [0, 128], sizes = [8, 128], strides = [1, 1]} : vector<8x256xf32> to vector<8x128xf32>
    %722 = arith.mulf %718, %718 : vector<8x128xf32>
    %723 = arith.mulf %719, %719 : vector<8x128xf32>
    %724 = arith.addf %722, %723 : vector<8x128xf32>
    %725 = vector.broadcast %717 : vector<8x1xf32> to vector<8x128xf32>
    %726 = arith.mulf %724, %725 : vector<8x128xf32>
    %727 = arith.mulf %720, %720 : vector<8x128xf32>
    %728 = arith.mulf %721, %721 : vector<8x128xf32>
    %729 = arith.addf %727, %728 : vector<8x128xf32>
    %730 = vector.broadcast %717 : vector<8x1xf32> to vector<8x128xf32>
    %731 = arith.mulf %729, %730 : vector<8x128xf32>
    %cst_103 = arith.constant 9.99999982E-15 : f32
    %732 = vector.broadcast %cst_103 : f32 to vector<8x128xf32>
    %733 = arith.maximumf %726, %732 : vector<8x128xf32>
    %cst_104 = arith.constant 9.99999982E-15 : f32
    %734 = vector.broadcast %cst_104 : f32 to vector<8x128xf32>
    %735 = arith.maximumf %731, %734 : vector<8x128xf32>
    %736 = arith.addf %735, %733 : vector<8x128xf32>
    %737 = arith.mulf %735, %733 : vector<8x128xf32>
    %738 = math.sqrt %737 : vector<8x128xf32>
    %cst_105 = arith.constant 2.000000e+00 : f32
    %739 = vector.broadcast %cst_105 : f32 to vector<8x128xf32>
    %740 = arith.mulf %739, %738 : vector<8x128xf32>
    %741 = arith.subf %736, %740 : vector<8x128xf32>
    %742 = arith.addf %707, %741 : vector<8x128xf32>
    %743 = arith.addf %708, %731 : vector<8x128xf32>
    %744 = arith.divf %735, %733 : vector<8x128xf32>
    %745 = math.log %744 : vector<8x128xf32>
    %746 = math.absf %745 : vector<8x128xf32>
    %cst_106 = arith.constant 5.000000e-01 : f32
    %747 = vector.broadcast %cst_106 : f32 to vector<8x128xf32>
    %748 = arith.mulf %747, %746 : vector<8x128xf32>
    %749 = arith.addf %714, %748 : vector<8x128xf32>
    %750 = vector.extract_strided_slice %38 {offsets = [160, 0], sizes = [8, 256], strides = [1, 1]} : vector<512x256xf32> to vector<8x256xf32>
    %751 = vector.extract_strided_slice %38 {offsets = [416, 0], sizes = [8, 256], strides = [1, 1]} : vector<512x256xf32> to vector<8x256xf32>
    %752 = vector.extract_strided_slice %46 {offsets = [160, 0], sizes = [8, 1], strides = [1, 1]} : vector<256x1xf32> to vector<8x1xf32>
    %753 = vector.extract_strided_slice %750 {offsets = [0, 0], sizes = [8, 128], strides = [1, 1]} : vector<8x256xf32> to vector<8x128xf32>
    %754 = vector.extract_strided_slice %750 {offsets = [0, 128], sizes = [8, 128], strides = [1, 1]} : vector<8x256xf32> to vector<8x128xf32>
    %755 = vector.extract_strided_slice %751 {offsets = [0, 0], sizes = [8, 128], strides = [1, 1]} : vector<8x256xf32> to vector<8x128xf32>
    %756 = vector.extract_strided_slice %751 {offsets = [0, 128], sizes = [8, 128], strides = [1, 1]} : vector<8x256xf32> to vector<8x128xf32>
    %757 = arith.mulf %753, %753 : vector<8x128xf32>
    %758 = arith.mulf %754, %754 : vector<8x128xf32>
    %759 = arith.addf %757, %758 : vector<8x128xf32>
    %760 = vector.broadcast %752 : vector<8x1xf32> to vector<8x128xf32>
    %761 = arith.mulf %759, %760 : vector<8x128xf32>
    %762 = arith.mulf %755, %755 : vector<8x128xf32>
    %763 = arith.mulf %756, %756 : vector<8x128xf32>
    %764 = arith.addf %762, %763 : vector<8x128xf32>
    %765 = vector.broadcast %752 : vector<8x1xf32> to vector<8x128xf32>
    %766 = arith.mulf %764, %765 : vector<8x128xf32>
    %cst_107 = arith.constant 9.99999982E-15 : f32
    %767 = vector.broadcast %cst_107 : f32 to vector<8x128xf32>
    %768 = arith.maximumf %761, %767 : vector<8x128xf32>
    %cst_108 = arith.constant 9.99999982E-15 : f32
    %769 = vector.broadcast %cst_108 : f32 to vector<8x128xf32>
    %770 = arith.maximumf %766, %769 : vector<8x128xf32>
    %771 = arith.addf %770, %768 : vector<8x128xf32>
    %772 = arith.mulf %770, %768 : vector<8x128xf32>
    %773 = math.sqrt %772 : vector<8x128xf32>
    %cst_109 = arith.constant 2.000000e+00 : f32
    %774 = vector.broadcast %cst_109 : f32 to vector<8x128xf32>
    %775 = arith.mulf %774, %773 : vector<8x128xf32>
    %776 = arith.subf %771, %775 : vector<8x128xf32>
    %777 = arith.addf %742, %776 : vector<8x128xf32>
    %778 = arith.addf %743, %766 : vector<8x128xf32>
    %779 = arith.divf %770, %768 : vector<8x128xf32>
    %780 = math.log %779 : vector<8x128xf32>
    %781 = math.absf %780 : vector<8x128xf32>
    %cst_110 = arith.constant 5.000000e-01 : f32
    %782 = vector.broadcast %cst_110 : f32 to vector<8x128xf32>
    %783 = arith.mulf %782, %781 : vector<8x128xf32>
    %784 = arith.addf %749, %783 : vector<8x128xf32>
    %785 = vector.extract_strided_slice %38 {offsets = [168, 0], sizes = [8, 256], strides = [1, 1]} : vector<512x256xf32> to vector<8x256xf32>
    %786 = vector.extract_strided_slice %38 {offsets = [424, 0], sizes = [8, 256], strides = [1, 1]} : vector<512x256xf32> to vector<8x256xf32>
    %787 = vector.extract_strided_slice %46 {offsets = [168, 0], sizes = [8, 1], strides = [1, 1]} : vector<256x1xf32> to vector<8x1xf32>
    %788 = vector.extract_strided_slice %785 {offsets = [0, 0], sizes = [8, 128], strides = [1, 1]} : vector<8x256xf32> to vector<8x128xf32>
    %789 = vector.extract_strided_slice %785 {offsets = [0, 128], sizes = [8, 128], strides = [1, 1]} : vector<8x256xf32> to vector<8x128xf32>
    %790 = vector.extract_strided_slice %786 {offsets = [0, 0], sizes = [8, 128], strides = [1, 1]} : vector<8x256xf32> to vector<8x128xf32>
    %791 = vector.extract_strided_slice %786 {offsets = [0, 128], sizes = [8, 128], strides = [1, 1]} : vector<8x256xf32> to vector<8x128xf32>
    %792 = arith.mulf %788, %788 : vector<8x128xf32>
    %793 = arith.mulf %789, %789 : vector<8x128xf32>
    %794 = arith.addf %792, %793 : vector<8x128xf32>
    %795 = vector.broadcast %787 : vector<8x1xf32> to vector<8x128xf32>
    %796 = arith.mulf %794, %795 : vector<8x128xf32>
    %797 = arith.mulf %790, %790 : vector<8x128xf32>
    %798 = arith.mulf %791, %791 : vector<8x128xf32>
    %799 = arith.addf %797, %798 : vector<8x128xf32>
    %800 = vector.broadcast %787 : vector<8x1xf32> to vector<8x128xf32>
    %801 = arith.mulf %799, %800 : vector<8x128xf32>
    %cst_111 = arith.constant 9.99999982E-15 : f32
    %802 = vector.broadcast %cst_111 : f32 to vector<8x128xf32>
    %803 = arith.maximumf %796, %802 : vector<8x128xf32>
    %cst_112 = arith.constant 9.99999982E-15 : f32
    %804 = vector.broadcast %cst_112 : f32 to vector<8x128xf32>
    %805 = arith.maximumf %801, %804 : vector<8x128xf32>
    %806 = arith.addf %805, %803 : vector<8x128xf32>
    %807 = arith.mulf %805, %803 : vector<8x128xf32>
    %808 = math.sqrt %807 : vector<8x128xf32>
    %cst_113 = arith.constant 2.000000e+00 : f32
    %809 = vector.broadcast %cst_113 : f32 to vector<8x128xf32>
    %810 = arith.mulf %809, %808 : vector<8x128xf32>
    %811 = arith.subf %806, %810 : vector<8x128xf32>
    %812 = arith.addf %777, %811 : vector<8x128xf32>
    %813 = arith.addf %778, %801 : vector<8x128xf32>
    %814 = arith.divf %805, %803 : vector<8x128xf32>
    %815 = math.log %814 : vector<8x128xf32>
    %816 = math.absf %815 : vector<8x128xf32>
    %cst_114 = arith.constant 5.000000e-01 : f32
    %817 = vector.broadcast %cst_114 : f32 to vector<8x128xf32>
    %818 = arith.mulf %817, %816 : vector<8x128xf32>
    %819 = arith.addf %784, %818 : vector<8x128xf32>
    %820 = vector.extract_strided_slice %38 {offsets = [176, 0], sizes = [8, 256], strides = [1, 1]} : vector<512x256xf32> to vector<8x256xf32>
    %821 = vector.extract_strided_slice %38 {offsets = [432, 0], sizes = [8, 256], strides = [1, 1]} : vector<512x256xf32> to vector<8x256xf32>
    %822 = vector.extract_strided_slice %46 {offsets = [176, 0], sizes = [8, 1], strides = [1, 1]} : vector<256x1xf32> to vector<8x1xf32>
    %823 = vector.extract_strided_slice %820 {offsets = [0, 0], sizes = [8, 128], strides = [1, 1]} : vector<8x256xf32> to vector<8x128xf32>
    %824 = vector.extract_strided_slice %820 {offsets = [0, 128], sizes = [8, 128], strides = [1, 1]} : vector<8x256xf32> to vector<8x128xf32>
    %825 = vector.extract_strided_slice %821 {offsets = [0, 0], sizes = [8, 128], strides = [1, 1]} : vector<8x256xf32> to vector<8x128xf32>
    %826 = vector.extract_strided_slice %821 {offsets = [0, 128], sizes = [8, 128], strides = [1, 1]} : vector<8x256xf32> to vector<8x128xf32>
    %827 = arith.mulf %823, %823 : vector<8x128xf32>
    %828 = arith.mulf %824, %824 : vector<8x128xf32>
    %829 = arith.addf %827, %828 : vector<8x128xf32>
    %830 = vector.broadcast %822 : vector<8x1xf32> to vector<8x128xf32>
    %831 = arith.mulf %829, %830 : vector<8x128xf32>
    %832 = arith.mulf %825, %825 : vector<8x128xf32>
    %833 = arith.mulf %826, %826 : vector<8x128xf32>
    %834 = arith.addf %832, %833 : vector<8x128xf32>
    %835 = vector.broadcast %822 : vector<8x1xf32> to vector<8x128xf32>
    %836 = arith.mulf %834, %835 : vector<8x128xf32>
    %cst_115 = arith.constant 9.99999982E-15 : f32
    %837 = vector.broadcast %cst_115 : f32 to vector<8x128xf32>
    %838 = arith.maximumf %831, %837 : vector<8x128xf32>
    %cst_116 = arith.constant 9.99999982E-15 : f32
    %839 = vector.broadcast %cst_116 : f32 to vector<8x128xf32>
    %840 = arith.maximumf %836, %839 : vector<8x128xf32>
    %841 = arith.addf %840, %838 : vector<8x128xf32>
    %842 = arith.mulf %840, %838 : vector<8x128xf32>
    %843 = math.sqrt %842 : vector<8x128xf32>
    %cst_117 = arith.constant 2.000000e+00 : f32
    %844 = vector.broadcast %cst_117 : f32 to vector<8x128xf32>
    %845 = arith.mulf %844, %843 : vector<8x128xf32>
    %846 = arith.subf %841, %845 : vector<8x128xf32>
    %847 = arith.addf %812, %846 : vector<8x128xf32>
    %848 = arith.addf %813, %836 : vector<8x128xf32>
    %849 = arith.divf %840, %838 : vector<8x128xf32>
    %850 = math.log %849 : vector<8x128xf32>
    %851 = math.absf %850 : vector<8x128xf32>
    %cst_118 = arith.constant 5.000000e-01 : f32
    %852 = vector.broadcast %cst_118 : f32 to vector<8x128xf32>
    %853 = arith.mulf %852, %851 : vector<8x128xf32>
    %854 = arith.addf %819, %853 : vector<8x128xf32>
    %855 = vector.extract_strided_slice %38 {offsets = [184, 0], sizes = [8, 256], strides = [1, 1]} : vector<512x256xf32> to vector<8x256xf32>
    %856 = vector.extract_strided_slice %38 {offsets = [440, 0], sizes = [8, 256], strides = [1, 1]} : vector<512x256xf32> to vector<8x256xf32>
    %857 = vector.extract_strided_slice %46 {offsets = [184, 0], sizes = [8, 1], strides = [1, 1]} : vector<256x1xf32> to vector<8x1xf32>
    %858 = vector.extract_strided_slice %855 {offsets = [0, 0], sizes = [8, 128], strides = [1, 1]} : vector<8x256xf32> to vector<8x128xf32>
    %859 = vector.extract_strided_slice %855 {offsets = [0, 128], sizes = [8, 128], strides = [1, 1]} : vector<8x256xf32> to vector<8x128xf32>
    %860 = vector.extract_strided_slice %856 {offsets = [0, 0], sizes = [8, 128], strides = [1, 1]} : vector<8x256xf32> to vector<8x128xf32>
    %861 = vector.extract_strided_slice %856 {offsets = [0, 128], sizes = [8, 128], strides = [1, 1]} : vector<8x256xf32> to vector<8x128xf32>
    %862 = arith.mulf %858, %858 : vector<8x128xf32>
    %863 = arith.mulf %859, %859 : vector<8x128xf32>
    %864 = arith.addf %862, %863 : vector<8x128xf32>
    %865 = vector.broadcast %857 : vector<8x1xf32> to vector<8x128xf32>
    %866 = arith.mulf %864, %865 : vector<8x128xf32>
    %867 = arith.mulf %860, %860 : vector<8x128xf32>
    %868 = arith.mulf %861, %861 : vector<8x128xf32>
    %869 = arith.addf %867, %868 : vector<8x128xf32>
    %870 = vector.broadcast %857 : vector<8x1xf32> to vector<8x128xf32>
    %871 = arith.mulf %869, %870 : vector<8x128xf32>
    %cst_119 = arith.constant 9.99999982E-15 : f32
    %872 = vector.broadcast %cst_119 : f32 to vector<8x128xf32>
    %873 = arith.maximumf %866, %872 : vector<8x128xf32>
    %cst_120 = arith.constant 9.99999982E-15 : f32
    %874 = vector.broadcast %cst_120 : f32 to vector<8x128xf32>
    %875 = arith.maximumf %871, %874 : vector<8x128xf32>
    %876 = arith.addf %875, %873 : vector<8x128xf32>
    %877 = arith.mulf %875, %873 : vector<8x128xf32>
    %878 = math.sqrt %877 : vector<8x128xf32>
    %cst_121 = arith.constant 2.000000e+00 : f32
    %879 = vector.broadcast %cst_121 : f32 to vector<8x128xf32>
    %880 = arith.mulf %879, %878 : vector<8x128xf32>
    %881 = arith.subf %876, %880 : vector<8x128xf32>
    %882 = arith.addf %847, %881 : vector<8x128xf32>
    %883 = arith.addf %848, %871 : vector<8x128xf32>
    %884 = arith.divf %875, %873 : vector<8x128xf32>
    %885 = math.log %884 : vector<8x128xf32>
    %886 = math.absf %885 : vector<8x128xf32>
    %cst_122 = arith.constant 5.000000e-01 : f32
    %887 = vector.broadcast %cst_122 : f32 to vector<8x128xf32>
    %888 = arith.mulf %887, %886 : vector<8x128xf32>
    %889 = arith.addf %854, %888 : vector<8x128xf32>
    %890 = vector.extract_strided_slice %38 {offsets = [192, 0], sizes = [8, 256], strides = [1, 1]} : vector<512x256xf32> to vector<8x256xf32>
    %891 = vector.extract_strided_slice %38 {offsets = [448, 0], sizes = [8, 256], strides = [1, 1]} : vector<512x256xf32> to vector<8x256xf32>
    %892 = vector.extract_strided_slice %46 {offsets = [192, 0], sizes = [8, 1], strides = [1, 1]} : vector<256x1xf32> to vector<8x1xf32>
    %893 = vector.extract_strided_slice %890 {offsets = [0, 0], sizes = [8, 128], strides = [1, 1]} : vector<8x256xf32> to vector<8x128xf32>
    %894 = vector.extract_strided_slice %890 {offsets = [0, 128], sizes = [8, 128], strides = [1, 1]} : vector<8x256xf32> to vector<8x128xf32>
    %895 = vector.extract_strided_slice %891 {offsets = [0, 0], sizes = [8, 128], strides = [1, 1]} : vector<8x256xf32> to vector<8x128xf32>
    %896 = vector.extract_strided_slice %891 {offsets = [0, 128], sizes = [8, 128], strides = [1, 1]} : vector<8x256xf32> to vector<8x128xf32>
    %897 = arith.mulf %893, %893 : vector<8x128xf32>
    %898 = arith.mulf %894, %894 : vector<8x128xf32>
    %899 = arith.addf %897, %898 : vector<8x128xf32>
    %900 = vector.broadcast %892 : vector<8x1xf32> to vector<8x128xf32>
    %901 = arith.mulf %899, %900 : vector<8x128xf32>
    %902 = arith.mulf %895, %895 : vector<8x128xf32>
    %903 = arith.mulf %896, %896 : vector<8x128xf32>
    %904 = arith.addf %902, %903 : vector<8x128xf32>
    %905 = vector.broadcast %892 : vector<8x1xf32> to vector<8x128xf32>
    %906 = arith.mulf %904, %905 : vector<8x128xf32>
    %cst_123 = arith.constant 9.99999982E-15 : f32
    %907 = vector.broadcast %cst_123 : f32 to vector<8x128xf32>
    %908 = arith.maximumf %901, %907 : vector<8x128xf32>
    %cst_124 = arith.constant 9.99999982E-15 : f32
    %909 = vector.broadcast %cst_124 : f32 to vector<8x128xf32>
    %910 = arith.maximumf %906, %909 : vector<8x128xf32>
    %911 = arith.addf %910, %908 : vector<8x128xf32>
    %912 = arith.mulf %910, %908 : vector<8x128xf32>
    %913 = math.sqrt %912 : vector<8x128xf32>
    %cst_125 = arith.constant 2.000000e+00 : f32
    %914 = vector.broadcast %cst_125 : f32 to vector<8x128xf32>
    %915 = arith.mulf %914, %913 : vector<8x128xf32>
    %916 = arith.subf %911, %915 : vector<8x128xf32>
    %917 = arith.addf %882, %916 : vector<8x128xf32>
    %918 = arith.addf %883, %906 : vector<8x128xf32>
    %919 = arith.divf %910, %908 : vector<8x128xf32>
    %920 = math.log %919 : vector<8x128xf32>
    %921 = math.absf %920 : vector<8x128xf32>
    %cst_126 = arith.constant 5.000000e-01 : f32
    %922 = vector.broadcast %cst_126 : f32 to vector<8x128xf32>
    %923 = arith.mulf %922, %921 : vector<8x128xf32>
    %924 = arith.addf %889, %923 : vector<8x128xf32>
    %925 = vector.extract_strided_slice %38 {offsets = [200, 0], sizes = [8, 256], strides = [1, 1]} : vector<512x256xf32> to vector<8x256xf32>
    %926 = vector.extract_strided_slice %38 {offsets = [456, 0], sizes = [8, 256], strides = [1, 1]} : vector<512x256xf32> to vector<8x256xf32>
    %927 = vector.extract_strided_slice %46 {offsets = [200, 0], sizes = [8, 1], strides = [1, 1]} : vector<256x1xf32> to vector<8x1xf32>
    %928 = vector.extract_strided_slice %925 {offsets = [0, 0], sizes = [8, 128], strides = [1, 1]} : vector<8x256xf32> to vector<8x128xf32>
    %929 = vector.extract_strided_slice %925 {offsets = [0, 128], sizes = [8, 128], strides = [1, 1]} : vector<8x256xf32> to vector<8x128xf32>
    %930 = vector.extract_strided_slice %926 {offsets = [0, 0], sizes = [8, 128], strides = [1, 1]} : vector<8x256xf32> to vector<8x128xf32>
    %931 = vector.extract_strided_slice %926 {offsets = [0, 128], sizes = [8, 128], strides = [1, 1]} : vector<8x256xf32> to vector<8x128xf32>
    %932 = arith.mulf %928, %928 : vector<8x128xf32>
    %933 = arith.mulf %929, %929 : vector<8x128xf32>
    %934 = arith.addf %932, %933 : vector<8x128xf32>
    %935 = vector.broadcast %927 : vector<8x1xf32> to vector<8x128xf32>
    %936 = arith.mulf %934, %935 : vector<8x128xf32>
    %937 = arith.mulf %930, %930 : vector<8x128xf32>
    %938 = arith.mulf %931, %931 : vector<8x128xf32>
    %939 = arith.addf %937, %938 : vector<8x128xf32>
    %940 = vector.broadcast %927 : vector<8x1xf32> to vector<8x128xf32>
    %941 = arith.mulf %939, %940 : vector<8x128xf32>
    %cst_127 = arith.constant 9.99999982E-15 : f32
    %942 = vector.broadcast %cst_127 : f32 to vector<8x128xf32>
    %943 = arith.maximumf %936, %942 : vector<8x128xf32>
    %cst_128 = arith.constant 9.99999982E-15 : f32
    %944 = vector.broadcast %cst_128 : f32 to vector<8x128xf32>
    %945 = arith.maximumf %941, %944 : vector<8x128xf32>
    %946 = arith.addf %945, %943 : vector<8x128xf32>
    %947 = arith.mulf %945, %943 : vector<8x128xf32>
    %948 = math.sqrt %947 : vector<8x128xf32>
    %cst_129 = arith.constant 2.000000e+00 : f32
    %949 = vector.broadcast %cst_129 : f32 to vector<8x128xf32>
    %950 = arith.mulf %949, %948 : vector<8x128xf32>
    %951 = arith.subf %946, %950 : vector<8x128xf32>
    %952 = arith.addf %917, %951 : vector<8x128xf32>
    %953 = arith.addf %918, %941 : vector<8x128xf32>
    %954 = arith.divf %945, %943 : vector<8x128xf32>
    %955 = math.log %954 : vector<8x128xf32>
    %956 = math.absf %955 : vector<8x128xf32>
    %cst_130 = arith.constant 5.000000e-01 : f32
    %957 = vector.broadcast %cst_130 : f32 to vector<8x128xf32>
    %958 = arith.mulf %957, %956 : vector<8x128xf32>
    %959 = arith.addf %924, %958 : vector<8x128xf32>
    %960 = vector.extract_strided_slice %38 {offsets = [208, 0], sizes = [8, 256], strides = [1, 1]} : vector<512x256xf32> to vector<8x256xf32>
    %961 = vector.extract_strided_slice %38 {offsets = [464, 0], sizes = [8, 256], strides = [1, 1]} : vector<512x256xf32> to vector<8x256xf32>
    %962 = vector.extract_strided_slice %46 {offsets = [208, 0], sizes = [8, 1], strides = [1, 1]} : vector<256x1xf32> to vector<8x1xf32>
    %963 = vector.extract_strided_slice %960 {offsets = [0, 0], sizes = [8, 128], strides = [1, 1]} : vector<8x256xf32> to vector<8x128xf32>
    %964 = vector.extract_strided_slice %960 {offsets = [0, 128], sizes = [8, 128], strides = [1, 1]} : vector<8x256xf32> to vector<8x128xf32>
    %965 = vector.extract_strided_slice %961 {offsets = [0, 0], sizes = [8, 128], strides = [1, 1]} : vector<8x256xf32> to vector<8x128xf32>
    %966 = vector.extract_strided_slice %961 {offsets = [0, 128], sizes = [8, 128], strides = [1, 1]} : vector<8x256xf32> to vector<8x128xf32>
    %967 = arith.mulf %963, %963 : vector<8x128xf32>
    %968 = arith.mulf %964, %964 : vector<8x128xf32>
    %969 = arith.addf %967, %968 : vector<8x128xf32>
    %970 = vector.broadcast %962 : vector<8x1xf32> to vector<8x128xf32>
    %971 = arith.mulf %969, %970 : vector<8x128xf32>
    %972 = arith.mulf %965, %965 : vector<8x128xf32>
    %973 = arith.mulf %966, %966 : vector<8x128xf32>
    %974 = arith.addf %972, %973 : vector<8x128xf32>
    %975 = vector.broadcast %962 : vector<8x1xf32> to vector<8x128xf32>
    %976 = arith.mulf %974, %975 : vector<8x128xf32>
    %cst_131 = arith.constant 9.99999982E-15 : f32
    %977 = vector.broadcast %cst_131 : f32 to vector<8x128xf32>
    %978 = arith.maximumf %971, %977 : vector<8x128xf32>
    %cst_132 = arith.constant 9.99999982E-15 : f32
    %979 = vector.broadcast %cst_132 : f32 to vector<8x128xf32>
    %980 = arith.maximumf %976, %979 : vector<8x128xf32>
    %981 = arith.addf %980, %978 : vector<8x128xf32>
    %982 = arith.mulf %980, %978 : vector<8x128xf32>
    %983 = math.sqrt %982 : vector<8x128xf32>
    %cst_133 = arith.constant 2.000000e+00 : f32
    %984 = vector.broadcast %cst_133 : f32 to vector<8x128xf32>
    %985 = arith.mulf %984, %983 : vector<8x128xf32>
    %986 = arith.subf %981, %985 : vector<8x128xf32>
    %987 = arith.addf %952, %986 : vector<8x128xf32>
    %988 = arith.addf %953, %976 : vector<8x128xf32>
    %989 = arith.divf %980, %978 : vector<8x128xf32>
    %990 = math.log %989 : vector<8x128xf32>
    %991 = math.absf %990 : vector<8x128xf32>
    %cst_134 = arith.constant 5.000000e-01 : f32
    %992 = vector.broadcast %cst_134 : f32 to vector<8x128xf32>
    %993 = arith.mulf %992, %991 : vector<8x128xf32>
    %994 = arith.addf %959, %993 : vector<8x128xf32>
    %995 = vector.extract_strided_slice %38 {offsets = [216, 0], sizes = [8, 256], strides = [1, 1]} : vector<512x256xf32> to vector<8x256xf32>
    %996 = vector.extract_strided_slice %38 {offsets = [472, 0], sizes = [8, 256], strides = [1, 1]} : vector<512x256xf32> to vector<8x256xf32>
    %997 = vector.extract_strided_slice %46 {offsets = [216, 0], sizes = [8, 1], strides = [1, 1]} : vector<256x1xf32> to vector<8x1xf32>
    %998 = vector.extract_strided_slice %995 {offsets = [0, 0], sizes = [8, 128], strides = [1, 1]} : vector<8x256xf32> to vector<8x128xf32>
    %999 = vector.extract_strided_slice %995 {offsets = [0, 128], sizes = [8, 128], strides = [1, 1]} : vector<8x256xf32> to vector<8x128xf32>
    %1000 = vector.extract_strided_slice %996 {offsets = [0, 0], sizes = [8, 128], strides = [1, 1]} : vector<8x256xf32> to vector<8x128xf32>
    %1001 = vector.extract_strided_slice %996 {offsets = [0, 128], sizes = [8, 128], strides = [1, 1]} : vector<8x256xf32> to vector<8x128xf32>
    %1002 = arith.mulf %998, %998 : vector<8x128xf32>
    %1003 = arith.mulf %999, %999 : vector<8x128xf32>
    %1004 = arith.addf %1002, %1003 : vector<8x128xf32>
    %1005 = vector.broadcast %997 : vector<8x1xf32> to vector<8x128xf32>
    %1006 = arith.mulf %1004, %1005 : vector<8x128xf32>
    %1007 = arith.mulf %1000, %1000 : vector<8x128xf32>
    %1008 = arith.mulf %1001, %1001 : vector<8x128xf32>
    %1009 = arith.addf %1007, %1008 : vector<8x128xf32>
    %1010 = vector.broadcast %997 : vector<8x1xf32> to vector<8x128xf32>
    %1011 = arith.mulf %1009, %1010 : vector<8x128xf32>
    %cst_135 = arith.constant 9.99999982E-15 : f32
    %1012 = vector.broadcast %cst_135 : f32 to vector<8x128xf32>
    %1013 = arith.maximumf %1006, %1012 : vector<8x128xf32>
    %cst_136 = arith.constant 9.99999982E-15 : f32
    %1014 = vector.broadcast %cst_136 : f32 to vector<8x128xf32>
    %1015 = arith.maximumf %1011, %1014 : vector<8x128xf32>
    %1016 = arith.addf %1015, %1013 : vector<8x128xf32>
    %1017 = arith.mulf %1015, %1013 : vector<8x128xf32>
    %1018 = math.sqrt %1017 : vector<8x128xf32>
    %cst_137 = arith.constant 2.000000e+00 : f32
    %1019 = vector.broadcast %cst_137 : f32 to vector<8x128xf32>
    %1020 = arith.mulf %1019, %1018 : vector<8x128xf32>
    %1021 = arith.subf %1016, %1020 : vector<8x128xf32>
    %1022 = arith.addf %987, %1021 : vector<8x128xf32>
    %1023 = arith.addf %988, %1011 : vector<8x128xf32>
    %1024 = arith.divf %1015, %1013 : vector<8x128xf32>
    %1025 = math.log %1024 : vector<8x128xf32>
    %1026 = math.absf %1025 : vector<8x128xf32>
    %cst_138 = arith.constant 5.000000e-01 : f32
    %1027 = vector.broadcast %cst_138 : f32 to vector<8x128xf32>
    %1028 = arith.mulf %1027, %1026 : vector<8x128xf32>
    %1029 = arith.addf %994, %1028 : vector<8x128xf32>
    %1030 = vector.extract_strided_slice %38 {offsets = [224, 0], sizes = [8, 256], strides = [1, 1]} : vector<512x256xf32> to vector<8x256xf32>
    %1031 = vector.extract_strided_slice %38 {offsets = [480, 0], sizes = [8, 256], strides = [1, 1]} : vector<512x256xf32> to vector<8x256xf32>
    %1032 = vector.extract_strided_slice %46 {offsets = [224, 0], sizes = [8, 1], strides = [1, 1]} : vector<256x1xf32> to vector<8x1xf32>
    %1033 = vector.extract_strided_slice %1030 {offsets = [0, 0], sizes = [8, 128], strides = [1, 1]} : vector<8x256xf32> to vector<8x128xf32>
    %1034 = vector.extract_strided_slice %1030 {offsets = [0, 128], sizes = [8, 128], strides = [1, 1]} : vector<8x256xf32> to vector<8x128xf32>
    %1035 = vector.extract_strided_slice %1031 {offsets = [0, 0], sizes = [8, 128], strides = [1, 1]} : vector<8x256xf32> to vector<8x128xf32>
    %1036 = vector.extract_strided_slice %1031 {offsets = [0, 128], sizes = [8, 128], strides = [1, 1]} : vector<8x256xf32> to vector<8x128xf32>
    %1037 = arith.mulf %1033, %1033 : vector<8x128xf32>
    %1038 = arith.mulf %1034, %1034 : vector<8x128xf32>
    %1039 = arith.addf %1037, %1038 : vector<8x128xf32>
    %1040 = vector.broadcast %1032 : vector<8x1xf32> to vector<8x128xf32>
    %1041 = arith.mulf %1039, %1040 : vector<8x128xf32>
    %1042 = arith.mulf %1035, %1035 : vector<8x128xf32>
    %1043 = arith.mulf %1036, %1036 : vector<8x128xf32>
    %1044 = arith.addf %1042, %1043 : vector<8x128xf32>
    %1045 = vector.broadcast %1032 : vector<8x1xf32> to vector<8x128xf32>
    %1046 = arith.mulf %1044, %1045 : vector<8x128xf32>
    %cst_139 = arith.constant 9.99999982E-15 : f32
    %1047 = vector.broadcast %cst_139 : f32 to vector<8x128xf32>
    %1048 = arith.maximumf %1041, %1047 : vector<8x128xf32>
    %cst_140 = arith.constant 9.99999982E-15 : f32
    %1049 = vector.broadcast %cst_140 : f32 to vector<8x128xf32>
    %1050 = arith.maximumf %1046, %1049 : vector<8x128xf32>
    %1051 = arith.addf %1050, %1048 : vector<8x128xf32>
    %1052 = arith.mulf %1050, %1048 : vector<8x128xf32>
    %1053 = math.sqrt %1052 : vector<8x128xf32>
    %cst_141 = arith.constant 2.000000e+00 : f32
    %1054 = vector.broadcast %cst_141 : f32 to vector<8x128xf32>
    %1055 = arith.mulf %1054, %1053 : vector<8x128xf32>
    %1056 = arith.subf %1051, %1055 : vector<8x128xf32>
    %1057 = arith.addf %1022, %1056 : vector<8x128xf32>
    %1058 = arith.addf %1023, %1046 : vector<8x128xf32>
    %1059 = arith.divf %1050, %1048 : vector<8x128xf32>
    %1060 = math.log %1059 : vector<8x128xf32>
    %1061 = math.absf %1060 : vector<8x128xf32>
    %cst_142 = arith.constant 5.000000e-01 : f32
    %1062 = vector.broadcast %cst_142 : f32 to vector<8x128xf32>
    %1063 = arith.mulf %1062, %1061 : vector<8x128xf32>
    %1064 = arith.addf %1029, %1063 : vector<8x128xf32>
    %1065 = vector.extract_strided_slice %38 {offsets = [232, 0], sizes = [8, 256], strides = [1, 1]} : vector<512x256xf32> to vector<8x256xf32>
    %1066 = vector.extract_strided_slice %38 {offsets = [488, 0], sizes = [8, 256], strides = [1, 1]} : vector<512x256xf32> to vector<8x256xf32>
    %1067 = vector.extract_strided_slice %46 {offsets = [232, 0], sizes = [8, 1], strides = [1, 1]} : vector<256x1xf32> to vector<8x1xf32>
    %1068 = vector.extract_strided_slice %1065 {offsets = [0, 0], sizes = [8, 128], strides = [1, 1]} : vector<8x256xf32> to vector<8x128xf32>
    %1069 = vector.extract_strided_slice %1065 {offsets = [0, 128], sizes = [8, 128], strides = [1, 1]} : vector<8x256xf32> to vector<8x128xf32>
    %1070 = vector.extract_strided_slice %1066 {offsets = [0, 0], sizes = [8, 128], strides = [1, 1]} : vector<8x256xf32> to vector<8x128xf32>
    %1071 = vector.extract_strided_slice %1066 {offsets = [0, 128], sizes = [8, 128], strides = [1, 1]} : vector<8x256xf32> to vector<8x128xf32>
    %1072 = arith.mulf %1068, %1068 : vector<8x128xf32>
    %1073 = arith.mulf %1069, %1069 : vector<8x128xf32>
    %1074 = arith.addf %1072, %1073 : vector<8x128xf32>
    %1075 = vector.broadcast %1067 : vector<8x1xf32> to vector<8x128xf32>
    %1076 = arith.mulf %1074, %1075 : vector<8x128xf32>
    %1077 = arith.mulf %1070, %1070 : vector<8x128xf32>
    %1078 = arith.mulf %1071, %1071 : vector<8x128xf32>
    %1079 = arith.addf %1077, %1078 : vector<8x128xf32>
    %1080 = vector.broadcast %1067 : vector<8x1xf32> to vector<8x128xf32>
    %1081 = arith.mulf %1079, %1080 : vector<8x128xf32>
    %cst_143 = arith.constant 9.99999982E-15 : f32
    %1082 = vector.broadcast %cst_143 : f32 to vector<8x128xf32>
    %1083 = arith.maximumf %1076, %1082 : vector<8x128xf32>
    %cst_144 = arith.constant 9.99999982E-15 : f32
    %1084 = vector.broadcast %cst_144 : f32 to vector<8x128xf32>
    %1085 = arith.maximumf %1081, %1084 : vector<8x128xf32>
    %1086 = arith.addf %1085, %1083 : vector<8x128xf32>
    %1087 = arith.mulf %1085, %1083 : vector<8x128xf32>
    %1088 = math.sqrt %1087 : vector<8x128xf32>
    %cst_145 = arith.constant 2.000000e+00 : f32
    %1089 = vector.broadcast %cst_145 : f32 to vector<8x128xf32>
    %1090 = arith.mulf %1089, %1088 : vector<8x128xf32>
    %1091 = arith.subf %1086, %1090 : vector<8x128xf32>
    %1092 = arith.addf %1057, %1091 : vector<8x128xf32>
    %1093 = arith.addf %1058, %1081 : vector<8x128xf32>
    %1094 = arith.divf %1085, %1083 : vector<8x128xf32>
    %1095 = math.log %1094 : vector<8x128xf32>
    %1096 = math.absf %1095 : vector<8x128xf32>
    %cst_146 = arith.constant 5.000000e-01 : f32
    %1097 = vector.broadcast %cst_146 : f32 to vector<8x128xf32>
    %1098 = arith.mulf %1097, %1096 : vector<8x128xf32>
    %1099 = arith.addf %1064, %1098 : vector<8x128xf32>
    %1100 = vector.extract_strided_slice %38 {offsets = [240, 0], sizes = [8, 256], strides = [1, 1]} : vector<512x256xf32> to vector<8x256xf32>
    %1101 = vector.extract_strided_slice %38 {offsets = [496, 0], sizes = [8, 256], strides = [1, 1]} : vector<512x256xf32> to vector<8x256xf32>
    %1102 = vector.extract_strided_slice %46 {offsets = [240, 0], sizes = [8, 1], strides = [1, 1]} : vector<256x1xf32> to vector<8x1xf32>
    %1103 = vector.extract_strided_slice %1100 {offsets = [0, 0], sizes = [8, 128], strides = [1, 1]} : vector<8x256xf32> to vector<8x128xf32>
    %1104 = vector.extract_strided_slice %1100 {offsets = [0, 128], sizes = [8, 128], strides = [1, 1]} : vector<8x256xf32> to vector<8x128xf32>
    %1105 = vector.extract_strided_slice %1101 {offsets = [0, 0], sizes = [8, 128], strides = [1, 1]} : vector<8x256xf32> to vector<8x128xf32>
    %1106 = vector.extract_strided_slice %1101 {offsets = [0, 128], sizes = [8, 128], strides = [1, 1]} : vector<8x256xf32> to vector<8x128xf32>
    %1107 = arith.mulf %1103, %1103 : vector<8x128xf32>
    %1108 = arith.mulf %1104, %1104 : vector<8x128xf32>
    %1109 = arith.addf %1107, %1108 : vector<8x128xf32>
    %1110 = vector.broadcast %1102 : vector<8x1xf32> to vector<8x128xf32>
    %1111 = arith.mulf %1109, %1110 : vector<8x128xf32>
    %1112 = arith.mulf %1105, %1105 : vector<8x128xf32>
    %1113 = arith.mulf %1106, %1106 : vector<8x128xf32>
    %1114 = arith.addf %1112, %1113 : vector<8x128xf32>
    %1115 = vector.broadcast %1102 : vector<8x1xf32> to vector<8x128xf32>
    %1116 = arith.mulf %1114, %1115 : vector<8x128xf32>
    %cst_147 = arith.constant 9.99999982E-15 : f32
    %1117 = vector.broadcast %cst_147 : f32 to vector<8x128xf32>
    %1118 = arith.maximumf %1111, %1117 : vector<8x128xf32>
    %cst_148 = arith.constant 9.99999982E-15 : f32
    %1119 = vector.broadcast %cst_148 : f32 to vector<8x128xf32>
    %1120 = arith.maximumf %1116, %1119 : vector<8x128xf32>
    %1121 = arith.addf %1120, %1118 : vector<8x128xf32>
    %1122 = arith.mulf %1120, %1118 : vector<8x128xf32>
    %1123 = math.sqrt %1122 : vector<8x128xf32>
    %cst_149 = arith.constant 2.000000e+00 : f32
    %1124 = vector.broadcast %cst_149 : f32 to vector<8x128xf32>
    %1125 = arith.mulf %1124, %1123 : vector<8x128xf32>
    %1126 = arith.subf %1121, %1125 : vector<8x128xf32>
    %1127 = arith.addf %1092, %1126 : vector<8x128xf32>
    %1128 = arith.addf %1093, %1116 : vector<8x128xf32>
    %1129 = arith.divf %1120, %1118 : vector<8x128xf32>
    %1130 = math.log %1129 : vector<8x128xf32>
    %1131 = math.absf %1130 : vector<8x128xf32>
    %cst_150 = arith.constant 5.000000e-01 : f32
    %1132 = vector.broadcast %cst_150 : f32 to vector<8x128xf32>
    %1133 = arith.mulf %1132, %1131 : vector<8x128xf32>
    %1134 = arith.addf %1099, %1133 : vector<8x128xf32>
    %1135 = vector.extract_strided_slice %38 {offsets = [248, 0], sizes = [8, 256], strides = [1, 1]} : vector<512x256xf32> to vector<8x256xf32>
    %1136 = vector.extract_strided_slice %38 {offsets = [504, 0], sizes = [8, 256], strides = [1, 1]} : vector<512x256xf32> to vector<8x256xf32>
    %1137 = vector.extract_strided_slice %46 {offsets = [248, 0], sizes = [8, 1], strides = [1, 1]} : vector<256x1xf32> to vector<8x1xf32>
    %1138 = vector.extract_strided_slice %1135 {offsets = [0, 0], sizes = [8, 128], strides = [1, 1]} : vector<8x256xf32> to vector<8x128xf32>
    %1139 = vector.extract_strided_slice %1135 {offsets = [0, 128], sizes = [8, 128], strides = [1, 1]} : vector<8x256xf32> to vector<8x128xf32>
    %1140 = vector.extract_strided_slice %1136 {offsets = [0, 0], sizes = [8, 128], strides = [1, 1]} : vector<8x256xf32> to vector<8x128xf32>
    %1141 = vector.extract_strided_slice %1136 {offsets = [0, 128], sizes = [8, 128], strides = [1, 1]} : vector<8x256xf32> to vector<8x128xf32>
    %1142 = arith.mulf %1138, %1138 : vector<8x128xf32>
    %1143 = arith.mulf %1139, %1139 : vector<8x128xf32>
    %1144 = arith.addf %1142, %1143 : vector<8x128xf32>
    %1145 = vector.broadcast %1137 : vector<8x1xf32> to vector<8x128xf32>
    %1146 = arith.mulf %1144, %1145 : vector<8x128xf32>
    %1147 = arith.mulf %1140, %1140 : vector<8x128xf32>
    %1148 = arith.mulf %1141, %1141 : vector<8x128xf32>
    %1149 = arith.addf %1147, %1148 : vector<8x128xf32>
    %1150 = vector.broadcast %1137 : vector<8x1xf32> to vector<8x128xf32>
    %1151 = arith.mulf %1149, %1150 : vector<8x128xf32>
    %cst_151 = arith.constant 9.99999982E-15 : f32
    %1152 = vector.broadcast %cst_151 : f32 to vector<8x128xf32>
    %1153 = arith.maximumf %1146, %1152 : vector<8x128xf32>
    %cst_152 = arith.constant 9.99999982E-15 : f32
    %1154 = vector.broadcast %cst_152 : f32 to vector<8x128xf32>
    %1155 = arith.maximumf %1151, %1154 : vector<8x128xf32>
    %1156 = arith.addf %1155, %1153 : vector<8x128xf32>
    %1157 = arith.mulf %1155, %1153 : vector<8x128xf32>
    %1158 = math.sqrt %1157 : vector<8x128xf32>
    %cst_153 = arith.constant 2.000000e+00 : f32
    %1159 = vector.broadcast %cst_153 : f32 to vector<8x128xf32>
    %1160 = arith.mulf %1159, %1158 : vector<8x128xf32>
    %1161 = arith.subf %1156, %1160 : vector<8x128xf32>
    %1162 = arith.addf %1127, %1161 : vector<8x128xf32>
    %1163 = arith.addf %1128, %1151 : vector<8x128xf32>
    %1164 = arith.divf %1155, %1153 : vector<8x128xf32>
    %1165 = math.log %1164 : vector<8x128xf32>
    %1166 = math.absf %1165 : vector<8x128xf32>
    %cst_154 = arith.constant 5.000000e-01 : f32
    %1167 = vector.broadcast %cst_154 : f32 to vector<8x128xf32>
    %1168 = arith.mulf %1167, %1166 : vector<8x128xf32>
    %1169 = arith.addf %1134, %1168 : vector<8x128xf32>
    %1170 = tpu.concatenate %1162, %1163, %1169 in 1 : vector<8x128xf32>, vector<8x128xf32>, vector<8x128xf32> -> vector<8x384xf32>
    %c0_155 = arith.constant 0 : index
    %c0_156 = arith.constant 0 : index
    %c0_157 = arith.constant 0 : index
    %1171 = vector.load %arg7[%c0_155, %c0_156, %c0_157] : memref<1x8x384xf32, #tpu.memory_space<vmem>>, vector<1x8x384xf32>
    %1172 = vector.shape_cast %1171 : vector<1x8x384xf32> to vector<8x384xf32>
    %1173 = vector.shape_cast %1170 : vector<8x384xf32> to vector<1x8x384xf32>
    tpu.vector_store %arg7[%c0_155, %c0_156, %c0_157], %1173 {strides = array<i32>} : memref<1x8x384xf32, #tpu.memory_space<vmem>>, vector<1x8x384xf32>,
    return
  }
  func.func @transform_0(%arg0: i32, %arg1: i32) -> (i32, i32, i32) {
    %c0_i32 = arith.constant 0 : i32
    %c0_i32_0 = arith.constant 0 : i32
    return %arg0, %arg1, %c0_i32 : i32, i32, i32
  }
  func.func @transform_1(%arg0: i32, %arg1: i32) -> (i32, i32, i32) {
    %c1_i32 = arith.constant 1 : i32
    %0 = arith.addi %arg1, %c1_i32 : i32
    %c0_i32 = arith.constant 0 : i32
    %c0_i32_0 = arith.constant 0 : i32
    return %arg0, %0, %c0_i32 : i32, i32, i32
  }
  func.func @transform_2(%arg0: i32, %arg1: i32) -> (i32, i32, i32) {
    %c0_i32 = arith.constant 0 : i32
    %c0_i32_0 = arith.constant 0 : i32
    return %arg0, %arg1, %c0_i32 : i32, i32, i32
  }
  func.func @transform_3(%arg0: i32, %arg1: i32) -> (i32, i32, i32) {
    %c1_i32 = arith.constant 1 : i32
    %0 = arith.addi %arg1, %c1_i32 : i32
    %c0_i32 = arith.constant 0 : i32
    %c0_i32_0 = arith.constant 0 : i32
    return %arg0, %0, %c0_i32 : i32, i32, i32
  }
  func.func @transform_4(%arg0: i32, %arg1: i32) -> (i32, i32, i32) {
    %c0_i32 = arith.constant 0 : i32
    %c0_i32_0 = arith.constant 0 : i32
    %c0_i32_1 = arith.constant 0 : i32
    %c0_i32_2 = arith.constant 0 : i32
    return %c0_i32, %c0_i32_0, %c0_i32_1 : i32, i32, i32
  }
  func.func @transform_5(%arg0: i32, %arg1: i32) -> (i32, i32, i32) {
    %c0_i32 = arith.constant 0 : i32
    %c0_i32_0 = arith.constant 0 : i32
    return %arg0, %arg1, %c0_i32 : i32, i32, i32
  }
}

</mosaic_0001>

<bundles_post_ra>
// kernel: single_resolution_stft_loss.1
= control target key start
LH: loop header
LB: loop body
LE: loop exit
PB: predicated region body
PF: predicated region fallthrough
CT: control target
= control target key end

     0   :  { %s4992_s18 = smov 0   ;;  %s4994_s19 = smov 0   ;;  %s7382_s0 = inlined_call_operand.vmem [shape: bf16[2,512,16], index: 0, kind: input, shape index: {}, may-alias: {0,1}]   ;;  %s7383_s1 = inlined_call_operand.vmem [shape: bf16[2,512,16], index: 1, kind: input, shape index: {}, may-alias: {0,1}]   ;;  %s7384_s2 = inlined_call_operand.vmem [shape: bf16[2,512,16], index: 2, kind: input, shape index: {}, may-alias: {2,3}]   ;;  %s7385_s3 = inlined_call_operand.vmem [shape: bf16[2,512,16], index: 3, kind: input, shape index: {}, may-alias: {2,3}]   ;;  %s7386_s4 = inlined_call_operand.vmem [shape: bf16[4,16,256], index: 4, kind: input, shape index: {}]   ;;  %s7387_s5 = inlined_call_operand.vmem [shape: f32[2,8,384], index: 5, kind: output, shape index: {}]  }
   0x1   :  { %s4996_s20 = smov 0  }
   0x2 LB: > { %s27_s21 = sadd.s32 1, %s4954_s19  ;;  %p4440_p0 = scmp.ge.s32.totalorder %s4958_s20, 1  ;;  %s4958_s20 = sphi %s4996_s20, %s15_s20   ;;  %s4954_s19 = sphi %s4994_s19, %s7773_s19   ;;  %s4950_s18 = sphi %s4992_s18, %s7772_s18  }
   0x3   : > { %p29_p1 = scmp.ge.s32.totalorder %s27_s21, 2  ;;  %p267_p2 = scmp.lt.s32.totalorder %s4958_s20, 3 }
   0x5   : > { %s7775_s21 = smov (%p29_p1, %s27_s21), 0  ;;  %p268_p3 = pnand %p4440_p0, %p267_p2 }
   0x7   : > { %271 = sbr.rel (%p268_p3) target bundleno = 850 (0x352), region = 40 }
   0xc   : > { %v4664_v0 = vld [vmem:[%s7386_s4 + $0x4] ss:$8 sps:$4 sm:$0xff]   ;;  %p333_p4 = scmp.lt.s32.totalorder %s4950_s18, 1  ;;  %v4666_v1 = vld [vmem:[%s7386_s4] ss:$8 sps:$4 sm:$0xff]   ;;  %v7418_v2 = vmov 0  }
   0xd   : > { %1460 = vmatprep.mubr.bf16.mxu1 %v7418_v2  ;;  %1033 = vmatprep.mubr.bf16.mxu0 %v7418_v2  ;;  %v4667_v3 = vld [vmem:[%s7386_s4 + $0x14] ss:$8 sps:$4 sm:$0xff]   ;;  %v4669_v4 = vld [vmem:[%s7386_s4 + $0x10] ss:$8 sps:$4 sm:$0xff]   ;;  %v4673_v5 = vld [vmem:[%s7386_s4 + $0x24] ss:$8 sps:$4 sm:$0xff]  }
   0xe   : > { %1442 = vmatprep.subr.bf16.mxu1 %v4664_v0  ;;  %s7777_s18 = smov (!%p333_p4, %s4950_s18), 1  ;;  %1015 = vmatprep.subr.bf16.mxu0 %v4667_v3  ;;  %vm904_vm0 = vcmask 130048   ;;  %v4675_v6 = vld [vmem:[%s7386_s4 + $0x30] ss:$8 sps:$4 sm:$0xff]   ;;  %v4677_v7 = vld [vmem:[%s7386_s4 + $0x34] ss:$8 sps:$4 sm:$0xff]  }
   0xf   : > { %1443 = vmatpush1.bf16.msra.mxu1 %v4666_v1  ;;  %s5030_s7 = sshll.u32 %s7777_s18, 8  ;;  %1016 = vmatpush1.bf16.msra.mxu0 %v4669_v4  ;;  %v4671_v15 = vld [vmem:[%s7386_s4 + $0x20] ss:$8 sps:$4 sm:$0xff]   ;;  %vm626_vm1 = vsmask.f32 7424  ;;  %vm1781_vm3 = vcmask 1046528  }
  0x10   : > { %s5036_s10 = scalar_lea.vmem %s7382_s0, %s5030_s7  ;;  %1971 = vmatprep.subr.bf16.mxu0 %v4673_v5  ;;  %2700 = vmatprep.subr.bf16.mxu1 %v4677_v7  ;;  %s4631_s17 = sadd.s32 128, %s5030_s7  ;;  %vm2438_vm2 = vsmask.f32 6400 }
  0x11   : > { %v4670_v8 = vld [vmem:[%s5036_s10] sm:$0xff]   ;;  %v4674_v9 = vld [vmem:[%s5036_s10 + $0x8] sm:$0xff]   ;;  %v5048_v12 = vld [vmem:[%s5036_s10 + $0x10] sm:$0xff]   ;;  %s5097_s24 = scalar_lea.vmem %s7383_s1, %s4631_s17  ;;  %s5104_s27 = scalar_lea.vmem %s7384_s2, %s5030_s7 }
  0x12   : > { %4522 = vmatmul.mubr.msk.bf16.vlgmr.msra.gmra.mxu1 %vm904_vm0, %v4670_v8  ;;  %v628_v10 = vshrl.u32 %v4670_v8, 16  ;;  %v630_v11 = vshll.u32 %v4670_v8, 16  ;;  %v635_v13 = vshll.u32 %v4674_v9, 16  ;;  %v639_v14 = vshrl.u32 %v4674_v9, 16  ;;  %v5069_v29 = vld [vmem:[%s5036_s10 + $0x18] sm:$0xff]   ;;  %v5085_v35 = vld [vmem:[%s5036_s10 + $0x20] sm:$0xff]   ;;  %s5152_s30 = scalar_lea.vmem %s7385_s3, %s4631_s17 }
  0x13   : > { %2701 = vmatpush1.bf16.msra.mxu1 %v4675_v6  ;;  %1470 = vmatprep.mubr.bf16.mxu1 %v7418_v2  ;;  %v643_v24 = vshll.u32 %v5048_v12, 16  ;;  %v647_v31 = vshrl.u32 %v5048_v12, 16  ;;  %v651_v32 = vshll.u32 %v5069_v29, 16  ;;  %v655_v37 = vshrl.u32 %v5069_v29, 16  ;;  %v5114_v41 = vld [vmem:[%s5036_s10 + $0x28] sm:$0xff]   ;;  %v5129_v47 = vld [vmem:[%s5036_s10 + $0x30] sm:$0xff]  }
  0x14   : > { %v632_v16 = vrot.slane %v630_v11, 1  ;;  %v5054_v17 = vrot.slane %v628_v10, 1  ;;  %v5056_v18 = vrot.slane %v630_v11, 2  ;;  %v637_v19 = vrot.slane %v635_v13, 1  ;;  %v5144_v53 = vld [vmem:[%s5036_s10 + $0x38] sm:$0xff]   ;;  %v5166_v59 = vld [vmem:[%s5036_s10 + $0x40] sm:$0xff]  }
  0x15   : > { %v2443_v20 = vrot.slane %v635_v13, 2  ;;  %v2442_v21 = vrot.slane %v639_v14, 1  ;;  %v645_v28 = vrot.slane %v643_v24, 1  ;;  %v653_v34 = vrot.slane %v651_v32, 1  ;;  %v5181_v1 = vld [vmem:[%s5036_s10 + $0x48] sm:$0xff]   ;;  %v5196_v8 = vld [vmem:[%s5036_s10 + $0x50] sm:$0xff]  }
  0x16   : > { %v633_v22 = vor.u32 %v632_v16, %v628_v10  ;;  %v2441_v23 = vor.u32 %v5056_v18, %v5054_v17  ;;  %v641_v27 = vor.u32 %v639_v14, %v637_v19  ;;  %v659_v38 = vshll.u32 %v5085_v35, 16  ;;  %v5348_v18 = vld [vmem:[%s5104_s27 + $0x18] sm:$0xff]   ;;  %s4637_s6 = smul.u32 24, %s7777_s18 }
  0x17   : > { %v5061_v25 = vor.u32 %v2443_v20, %v2442_v21  ;;  %v649_v33 = vor.u32 %v647_v31, %v645_v28  ;;  %v657_v39 = vor.u32 %v655_v37, %v653_v34  ;;  %v663_v43 = vshrl.u32 %v5085_v35, 16 }
  0x18   : > { %v638_v26 = vsel %vm626_vm1, %v633_v22, %v637_v19  ;;  %v646_v30 = vsel %vm626_vm1, %v641_v27, %v645_v28  ;;  %v661_v40 = vrot.slane %v659_v38, 1  ;;  %v667_v44 = vshll.u32 %v5114_v41, 16  ;;  %s7358_s8 = scalar_lea.vmem %s7387_s5, %s4637_s6 }
  0x19   : > { %4488 = vmatmul.mubr.msk.bf16.vlgmr.msra.gmra.mxu0 %vm904_vm0, %v638_v26  ;;  %v654_v36 = vsel %vm626_vm1, %v649_v33, %v653_v34  ;;  %v671_v49 = vshrl.u32 %v5114_v41, 16  ;;  %v675_v50 = vshll.u32 %v5129_v47, 16  ;;  %v679_v55 = vshrl.u32 %v5129_v47, 16  ;;  %v5226_v26 = vld [vmem:[%s5036_s10 + $0x60] sm:$0xff]  }
  0x1a   : > { %1972 = vmatpush1.bf16.msra.mxu0 %v4671_v15  ;;  %4523 = vmatmul.mubr.msk.bf16.gmra.mxu1 %vm904_vm0, %v4674_v9  ;;  %v662_v42 = vsel %vm626_vm1, %v657_v39, %v661_v40  ;;  %v665_v45 = vor.u32 %v663_v43, %v661_v40  ;;  %v669_v46 = vrot.slane %v667_v44, 1  ;;  %v683_v56 = vshll.u32 %v5144_v53, 16  ;;  %v5211_v15 = vld [vmem:[%s5036_s10 + $0x58] sm:$0xff]  }
  0x1b   : > { %1043 = vmatprep.mubr.bf16.mxu0 %v7418_v2  ;;  %1480 = vmatprep.mubr.bf16.mxu1 %v7418_v2  ;;  %v677_v52 = vrot.slane %v675_v50, 1  ;;  %v687_v61 = vshrl.u32 %v5144_v53, 16  ;;  %v691_v62 = vshll.u32 %v5166_v59, 16  ;;  %v695_v4 = vshrl.u32 %v5166_v59, 16 }
  0x1c   : > { %v670_v48 = vsel %vm626_vm1, %v665_v45, %v669_v46  ;;  %v673_v51 = vor.u32 %v671_v49, %v669_v46  ;;  %v685_v58 = vrot.slane %v683_v56, 1  ;;  %v699_v5 = vshll.u32 %v5181_v1, 16 }
  0x1d   : > { %v681_v57 = vor.u32 %v679_v55, %v677_v52  ;;  %v693_v0 = vrot.slane %v691_v62, 1  ;;  %v703_v10 = vshrl.u32 %v5181_v1, 16  ;;  %v707_v11 = vshll.u32 %v5196_v8, 16 }
  0x1e   : > { %v678_v54 = vsel %vm626_vm1, %v673_v51, %v677_v52  ;;  %v689_v63 = vor.u32 %v687_v61, %v685_v58  ;;  %v701_v7 = vrot.slane %v699_v5, 1  ;;  %v711_v19 = vshrl.u32 %v5196_v8, 16 }
  0x1f   : > { %v686_v60 = vsel %vm626_vm1, %v681_v57, %v685_v58  ;;  %v697_v6 = vor.u32 %v695_v4, %v693_v0  ;;  %v709_v14 = vrot.slane %v707_v11, 1  ;;  %v715_v20 = vshll.u32 %v5211_v15, 16 }
  0x20   : > { %v694_v3 = vsel %vm626_vm1, %v689_v63, %v693_v0  ;;  %v705_v13 = vor.u32 %v703_v10, %v701_v7  ;;  %v719_v28 = vshrl.u32 %v5211_v15, 16  ;;  %v727_v40 = vshrl.u32 %v5226_v26, 16 }
  0x21   : > { %4489 = vmatmul.mubr.msk.bf16.gmra.mxu0 %vm904_vm0, %v646_v30  ;;  %v702_v9 = vsel %vm626_vm1, %v697_v6, %v701_v7  ;;  %v713_v21 = vor.u32 %v711_v19, %v709_v14  ;;  %v717_v22 = vrot.slane %v715_v20, 1  ;;  %v723_v30 = vshll.u32 %v5226_v26, 16 }
  0x22   : > { %4524 = vmatmul.mubr.msk.bf16.gmra.mxu1 %vm904_vm0, %v5048_v12  ;;  %1053 = vmatprep.mubr.bf16.mxu0 %v7418_v2  ;;  %v710_v16 = vsel %vm626_vm1, %v705_v13, %v709_v14 }
  0x23   : > { %1490 = vmatprep.mubr.bf16.mxu1 %v7418_v2  ;;  %v718_v27 = vsel %vm626_vm1, %v713_v21, %v717_v22  ;;  %v721_v33 = vor.u32 %v719_v28, %v717_v22  ;;  %v725_v34 = vrot.slane %v723_v30, 1  ;;  %v5293_v21 = vld [vmem:[%s5104_s27] sm:$0xff]  }
  0x25   : > { %v726_v39 = vsel %vm626_vm1, %v721_v33, %v725_v34  ;;  %v729_v45 = vor.u32 %v727_v40, %v725_v34  ;;  %v5304_v33 = vld [vmem:[%s5104_s27 + $0x8] sm:$0xff]   ;;  %v7405_v34 = vshll.u32 %v5293_v21, 16 }
  0x29   : > { %4490 = vmatmul.mubr.msk.bf16.gmra.mxu0 %vm904_vm0, %v654_v36  ;;  %v5241_v36 = vld [vmem:[%s5036_s10 + $0x68] sm:$0xff]  }
  0x2a   : > { %4525 = vmatmul.mubr.msk.bf16.gmra.mxu1 %vm904_vm0, %v5069_v29  ;;  %1063 = vmatprep.mubr.bf16.mxu0 %v7418_v2  ;;  %v735_v52 = vshrl.u32 %v5241_v36, 16 }
  0x2b   : > { %1500 = vmatprep.mubr.bf16.mxu1 %v7418_v2 }
  0x31   : > { %4491 = vmatmul.mubr.msk.bf16.gmra.mxu0 %vm904_vm0, %v662_v42  ;;  %v731_v42 = vshll.u32 %v5241_v36, 16 }
  0x32   : > { %4526 = vmatmul.mubr.msk.bf16.gmra.mxu1 %vm904_vm0, %v5085_v35  ;;  %1073 = vmatprep.mubr.bf16.mxu0 %v7418_v2 }
  0x33   : > { %1510 = vmatprep.mubr.bf16.mxu1 %v7418_v2  ;;  %v733_v46 = vrot.slane %v731_v42, 1 }
  0x35   : > { %v734_v51 = vsel %vm626_vm1, %v729_v45, %v733_v46  ;;  %v737_v57 = vor.u32 %v735_v52, %v733_v46  ;;  %v7410_v45 = vshrl.u32 %v5293_v21, 16  ;;  %v764_v46 = vrot.slane %v7405_v34, 1 }
  0x39   : > { %4492 = vmatmul.mubr.msk.bf16.gmra.mxu0 %vm904_vm0, %v670_v48  ;;  %v5256_v48 = vld [vmem:[%s5036_s10 + $0x70] sm:$0xff]  }
  0x3a   : > { %4527 = vmatmul.mubr.msk.bf16.gmra.mxu1 %vm904_vm0, %v5114_v41  ;;  %1083 = vmatprep.mubr.bf16.mxu0 %v7418_v2  ;;  %v743_v0 = vshrl.u32 %v5256_v48, 16 }
  0x3b   : > { %1520 = vmatprep.mubr.bf16.mxu1 %v7418_v2 }
  0x41   : > { %4493 = vmatmul.mubr.msk.bf16.gmra.mxu0 %vm904_vm0, %v678_v54  ;;  %v739_v54 = vshll.u32 %v5256_v48, 16 }
  0x42   : > { %4528 = vmatmul.mubr.msk.bf16.gmra.mxu1 %vm904_vm0, %v5129_v47  ;;  %1093 = vmatprep.mubr.bf16.mxu0 %v7418_v2 }
  0x43   : > { %1530 = vmatprep.mubr.bf16.mxu1 %v7418_v2  ;;  %v741_v58 = vrot.slane %v739_v54, 1 }
  0x45   : > { %v742_v63 = vsel %vm626_vm1, %v737_v57, %v741_v58  ;;  %v745_v6 = vor.u32 %v743_v0, %v741_v58  ;;  %v765_v57 = vor.u32 %v764_v46, %v7410_v45  ;;  %v2450_v46 = vrot.slane %v655_v37, 1 }
  0x49   : > { %4494 = vmatmul.mubr.msk.bf16.gmra.mxu0 %vm904_vm0, %v686_v60  ;;  %v5271_v60 = vld [vmem:[%s5036_s10 + $0x78] sm:$0xff]  }
  0x4a   : > { %4529 = vmatmul.mubr.msk.bf16.gmra.mxu1 %vm904_vm0, %v5144_v53  ;;  %1103 = vmatprep.mubr.bf16.mxu0 %v7418_v2  ;;  %v7414_v14 = vshrl.u32 %v5271_v60, 16 }
  0x4b   : > { %1540 = vmatprep.mubr.bf16.mxu1 %v7418_v2 }
  0x51   : > { %4495 = vmatmul.mubr.msk.bf16.gmra.mxu0 %vm904_vm0, %v694_v3  ;;  %v7415_v3 = vshll.u32 %v5271_v60, 16 }
  0x52   : > { %4530 = vmatmul.mubr.msk.bf16.gmra.mxu1 %vm904_vm0, %v5166_v59  ;;  %1113 = vmatprep.mubr.bf16.mxu0 %v7418_v2 }
  0x53   : > { %1550 = vmatprep.mubr.bf16.mxu1 %v7418_v2  ;;  %v749_v7 = vrot.slane %v7415_v3, 1 }
  0x55   : > { %v750_v13 = vsel %vm626_vm1, %v745_v6, %v749_v7  ;;  %v753_v22 = vor.u32 %v7414_v14, %v749_v7  ;;  %v5330_v6 = vsel %vm2438_vm2, %v2441_v23, %v5061_v25  ;;  %v2447_v7 = vrot.slane %v643_v24, 2 }
  0x59   : > { %4496 = vmatmul.mubr.msk.bf16.gmra.mxu0 %vm904_vm0, %v702_v9  ;;  %v5286_v9 = vld [vmem:[%s5097_s24] sm:$0xff]  }
  0x5a   : > { %4531 = vmatmul.mubr.msk.bf16.gmra.mxu1 %vm904_vm0, %v5181_v1  ;;  %1123 = vmatprep.mubr.bf16.mxu0 %v7418_v2 }
  0x5b   : > { %1560 = vmatprep.mubr.bf16.mxu1 %v7418_v2 }
  0x61   : > { %4497 = vmatmul.mubr.msk.bf16.gmra.mxu0 %vm904_vm0, %v710_v16  ;;  %v7413_v16 = vshll.u32 %v5286_v9, 16 }
  0x62   : > { %4532 = vmatmul.mubr.msk.bf16.gmra.mxu1 %vm904_vm0, %v5196_v8  ;;  %1133 = vmatprep.mubr.bf16.mxu0 %v7418_v2 }
  0x63   : > { %1570 = vmatprep.mubr.bf16.mxu1 %v7418_v2 }
  0x69   : > { %4498 = vmatmul.mubr.msk.bf16.gmra.mxu0 %vm904_vm0, %v718_v27  ;;  %v757_v27 = vrot.slane %v7413_v16, 1 }
  0x6a   : > { %4533 = vmatmul.mubr.msk.bf16.gmra.mxu1 %vm904_vm0, %v5211_v15  ;;  %1143 = vmatprep.mubr.bf16.mxu0 %v7418_v2 }
  0x6b   : > { %1580 = vmatprep.mubr.bf16.mxu1 %v7418_v2 }
  0x71   : > { %4499 = vmatmul.mubr.msk.bf16.gmra.mxu0 %vm904_vm0, %v726_v39  ;;  %v758_v39 = vsel %vm626_vm1, %v753_v22, %v757_v27  ;;  %v7408_v27 = vshrl.u32 %v5304_v33, 16 }
  0x72   : > { %4534 = vmatmul.mubr.msk.bf16.gmra.mxu1 %vm904_vm0, %v5226_v26  ;;  %1153 = vmatprep.mubr.bf16.mxu0 %v7418_v2 }
  0x73   : > { %1590 = vmatprep.mubr.bf16.mxu1 %v7418_v2 }
  0x79   : > { %4500 = vmatmul.mubr.msk.bf16.gmra.mxu0 %vm904_vm0, %v734_v51  ;;  %v7409_v51 = vshll.u32 %v5304_v33, 16 }
  0x7a   : > { %4535 = vmatmul.mubr.msk.bf16.gmra.mxu1 %vm904_vm0, %v5241_v36  ;;  %1163 = vmatprep.mubr.bf16.mxu0 %v7418_v2 }
  0x7b   : > { %1600 = vmatprep.mubr.bf16.mxu1 %v7418_v2  ;;  %v769_v58 = vrot.slane %v7409_v51, 1 }
  0x7d   : > { %v770_v22 = vsel %vm626_vm1, %v765_v57, %v769_v58  ;;  %v773_v17 = vor.u32 %v7408_v27, %v769_v58 }
  0x81   : > { %4501 = vmatmul.mubr.msk.bf16.gmra.mxu0 %vm904_vm0, %v742_v63  ;;  %v5322_v63 = vld [vmem:[%s5104_s27 + $0x10] sm:$0xff]  }
  0x82   : > { %4536 = vmatmul.mubr.msk.bf16.gmra.mxu1 %vm904_vm0, %v5256_v48  ;;  %1173 = vmatprep.mubr.bf16.mxu0 %v7418_v2  ;;  %v7403_v58 = vshrl.u32 %v5322_v63, 16 }
  0x83   : > { %1610 = vmatprep.mubr.bf16.mxu1 %v7418_v2 }
  0x89   : > { %4502 = vmatmul.mubr.msk.bf16.gmra.mxu0 %vm904_vm0, %v750_v13  ;;  %v2446_v13 = vrot.slane %v647_v31, 1  ;;  %v2451_v31 = vrot.slane %v651_v32, 2  ;;  %v5371_v32 = vld [vmem:[%s5104_s27 + $0x20] sm:$0xff]  }
  0x8a   : > { %4537 = vmatmul.mubr.msk.bf16.gmra.mxu1 %vm904_vm0, %v5271_v60  ;;  %1183 = vmatprep.mubr.bf16.mxu0 %v7418_v2 }
  0x8b   : > { %1620 = vmatprep.mubr.bf16.mxu1 %v7418_v2  ;;  %v2448_v23 = vor.u32 %v2447_v7, %v2446_v13  ;;  %v2452_v37 = vor.u32 %v2451_v31, %v2450_v46  ;;  %v2455_v13 = vrot.slane %v659_v38, 2  ;;  %v5393_v38 = vld [vmem:[%s5104_s27 + $0x28] sm:$0xff]   ;;  %v2459_v46 = vrot.slane %v667_v44, 2  ;;  %v5415_v44 = vld [vmem:[%s5104_s27 + $0x30] sm:$0xff]  }
  0x8d   : > { %v5353_v24 = vsel %vm2438_vm2, %v5061_v25, %v2448_v23  ;;  %v5375_v7 = vsel %vm2438_vm2, %v2448_v23, %v2452_v37 }
  0x91   : > { %4503 = vmatmul.mubr.msk.bf16.gmra.mxu0 %vm904_vm0, %v758_v39  ;;  %v7404_v39 = vshll.u32 %v5322_v63, 16 }
  0x92   : > { %4538 = vmatmul.mubr.msk.bf16.gmra.mxu1 %vm904_vm0, %v5293_v21  ;;  %1193 = vmatprep.mubr.bf16.mxu0 %v7418_v2 }
  0x93   : > { %1630 = vmatprep.mubr.bf16.mxu1 %v7418_v2  ;;  %v777_v12 = vrot.slane %v7404_v39, 1 }
  0x95   : > { %v778_v57 = vsel %vm626_vm1, %v773_v17, %v777_v12  ;;  %v781_v25 = vor.u32 %v7403_v58, %v777_v12  ;;  %v2454_v17 = vrot.slane %v663_v43, 1 }
  0x97   : > { %v2456_v43 = vor.u32 %v2455_v13, %v2454_v17  ;;  %v2463_v17 = vrot.slane %v675_v50, 2  ;;  %v5437_v50 = vld [vmem:[%s5104_s27 + $0x38] sm:$0xff]  }
  0x99   : > { %4504 = vmatmul.mubr.msk.bf16.gmra.mxu0 %vm904_vm0, %v770_v22  ;;  %v7388_v22 = vshll.u32 %v5348_v18, 16  ;;  %v5397_v31 = vsel %vm2438_vm2, %v2452_v37, %v2456_v43 }
  0x9a   : > { %4539 = vmatmul.mubr.msk.bf16.gmra.mxu1 %vm904_vm0, %v5304_v33  ;;  %1203 = vmatprep.mubr.bf16.mxu0 %v7418_v2 }
  0x9b   : > { %1640 = vmatprep.mubr.bf16.mxu1 %v7418_v2  ;;  %v785_v29 = vrot.slane %v7388_v22, 1  ;;  %v7389_v22 = vshll.u32 %v5371_v32, 16 }
  0x9d   : > { %v786_v12 = vsel %vm626_vm1, %v781_v25, %v785_v29  ;;  %v793_v35 = vrot.slane %v7389_v22, 1  ;;  %v2458_v25 = vrot.slane %v671_v49, 1  ;;  %v7390_v22 = vshll.u32 %v5393_v38, 16 }
  0x9f   : > { %v801_v41 = vrot.slane %v7390_v22, 1  ;;  %v2460_v49 = vor.u32 %v2459_v46, %v2458_v25  ;;  %v7391_v22 = vshll.u32 %v5415_v44, 16  ;;  %v2467_v25 = vrot.slane %v683_v56, 2  ;;  %v5459_v56 = vld [vmem:[%s5104_s27 + $0x40] sm:$0xff]  }
  0xa1   : > { %4505 = vmatmul.mubr.msk.bf16.gmra.mxu0 %vm904_vm0, %v778_v57  ;;  %v7400_v57 = vshrl.u32 %v5348_v18, 16  ;;  %v5419_v13 = vsel %vm2438_vm2, %v2456_v43, %v2460_v49  ;;  %v809_v47 = vrot.slane %v7391_v22, 1  ;;  %v7392_v22 = vshll.u32 %v5437_v50, 16 }
  0xa2   : > { %4540 = vmatmul.mubr.msk.bf16.gmra.mxu1 %vm904_vm0, %v5322_v63  ;;  %1213 = vmatprep.mubr.bf16.mxu0 %v7418_v2 }
  0xa3   : > { %1650 = vmatprep.mubr.bf16.mxu1 %v7418_v2  ;;  %v789_v23 = vor.u32 %v7400_v57, %v785_v29  ;;  %v817_v53 = vrot.slane %v7392_v22, 1  ;;  %v7393_v22 = vshll.u32 %v5459_v56, 16  ;;  %v2483_v57 = vrot.slane %v715_v20, 2 }
  0xa5   : > { %v794_v29 = vsel %vm626_vm1, %v789_v23, %v793_v35  ;;  %v2462_v23 = vrot.slane %v679_v55, 1  ;;  %v825_v59 = vrot.slane %v7393_v22, 1 }
  0xa7   : > { %v2464_v55 = vor.u32 %v2463_v17, %v2462_v23  ;;  %v2471_v23 = vrot.slane %v691_v62, 2  ;;  %v5481_v62 = vld [vmem:[%s5104_s27 + $0x48] sm:$0xff]  }
  0xa8   : > { %v7396_v22 = vshll.u32 %v5481_v62, 16 }
  0xa9   : > { %4506 = vmatmul.mubr.msk.bf16.gmra.mxu0 %vm904_vm0, %v786_v12  ;;  %v7399_v12 = vshrl.u32 %v5371_v32, 16  ;;  %v5441_v46 = vsel %vm2438_vm2, %v2460_v49, %v2464_v55 }
  0xaa   : > { %4541 = vmatmul.mubr.msk.bf16.gmra.mxu1 %vm904_vm0, %v5348_v18  ;;  %1223 = vmatprep.mubr.bf16.mxu0 %v7418_v2  ;;  %v833_v1 = vrot.slane %v7396_v22, 1  ;;  %v7401_v22 = vshrl.u32 %v5481_v62, 16 }
  0xab   : > { %1660 = vmatprep.mubr.bf16.mxu1 %v7418_v2  ;;  %v797_v37 = vor.u32 %v7399_v12, %v793_v35 }
  0xac   : > { %v837_v8 = vor.u32 %v7401_v22, %v833_v1 }
  0xad   : > { %v802_v35 = vsel %vm626_vm1, %v797_v37, %v801_v41  ;;  %v2466_v37 = vrot.slane %v687_v61, 1 }
  0xaf   : > { %v2468_v61 = vor.u32 %v2467_v25, %v2466_v37  ;;  %v2475_v37 = vrot.slane %v699_v5, 2 }
  0xb1   : > { %4507 = vmatmul.mubr.msk.bf16.gmra.mxu0 %vm904_vm0, %v794_v29  ;;  %v7398_v29 = vshrl.u32 %v5393_v38, 16  ;;  %v5463_v17 = vsel %vm2438_vm2, %v2464_v55, %v2468_v61 }
  0xb2   : > { %4542 = vmatmul.mubr.msk.bf16.gmra.mxu1 %vm904_vm0, %v5371_v32  ;;  %1233 = vmatprep.mubr.bf16.mxu0 %v7418_v2 }
  0xb3   : > { %1670 = vmatprep.mubr.bf16.mxu1 %v7418_v2  ;;  %v805_v43 = vor.u32 %v7398_v29, %v801_v41 }
  0xb5   : > { %v810_v41 = vsel %vm626_vm1, %v805_v43, %v809_v47  ;;  %v2470_v43 = vrot.slane %v695_v4, 1 }
  0xb7   : > { %v2472_v4 = vor.u32 %v2471_v23, %v2470_v43 }
  0xb9   : > { %4508 = vmatmul.mubr.msk.bf16.gmra.mxu0 %vm904_vm0, %v802_v35  ;;  %v7397_v35 = vshrl.u32 %v5415_v44, 16  ;;  %v5485_v25 = vsel %vm2438_vm2, %v2468_v61, %v2472_v4 }
  0xba   : > { %4543 = vmatmul.mubr.msk.bf16.gmra.mxu1 %vm904_vm0, %v5393_v38  ;;  %1243 = vmatprep.mubr.bf16.mxu0 %v7418_v2 }
  0xbb   : > { %1680 = vmatprep.mubr.bf16.mxu1 %v7418_v2  ;;  %v813_v49 = vor.u32 %v7397_v35, %v809_v47 }
  0xbd   : > { %v818_v47 = vsel %vm626_vm1, %v813_v49, %v817_v53  ;;  %v2474_v49 = vrot.slane %v703_v10, 1  ;;  %v5503_v10 = vld [vmem:[%s5104_s27 + $0x50] sm:$0xff]  }
  0xbf   : > { %v2476_v61 = vor.u32 %v2475_v37, %v2474_v49  ;;  %v7402_v37 = vshll.u32 %v5503_v10, 16 }
  0xc1   : > { %4509 = vmatmul.mubr.msk.bf16.gmra.mxu0 %vm904_vm0, %v810_v41  ;;  %v7394_v41 = vshrl.u32 %v5437_v50, 16 }
  0xc2   : > { %4544 = vmatmul.mubr.msk.bf16.gmra.mxu1 %vm904_vm0, %v5415_v44  ;;  %1253 = vmatprep.mubr.bf16.mxu0 %v7418_v2 }
  0xc3   : > { %1690 = vmatprep.mubr.bf16.mxu1 %v7418_v2  ;;  %v821_v55 = vor.u32 %v7394_v41, %v817_v53  ;;  %v2478_v41 = vrot.slane %v711_v19, 1  ;;  %v5527_v19 = vld [vmem:[%s5104_s27 + $0x58] sm:$0xff]  }
  0xc5   : > { %v826_v53 = vsel %vm626_vm1, %v821_v55, %v825_v59  ;;  %v5507_v55 = vsel %vm2438_vm2, %v2472_v4, %v2476_v61 }
  0xc9   : > { %4510 = vmatmul.mubr.msk.bf16.gmra.mxu0 %vm904_vm0, %v818_v47  ;;  %v7395_v47 = vshrl.u32 %v5459_v56, 16 }
  0xca   : > { %4545 = vmatmul.mubr.msk.bf16.gmra.mxu1 %vm904_vm0, %v5437_v50  ;;  %1263 = vmatprep.mubr.bf16.mxu0 %v7418_v2 }
  0xcb   : > { %1700 = vmatprep.mubr.bf16.mxu1 %v7418_v2  ;;  %v829_v5 = vor.u32 %v7395_v47, %v825_v59 }
  0xcd   : > { %v834_v59 = vsel %vm626_vm1, %v829_v5, %v833_v1  ;;  %v2482_v1 = vrot.slane %v719_v28, 1 }
  0xd1   : > { %4511 = vmatmul.mubr.msk.bf16.gmra.mxu0 %vm904_vm0, %v826_v53  ;;  %v2479_v53 = vrot.slane %v707_v11, 2  ;;  %v841_v11 = vrot.slane %v7402_v37, 1 }
  0xd2   : > { %v1462_v23 = vpop.f32.mrf.mxu1  ;;  %4546 = vmatmul.mubr.msk.bf16.gmra.mxu1 %vm904_vm0, %v5459_v56  ;;  %1273 = vmatprep.mubr.bf16.mxu0 %v7418_v2 }
  0xd3   : > { %1710 = vmatprep.mubr.bf16.mxu1 %v7418_v2  ;;  %v2480_v5 = vor.u32 %v2479_v53, %v2478_v41  ;;  %v842_v41 = vsel %vm626_vm1, %v837_v8, %v841_v11 }
  0xd4   : > { %v1464_v43 = vpop.f32.mrf.mxu1 }
  0xd6   : > { %v1466_v47 = vpop.f32.mrf.mxu1 }
  0xd8   : > { %v1468_v49 = vpop.f32.mrf.mxu1 }
  0xd9   : > { %v1035_v35 = vpop.f32.mrf.mxu0  ;;  %4512 = vmatmul.mubr.msk.bf16.gmra.mxu0 %vm904_vm0, %v834_v59  ;;  %v5533_v59 = vsel %vm2438_vm2, %v2476_v61, %v2480_v5 }
  0xda   : > { %v5517_v4 = vadd.f32 %v1462_v23, %v1035_v35  ;;  %v1472_v29 = vpop.f32.mrf.mxu1  ;;  %4547 = vmatmul.mubr.msk.bf16.gmra.mxu1 %vm904_vm0, %v5481_v62  ;;  %1283 = vmatprep.mubr.bf16.mxu0 %v7418_v2 }
  0xdb   : > { %v1037_v12 = vpop.f32.mrf.mxu0  ;;  %1720 = vmatprep.mubr.bf16.mxu1 %v7418_v2 }
  0xdc   : > { %v5530_v35 = vadd.f32 %v1464_v43, %v1037_v12  ;;  %v1474_v23 = vpop.f32.mrf.mxu1  ;;  %v7406_v12 = vshrl.u32 %v5503_v10, 16  ;;  %v7407_v43 = vshll.u32 %v5527_v19, 16 }
  0xdd   : > { %v1039_v22 = vpop.f32.mrf.mxu0 }
  0xde   : > { %v5539_v37 = vadd.f32 %v1466_v47, %v1039_v22  ;;  %v1476_v53 = vpop.f32.mrf.mxu1  ;;  %v845_v28 = vor.u32 %v7406_v12, %v841_v11  ;;  %v849_v22 = vrot.slane %v7407_v43, 1  ;;  %v2484_v47 = vor.u32 %v2483_v57, %v2482_v1 }
  0xdf   : > { %v1041_v58 = vpop.f32.mrf.mxu0  ;;  %v2486_v11 = vrot.slane %v727_v40, 1 }
  0xe0   : > { %v5544_v61 = vadd.f32 %v1468_v49, %v1041_v58  ;;  %v1478_v39 = vpop.f32.mrf.mxu1  ;;  %v5557_v58 = vld [vmem:[%s5104_s27 + $0x60] sm:$0xff]   ;;  %v5563_v8 = vsel %vm2438_vm2, %v2480_v5, %v2484_v47  ;;  %v850_v57 = vsel %vm626_vm1, %v845_v28, %v849_v22 }
  0xe1   : > { %v1045_v34 = vpop.f32.mrf.mxu0  ;;  %4513 = vmatmul.mubr.msk.bf16.gmra.mxu0 %vm904_vm0, %v842_v41  ;;  %v2487_v41 = vrot.slane %v723_v30, 2 }
  0xe2   : > { %v5547_v15 = vadd.f32 %v1472_v29, %v1045_v34  ;;  %v1482_v20 = vpop.f32.mrf.mxu1  ;;  %4548 = vmatmul.mubr.msk.bf16.gmra.mxu1 %vm904_vm0, %v5503_v10  ;;  %1293 = vmatprep.mubr.bf16.mxu0 %v7418_v2 }
  0xe3   : > { %v1047_v49 = vpop.f32.mrf.mxu0  ;;  %1730 = vmatprep.mubr.bf16.mxu1 %v7418_v2 }
  0xe4   : > { %v5560_v34 = vadd.f32 %v1474_v23, %v1047_v49  ;;  %v1484_v29 = vpop.f32.mrf.mxu1  ;;  %v7411_v23 = vshrl.u32 %v5527_v19, 16  ;;  %v7412_v49 = vshll.u32 %v5557_v58, 16 }
  0xe5   : > { %v1049_v12 = vpop.f32.mrf.mxu0 }
  0xe6   : > { %v5569_v43 = vadd.f32 %v1476_v53, %v1049_v12  ;;  %v1486_v1 = vpop.f32.mrf.mxu1  ;;  %v853_v40 = vor.u32 %v7411_v23, %v849_v22  ;;  %v857_v53 = vrot.slane %v7412_v49, 1  ;;  %v2490_v22 = vrot.slane %v735_v52, 1 }
  0xe7   : > { %v1051_v27 = vpop.f32.mrf.mxu0 }
  0xe8   : > { %v5574_v5 = vadd.f32 %v1478_v39, %v1051_v27  ;;  %v1488_v51 = vpop.f32.mrf.mxu1  ;;  %v5587_v27 = vld [vmem:[%s5104_s27 + $0x68] sm:$0xff]   ;;  %v2488_v39 = vor.u32 %v2487_v41, %v2486_v11  ;;  %v858_v41 = vsel %vm626_vm1, %v853_v40, %v857_v53  ;;  %v7417_v11 = vshrl.u32 %v5557_v58, 16 }
  0xe9   : > { %v1055_v45 = vpop.f32.mrf.mxu0  ;;  %4514 = vmatmul.mubr.msk.bf16.gmra.mxu0 %vm904_vm0, %v850_v57  ;;  %v2491_v57 = vrot.slane %v731_v42, 2 }
  0xea   : > { %v5577_v26 = vadd.f32 %v1482_v20, %v1055_v45  ;;  %v1492_v30 = vpop.f32.mrf.mxu1  ;;  %4549 = vmatmul.mubr.msk.bf16.gmra.mxu1 %vm904_vm0, %v5527_v19  ;;  %1303 = vmatprep.mubr.bf16.mxu0 %v7418_v2  ;;  %v5593_v28 = vsel %vm2438_vm2, %v2484_v47, %v2488_v39  ;;  %v861_v42 = vor.u32 %v7417_v11, %v857_v53  ;;  %v2495_v53 = vrot.slane %v739_v54, 2  ;;  %v5638_v54 = vld [vmem:[%s5104_s27 + $0x78] sm:$0xff]  }
  0xeb   : > { %v1057_v12 = vpop.f32.mrf.mxu0  ;;  %1740 = vmatprep.mubr.bf16.mxu1 %v7418_v2  ;;  %7471 = vst [vmem:[#allocation9_spill] sm:$0xff] %v5638_v54 }
  0xec   : > { %v5590_v45 = vadd.f32 %v1484_v29, %v1057_v12  ;;  %v1494_v20 = vpop.f32.mrf.mxu1  ;;  %v7416_v12 = vshll.u32 %v5587_v27, 16 }
  0xed   : > { %v1059_v23 = vpop.f32.mrf.mxu0 }
  0xee   : > { %7464 = vst [vmem:[#allocation2_spill] sm:$0xff] %v5590_v45  ;;  %v5599_v49 = vadd.f32 %v1486_v1, %v1059_v23  ;;  %v1496_v29 = vpop.f32.mrf.mxu1  ;;  %v865_v1 = vrot.slane %v7416_v12, 1 }
  0xef   : > { %v1061_v16 = vpop.f32.mrf.mxu0 }
  0xf0   : > { %7465 = vst [vmem:[#allocation3_spill] sm:$0xff] %v5599_v49  ;;  %v5604_v47 = vadd.f32 %v1488_v51, %v1061_v16  ;;  %v1498_v14 = vpop.f32.mrf.mxu1  ;;  %v5617_v16 = vld [vmem:[%s5104_s27 + $0x70] sm:$0xff]   ;;  %v2492_v51 = vor.u32 %v2491_v57, %v2490_v22  ;;  %v866_v57 = vsel %vm626_vm1, %v861_v42, %v865_v1 }
  0xf1   : > { %v1065_v3 = vpop.f32.mrf.mxu0  ;;  %4515 = vmatmul.mubr.msk.bf16.gmra.mxu0 %vm904_vm0, %v858_v41  ;;  %v2494_v41 = vrot.slane %v743_v0, 1 }
  0xf2   : > { %7466 = vst [vmem:[#allocation4_spill] sm:$0xff] %v5604_v47  ;;  %v5607_v36 = vadd.f32 %v1492_v30, %v1065_v3  ;;  %v1502_v52 = vpop.f32.mrf.mxu1  ;;  %4550 = vmatmul.mubr.msk.bf16.gmra.mxu1 %vm904_vm0, %v5557_v58  ;;  %1313 = vmatprep.mubr.bf16.mxu0 %v7418_v2  ;;  %v5623_v40 = vsel %vm2438_vm2, %v2488_v39, %v2492_v51 }
  0xf3   : > { %v1067_v23 = vpop.f32.mrf.mxu0  ;;  %1750 = vmatprep.mubr.bf16.mxu1 %v7418_v2 }
  0xf4   : > { %7467 = vst [vmem:[#allocation5_spill] sm:$0xff] %v5607_v36  ;;  %v5620_v3 = vadd.f32 %v1494_v20, %v1067_v23  ;;  %v1504_v30 = vpop.f32.mrf.mxu1  ;;  %v7420_v20 = vshrl.u32 %v5587_v27, 16  ;;  %v7421_v23 = vshll.u32 %v5617_v16, 16 }
  0xf5   : > { %v1069_v12 = vpop.f32.mrf.mxu0 }
  0xf6   : > { %7468 = vst [vmem:[#allocation6_spill] sm:$0xff] %v5620_v3  ;;  %v5629_v11 = vadd.f32 %v1496_v29, %v1069_v12  ;;  %v1506_v22 = vpop.f32.mrf.mxu1  ;;  %v7473_v29 = vmov 0   ;;  %v869_v12 = vor.u32 %v7420_v20, %v865_v1  ;;  %v7475_v1 = vshll.u32 %v5271_v60, 16 }
  0xf7   : > { %v1071_v2 = vpop.f32.mrf.mxu0 }
  0xf8   : > { %7469 = vst [vmem:[#allocation7_spill] sm:$0xff] %v5629_v11  ;;  %v5634_v3 = vadd.f32 %v1498_v14, %v1071_v2  ;;  %v1508_v39 = vpop.f32.mrf.mxu1  ;;  %v873_v2 = vrot.slane %v7421_v23, 1  ;;  %v2496_v14 = vor.u32 %v2495_v53, %v2494_v41  ;;  %v2499_v20 = vrot.slane %v7475_v1, 2 }
  0xf9   : > { %v1075_v36 = vpop.f32.mrf.mxu0  ;;  %4516 = vmatmul.mubr.msk.bf16.gmra.mxu0 %vm904_vm0, %v866_v57  ;;  %v7476_v23 = vshrl.u32 %v5271_v60, 16  ;;  %v7479_v1 = vshll.u32 %v5638_v54, 16 }
  0xfa   : > { %7470 = vst [vmem:[#allocation8_spill] sm:$0xff] %v5634_v3  ;;  %v5640_v48 = vadd.f32 %v1502_v52, %v1075_v36  ;;  %v1512_v0 = vpop.f32.mrf.mxu1  ;;  %4551 = vmatmul.mubr.msk.bf16.gmra.mxu1 %vm904_vm0, %v5587_v27  ;;  %1323 = vmatprep.mubr.bf16.mxu0 %v7473_v29  ;;  %v5653_v52 = vsel %vm2438_vm2, %v2492_v51, %v2496_v14  ;;  %v7422_v3 = vshrl.u32 %v5617_v16, 16 }
  0xfb   : > { %v1077_v42 = vpop.f32.mrf.mxu0  ;;  %1760 = vmatprep.mubr.bf16.mxu1 %v7473_v29  ;;  %v2498_v53 = vrot.slane %v7476_v23, 1  ;;  %v881_v60 = vrot.slane %v7479_v1, 1  ;;  %v5677_v23 = vld [vmem:[%s5152_s30] sm:$0xff]  }
  0xfc   : > { %7472 = vst [vmem:[#allocation10_spill] sm:$0xff] %v5640_v48  ;;  %v5650_v57 = vadd.f32 %v1504_v30, %v1077_v42  ;;  %v1514_v36 = vpop.f32.mrf.mxu1  ;;  %v874_v30 = vsel %vm626_vm1, %v869_v12, %v873_v2  ;;  %v877_v11 = vor.u32 %v7422_v3, %v873_v2  ;;  %7481 = vst [vmem:[#allocation15_spill] sm:$0xff] %v5677_v23 }
  0xfd   : > { %v1079_v48 = vpop.f32.mrf.mxu0 }
  0xfe   : > { %7474 = vst [vmem:[#allocation11_spill] sm:$0xff] %v5650_v57  ;;  %v5661_v41 = vadd.f32 %v1506_v22, %v1079_v48  ;;  %v1516_v42 = vpop.f32.mrf.mxu1  ;;  %v882_v1 = vsel %vm626_vm1, %v877_v11, %v881_v60 }
  0xff   : > { %v1081_v57 = vpop.f32.mrf.mxu0 }
 0x100   : > { %7477 = vst [vmem:[#allocation12_spill] sm:$0xff] %v5661_v41  ;;  %v5664_v51 = vadd.f32 %v1508_v39, %v1081_v57  ;;  %v1518_v47 = vpop.f32.mrf.mxu1  ;;  %v2500_v39 = vor.u32 %v2499_v20, %v2498_v53  ;;  %v7423_v20 = vshrl.u32 %v5638_v54, 16  ;;  %v7424_v53 = vshll.u32 %v5677_v23, 16 }
 0x101   : > { %v1085_v49 = vpop.f32.mrf.mxu0  ;;  %4517 = vmatmul.mubr.msk.bf16.gmra.mxu0 %vm904_vm0, %v874_v30 }
 0x102   : > { %7478 = vst [vmem:[#allocation13_spill] sm:$0xff] %v5664_v51  ;;  %v5671_v45 = vadd.f32 %v1512_v0, %v1085_v49  ;;  %v1522_v22 = vpop.f32.mrf.mxu1  ;;  %4552 = vmatmul.mubr.msk.bf16.gmra.mxu1 %vm904_vm0, %v5617_v16  ;;  %1333 = vmatprep.mubr.bf16.mxu0 %v7473_v29  ;;  %v5683_v57 = vsel %vm2438_vm2, %v2496_v14, %v2500_v39  ;;  %v7483_v49 = vshll.u32 %v5286_v9, 16 }
 0x103   : > { %v1087_v48 = vpop.f32.mrf.mxu0  ;;  %1770 = vmatprep.mubr.bf16.mxu1 %v7473_v29 }
 0x104   : > { %7480 = vst [vmem:[#allocation14_spill] sm:$0xff] %v5671_v45  ;;  %v5680_v12 = vadd.f32 %v1514_v36, %v1087_v48  ;;  %v1524_v2 = vpop.f32.mrf.mxu1  ;;  %v2505_v0 = vrot.slane %v7483_v49, 2  ;;  %v2502_v36 = vshrl.u32 %v5286_v9, 16  ;;  %v889_v9 = vrot.slane %v7424_v53, 1 }
 0x105   : > { %v1089_v30 = vpop.f32.mrf.mxu0  ;;  %v7490_v53 = vshrl.u32 %v5304_v33, 16 }
 0x106   : > { %7482 = vst [vmem:[#allocation16_spill] sm:$0xff] %v5680_v12  ;;  %v5688_v3 = vadd.f32 %v1516_v42, %v1089_v30  ;;  %v1526_v45 = vpop.f32.mrf.mxu1  ;;  %v2504_v51 = vrot.slane %v2502_v36, 1  ;;  %v885_v42 = vor.u32 %v7423_v20, %v881_v60  ;;  %v7488_v36 = vshrl.u32 %v5293_v21, 16 }
 0x107   : > { %v1091_v48 = vpop.f32.mrf.mxu0  ;;  %v7489_v60 = vshll.u32 %v5304_v33, 16 }
 0x108   : > { %7484 = vst [vmem:[#allocation17_spill] sm:$0xff] %v5688_v3  ;;  %v5693_v12 = vadd.f32 %v1518_v47, %v1091_v48  ;;  %v1528_v14 = vpop.f32.mrf.mxu1  ;;  %v2506_v47 = vor.u32 %v2505_v0, %v2504_v51  ;;  %v2508_v48 = vrot.slane %v7488_v36, 1  ;;  %v2511_v51 = vrot.slane %v7490_v53, 1  ;;  %v4902_v3 = vld [vmem:[%s5036_s10] sm:$0xff]  }
 0x109   : > { %v1095_v41 = vpop.f32.mrf.mxu0  ;;  %4518 = vmatmul.mubr.msk.bf16.gmra.mxu0 %vm904_vm0, %v882_v1  ;;  %v2512_v20 = vrot.slane %v7489_v60, 2  ;;  %v1782_v23 = vrot.slane %v4902_v3, 1  ;;  %v7493_v60 = vshrl.u32 %v5322_v63, 16 }
 0x10a   : > { %7485 = vst [vmem:[#allocation18_spill] sm:$0xff] %v5693_v12  ;;  %v5696_v49 = vadd.f32 %v1522_v22, %v1095_v41  ;;  %v1532_v11 = vpop.f32.mrf.mxu1  ;;  %4553 = vmatmul.mubr.msk.bf16.gmra.mxu1 %vm904_vm0, %v5638_v54  ;;  %1343 = vmatprep.mubr.bf16.mxu0 %v7473_v29  ;;  %v5709_v22 = vsel %vm2438_vm2, %v2500_v39, %v2506_v47  ;;  %v7491_v47 = vshll.u32 %v5293_v21, 16 }
 0x10b   : > { %v1097_v30 = vpop.f32.mrf.mxu0  ;;  %2718 = vmatprep.mubr.bf16.mxu1 %v7473_v29 }
 0x10c   : > { %7486 = vst [vmem:[#allocation19_spill] sm:$0xff] %v5696_v49  ;;  %v5706_v1 = vadd.f32 %v1524_v2, %v1097_v30  ;;  %v1534_v41 = vpop.f32.mrf.mxu1  ;;  %v890_v2 = vsel %vm626_vm1, %v885_v42, %v889_v9  ;;  %v2509_v36 = vrot.slane %v7491_v47, 2  ;;  %v2513_v42 = vor.u32 %v2512_v20, %v2511_v51 }
 0x10d   : > { %v1099_v49 = vpop.f32.mrf.mxu0 }
 0x10e   : > { %7487 = vst [vmem:[#allocation20_spill] sm:$0xff] %v5706_v1  ;;  %v5717_v0 = vadd.f32 %v1526_v45, %v1099_v49  ;;  %v1536_v30 = vpop.f32.mrf.mxu1  ;;  %v4903_v45 = vld [vmem:[%s5036_s10 + $0x8] sm:$0xff]   ;;  %v2510_v49 = vor.u32 %v2509_v36, %v2508_v48 }
 0x10f   : > { %v1101_v1 = vpop.f32.mrf.mxu0 }
 0x110   : > { %v5720_v12 = vadd.f32 %v1528_v14, %v1101_v1  ;;  %v1538_v39 = vpop.f32.mrf.mxu1  ;;  %v1783_v14 = vrot.slane %v4903_v45, 1 }
 0x111   : > { %v1105_v54 = vpop.f32.mrf.mxu0  ;;  %4519 = vmatmul.mubr.msk.bf16.gmra.mxu0 %vm904_vm0, %v890_v2  ;;  %v2515_v2 = vrot.slane %v7493_v60, 1 }
 0x112   : > { %v5726_v33 = vadd.f32 %v1532_v11, %v1105_v54  ;;  %v1542_v53 = vpop.f32.mrf.mxu1  ;;  %4594 = vmatmul.mubr.msk.bf16.vlgmr.msra.gmra.mxu1 %vm904_vm0, %v5330_v6  ;;  %1989 = vmatprep.mubr.bf16.mxu0 %v7473_v29  ;;  %v5736_v54 = vsel %vm2438_vm2, %v2510_v49, %v2513_v42  ;;  %v7492_v6 = vshll.u32 %v5322_v63, 16  ;;  %v1784_v51 = vsel %vm1781_vm3, %v1782_v23, %v1783_v14  ;;  %v4904_v63 = vld [vmem:[%s5036_s10 + $0x10] sm:$0xff]  }
 0x113   : > { %v1107_v9 = vpop.f32.mrf.mxu0  ;;  %2728 = vmatprep.mubr.bf16.mxu1 %v7473_v29 }
 0x114   : > { %v5733_v21 = vadd.f32 %v1534_v41, %v1107_v9  ;;  %v1544_v3 = vpop.f32.mrf.mxu1  ;;  %v2516_v1 = vrot.slane %v7492_v6, 2 }
 0x115   : > { %v1109_v11 = vpop.f32.mrf.mxu0 }
 0x116   : > { %v5742_v48 = vadd.f32 %v1536_v30, %v1109_v11  ;;  %v1546_v20 = vpop.f32.mrf.mxu1  ;;  %v1785_v30 = vrot.slane %v4904_v63, 1  ;;  %v2517_v11 = vor.u32 %v2516_v1, %v2515_v2 }
 0x117   : > { %v1111_v47 = vpop.f32.mrf.mxu0 }
 0x118   : > { %v5745_v41 = vadd.f32 %v1538_v39, %v1111_v47  ;;  %v1548_v36 = vpop.f32.mrf.mxu1  ;;  %v5758_v60 = vsel %vm2438_vm2, %v2513_v42, %v2517_v11  ;;  %v1786_v2 = vsel %vm1781_vm3, %v1783_v14, %v1785_v30 }
 0x119   : > { %v1115_v45 = vpop.f32.mrf.mxu0  ;;  %4558 = vmatmul.mubr.msk.bf16.vlgmr.msra.gmra.mxu0 %vm904_vm0, %v1784_v51  ;;  %v7497_v51 = vshll.u32 %v5348_v18, 16 }
 0x11a   : > { %7494 = vst [vmem:[#allocation21_spill] sm:$0xff] %v5745_v41  ;;  %v5748_v49 = vadd.f32 %v1542_v53, %v1115_v45  ;;  %v1552_v9 = vpop.f32.mrf.mxu1  ;;  %4595 = vmatmul.mubr.msk.bf16.gmra.mxu1 %vm904_vm0, %v5353_v24  ;;  %1999 = vmatprep.mubr.bf16.mxu0 %v7473_v29  ;;  %v7498_v24 = vshrl.u32 %v5348_v18, 16  ;;  %v4905_v18 = vld [vmem:[%s5036_s10 + $0x18] sm:$0xff]  }
 0x11b   : > { %v1117_v6 = vpop.f32.mrf.mxu0  ;;  %2738 = vmatprep.mubr.bf16.mxu1 %v7473_v29  ;;  %v2520_v47 = vrot.slane %v7497_v51, 2 }
 0x11c   : > { %7495 = vst [vmem:[#allocation22_spill] sm:$0xff] %v5748_v49  ;;  %v5755_v23 = vadd.f32 %v1544_v3, %v1117_v6  ;;  %v1554_v39 = vpop.f32.mrf.mxu1  ;;  %v2519_v45 = vrot.slane %v7498_v24, 1 }
 0x11d   : > { %v1119_v53 = vpop.f32.mrf.mxu0 }
 0x11e   : > { %7496 = vst [vmem:[#allocation23_spill] sm:$0xff] %v5755_v23  ;;  %v5764_v49 = vadd.f32 %v1546_v20, %v1119_v53  ;;  %v1556_v1 = vpop.f32.mrf.mxu1  ;;  %v1787_v20 = vrot.slane %v4905_v18, 1  ;;  %v2521_v53 = vor.u32 %v2520_v47, %v2519_v45 }
 0x11f   : > { %v1121_v63 = vpop.f32.mrf.mxu0 }
 0x120   : > { %v5767_v3 = vadd.f32 %v1548_v36, %v1121_v63  ;;  %v1558_v6 = vpop.f32.mrf.mxu1  ;;  %v5780_v24 = vsel %vm2438_vm2, %v2517_v11, %v2521_v53  ;;  %v1788_v45 = vsel %vm1781_vm3, %v1785_v30, %v1787_v20 }
 0x121   : > { %v1125_v23 = vpop.f32.mrf.mxu0  ;;  %4559 = vmatmul.mubr.msk.bf16.gmra.mxu0 %vm904_vm0, %v1786_v2 }
 0x122   : > { %7499 = vst [vmem:[#allocation24_spill] sm:$0xff] %v5767_v3  ;;  %v5770_v42 = vadd.f32 %v1552_v9, %v1125_v23  ;;  %v1562_v41 = vpop.f32.mrf.mxu1  ;;  %4596 = vmatmul.mubr.msk.bf16.gmra.mxu1 %vm904_vm0, %v5375_v7  ;;  %2009 = vmatprep.mubr.bf16.mxu0 %v7473_v29  ;;  %v7502_v23 = vshll.u32 %v5371_v32, 16  ;;  %v7503_v7 = vshrl.u32 %v5371_v32, 16  ;;  %v4906_v32 = vld [vmem:[%s5036_s10 + $0x20] sm:$0xff]  }
 0x123   : > { %v1127_v51 = vpop.f32.mrf.mxu0  ;;  %2748 = vmatprep.mubr.bf16.mxu1 %v7473_v29 }
 0x124   : > { %7500 = vst [vmem:[#allocation25_spill] sm:$0xff] %v5770_v42  ;;  %v5777_v14 = vadd.f32 %v1554_v39, %v1127_v51  ;;  %v1564_v36 = vpop.f32.mrf.mxu1  ;;  %v2524_v2 = vrot.slane %v7502_v23, 2  ;;  %v2523_v63 = vrot.slane %v7503_v7, 1 }
 0x125   : > { %v1129_v9 = vpop.f32.mrf.mxu0 }
 0x126   : > { %7501 = vst [vmem:[#allocation26_spill] sm:$0xff] %v5777_v14  ;;  %v5786_v42 = vadd.f32 %v1556_v1, %v1129_v9  ;;  %v1566_v47 = vpop.f32.mrf.mxu1  ;;  %v1789_v1 = vrot.slane %v4906_v32, 1  ;;  %v2525_v9 = vor.u32 %v2524_v2, %v2523_v63 }
 0x127   : > { %v1131_v18 = vpop.f32.mrf.mxu0 }
 0x128   : > { %v5789_v39 = vadd.f32 %v1558_v6, %v1131_v18  ;;  %v1568_v51 = vpop.f32.mrf.mxu1  ;;  %v5802_v7 = vsel %vm2438_vm2, %v2521_v53, %v2525_v9  ;;  %v1790_v63 = vsel %vm1781_vm3, %v1787_v20, %v1789_v1 }
 0x129   : > { %v1135_v14 = vpop.f32.mrf.mxu0  ;;  %4560 = vmatmul.mubr.msk.bf16.gmra.mxu0 %vm904_vm0, %v1788_v45 }
 0x12a   : > { %7504 = vst [vmem:[#allocation27_spill] sm:$0xff] %v5789_v39  ;;  %v5792_v11 = vadd.f32 %v1562_v41, %v1135_v14  ;;  %v1572_v3 = vpop.f32.mrf.mxu1  ;;  %4597 = vmatmul.mubr.msk.bf16.gmra.mxu1 %vm904_vm0, %v5397_v31  ;;  %2019 = vmatprep.mubr.bf16.mxu0 %v7473_v29  ;;  %v7507_v14 = vshll.u32 %v5393_v38, 16  ;;  %v7508_v31 = vshrl.u32 %v5393_v38, 16  ;;  %v4907_v38 = vld [vmem:[%s5036_s10 + $0x28] sm:$0xff]  }
 0x12b   : > { %v1137_v23 = vpop.f32.mrf.mxu0  ;;  %2758 = vmatprep.mubr.bf16.mxu1 %v7473_v29 }
 0x12c   : > { %7505 = vst [vmem:[#allocation28_spill] sm:$0xff] %v5792_v11  ;;  %v5799_v30 = vadd.f32 %v1564_v36, %v1137_v23  ;;  %v1574_v6 = vpop.f32.mrf.mxu1  ;;  %v2528_v45 = vrot.slane %v7507_v14, 2  ;;  %v2527_v18 = vrot.slane %v7508_v31, 1 }
 0x12d   : > { %v1139_v41 = vpop.f32.mrf.mxu0 }
 0x12e   : > { %7506 = vst [vmem:[#allocation29_spill] sm:$0xff] %v5799_v30  ;;  %v5808_v11 = vadd.f32 %v1566_v47, %v1139_v41  ;;  %v1576_v2 = vpop.f32.mrf.mxu1  ;;  %v1791_v47 = vrot.slane %v4907_v38, 1  ;;  %v2529_v41 = vor.u32 %v2528_v45, %v2527_v18 }
 0x12f   : > { %v1141_v32 = vpop.f32.mrf.mxu0 }
 0x130   : > { %v5811_v36 = vadd.f32 %v1568_v51, %v1141_v32  ;;  %v1578_v23 = vpop.f32.mrf.mxu1  ;;  %v5824_v31 = vsel %vm2438_vm2, %v2525_v9, %v2529_v41  ;;  %v1792_v18 = vsel %vm1781_vm3, %v1789_v1, %v1791_v47 }
 0x131   : > { %v1145_v30 = vpop.f32.mrf.mxu0  ;;  %4561 = vmatmul.mubr.msk.bf16.gmra.mxu0 %vm904_vm0, %v1790_v63 }
 0x132   : > { %7509 = vst [vmem:[#allocation30_spill] sm:$0xff] %v5811_v36  ;;  %v5814_v53 = vadd.f32 %v1572_v3, %v1145_v30  ;;  %v1582_v39 = vpop.f32.mrf.mxu1  ;;  %4598 = vmatmul.mubr.msk.bf16.gmra.mxu1 %vm904_vm0, %v5419_v13  ;;  %2029 = vmatprep.mubr.bf16.mxu0 %v7473_v29  ;;  %v7512_v30 = vshll.u32 %v5415_v44, 16  ;;  %v7513_v13 = vshrl.u32 %v5415_v44, 16  ;;  %v4908_v44 = vld [vmem:[%s5036_s10 + $0x30] sm:$0xff]  }
 0x133   : > { %v1147_v14 = vpop.f32.mrf.mxu0  ;;  %2768 = vmatprep.mubr.bf16.mxu1 %v7473_v29 }
 0x134   : > { %7510 = vst [vmem:[#allocation31_spill] sm:$0xff] %v5814_v53  ;;  %v5821_v20 = vadd.f32 %v1574_v6, %v1147_v14  ;;  %v1584_v51 = vpop.f32.mrf.mxu1  ;;  %v2532_v63 = vrot.slane %v7512_v30, 2  ;;  %v2531_v32 = vrot.slane %v7513_v13, 1 }
 0x135   : > { %v1149_v3 = vpop.f32.mrf.mxu0 }
 0x136   : > { %7511 = vst [vmem:[#allocation32_spill] sm:$0xff] %v5821_v20  ;;  %v5830_v53 = vadd.f32 %v1576_v2, %v1149_v3  ;;  %v1586_v45 = vpop.f32.mrf.mxu1  ;;  %v1793_v2 = vrot.slane %v4908_v44, 1  ;;  %v2533_v3 = vor.u32 %v2532_v63, %v2531_v32 }
 0x137   : > { %v1151_v38 = vpop.f32.mrf.mxu0 }
 0x138   : > { %v5833_v6 = vadd.f32 %v1578_v23, %v1151_v38  ;;  %v1588_v14 = vpop.f32.mrf.mxu1  ;;  %v5846_v13 = vsel %vm2438_vm2, %v2529_v41, %v2533_v3  ;;  %v1794_v32 = vsel %vm1781_vm3, %v1791_v47, %v1793_v2 }
 0x139   : > { %v1155_v20 = vpop.f32.mrf.mxu0  ;;  %4562 = vmatmul.mubr.msk.bf16.gmra.mxu0 %vm904_vm0, %v1792_v18 }
 0x13a   : > { %7514 = vst [vmem:[#allocation33_spill] sm:$0xff] %v5833_v6  ;;  %v5836_v9 = vadd.f32 %v1582_v39, %v1155_v20  ;;  %v1592_v36 = vpop.f32.mrf.mxu1  ;;  %4599 = vmatmul.mubr.msk.bf16.gmra.mxu1 %vm904_vm0, %v5441_v46  ;;  %2039 = vmatprep.mubr.bf16.mxu0 %v7473_v29  ;;  %v7517_v20 = vshll.u32 %v5437_v50, 16  ;;  %v7518_v46 = vshrl.u32 %v5437_v50, 16  ;;  %v4909_v50 = vld [vmem:[%s5036_s10 + $0x38] sm:$0xff]  }
 0x13b   : > { %v1157_v30 = vpop.f32.mrf.mxu0  ;;  %2778 = vmatprep.mubr.bf16.mxu1 %v7473_v29 }
 0x13c   : > { %7515 = vst [vmem:[#allocation34_spill] sm:$0xff] %v5836_v9  ;;  %v5843_v1 = vadd.f32 %v1584_v51, %v1157_v30  ;;  %v1594_v23 = vpop.f32.mrf.mxu1  ;;  %v2536_v18 = vrot.slane %v7517_v20, 2  ;;  %v2535_v38 = vrot.slane %v7518_v46, 1 }
 0x13d   : > { %v1159_v39 = vpop.f32.mrf.mxu0 }
 0x13e   : > { %7516 = vst [vmem:[#allocation35_spill] sm:$0xff] %v5843_v1  ;;  %v5852_v9 = vadd.f32 %v1586_v45, %v1159_v39  ;;  %v1596_v63 = vpop.f32.mrf.mxu1  ;;  %v1795_v45 = vrot.slane %v4909_v50, 1  ;;  %v2537_v39 = vor.u32 %v2536_v18, %v2535_v38 }
 0x13f   : > { %v1161_v44 = vpop.f32.mrf.mxu0 }
 0x140   : > { %v5855_v51 = vadd.f32 %v1588_v14, %v1161_v44  ;;  %v1598_v30 = vpop.f32.mrf.mxu1  ;;  %v5868_v46 = vsel %vm2438_vm2, %v2533_v3, %v2537_v39  ;;  %v1796_v38 = vsel %vm1781_vm3, %v1793_v2, %v1795_v45 }
 0x141   : > { %v1165_v1 = vpop.f32.mrf.mxu0  ;;  %4563 = vmatmul.mubr.msk.bf16.gmra.mxu0 %vm904_vm0, %v1794_v32 }
 0x142   : > { %7519 = vst [vmem:[#allocation36_spill] sm:$0xff] %v5855_v51  ;;  %v5858_v41 = vadd.f32 %v1592_v36, %v1165_v1  ;;  %v1602_v6 = vpop.f32.mrf.mxu1  ;;  %4600 = vmatmul.mubr.msk.bf16.gmra.mxu1 %vm904_vm0, %v5463_v17  ;;  %2049 = vmatprep.mubr.bf16.mxu0 %v7473_v29  ;;  %v7522_v1 = vshll.u32 %v5459_v56, 16  ;;  %v7523_v17 = vshrl.u32 %v5459_v56, 16  ;;  %v4910_v56 = vld [vmem:[%s5036_s10 + $0x40] sm:$0xff]  }
 0x143   : > { %v1167_v20 = vpop.f32.mrf.mxu0  ;;  %2788 = vmatprep.mubr.bf16.mxu1 %v7473_v29 }
 0x144   : > { %7520 = vst [vmem:[#allocation37_spill] sm:$0xff] %v5858_v41  ;;  %v5865_v47 = vadd.f32 %v1594_v23, %v1167_v20  ;;  %v1604_v14 = vpop.f32.mrf.mxu1  ;;  %v2540_v32 = vrot.slane %v7522_v1, 2  ;;  %v2539_v44 = vrot.slane %v7523_v17, 1 }
 0x145   : > { %v1169_v36 = vpop.f32.mrf.mxu0 }
 0x146   : > { %7521 = vst [vmem:[#allocation38_spill] sm:$0xff] %v5865_v47  ;;  %v5874_v41 = vadd.f32 %v1596_v63, %v1169_v36  ;;  %v1606_v18 = vpop.f32.mrf.mxu1  ;;  %v1797_v63 = vrot.slane %v4910_v56, 1  ;;  %v2541_v36 = vor.u32 %v2540_v32, %v2539_v44 }
 0x147   : > { %v1171_v50 = vpop.f32.mrf.mxu0 }
 0x148   : > { %v5877_v23 = vadd.f32 %v1598_v30, %v1171_v50  ;;  %v1608_v20 = vpop.f32.mrf.mxu1  ;;  %v5890_v17 = vsel %vm2438_vm2, %v2537_v39, %v2541_v36  ;;  %v1798_v44 = vsel %vm1781_vm3, %v1795_v45, %v1797_v63 }
 0x149   : > { %v1175_v47 = vpop.f32.mrf.mxu0  ;;  %4564 = vmatmul.mubr.msk.bf16.gmra.mxu0 %vm904_vm0, %v1796_v38 }
 0x14a   : > { %7524 = vst [vmem:[#allocation39_spill] sm:$0xff] %v5877_v23  ;;  %v5880_v3 = vadd.f32 %v1602_v6, %v1175_v47  ;;  %v1612_v51 = vpop.f32.mrf.mxu1  ;;  %4601 = vmatmul.mubr.msk.bf16.gmra.mxu1 %vm904_vm0, %v5485_v25  ;;  %2059 = vmatprep.mubr.bf16.mxu0 %v7473_v29  ;;  %v7527_v47 = vshll.u32 %v5481_v62, 16  ;;  %v7528_v25 = vshrl.u32 %v5481_v62, 16  ;;  %v4911_v62 = vld [vmem:[%s5036_s10 + $0x48] sm:$0xff]  }
 0x14b   : > { %v1177_v1 = vpop.f32.mrf.mxu0  ;;  %2798 = vmatprep.mubr.bf16.mxu1 %v7473_v29 }
 0x14c   : > { %7525 = vst [vmem:[#allocation40_spill] sm:$0xff] %v5880_v3  ;;  %v5887_v2 = vadd.f32 %v1604_v14, %v1177_v1  ;;  %v1614_v30 = vpop.f32.mrf.mxu1  ;;  %v2544_v38 = vrot.slane %v7527_v47, 2  ;;  %v2543_v50 = vrot.slane %v7528_v25, 1 }
 0x14d   : > { %v1179_v6 = vpop.f32.mrf.mxu0 }
 0x14e   : > { %7526 = vst [vmem:[#allocation41_spill] sm:$0xff] %v5887_v2  ;;  %v5896_v3 = vadd.f32 %v1606_v18, %v1179_v6  ;;  %v1616_v32 = vpop.f32.mrf.mxu1  ;;  %v1799_v18 = vrot.slane %v4911_v62, 1  ;;  %v2545_v6 = vor.u32 %v2544_v38, %v2543_v50 }
 0x14f   : > { %v1181_v56 = vpop.f32.mrf.mxu0 }
 0x150   : > { %v5899_v14 = vadd.f32 %v1608_v20, %v1181_v56  ;;  %v1618_v1 = vpop.f32.mrf.mxu1  ;;  %v5912_v25 = vsel %vm2438_vm2, %v2541_v36, %v2545_v6  ;;  %v1800_v50 = vsel %vm1781_vm3, %v1797_v63, %v1799_v18 }
 0x151   : > { %v1185_v2 = vpop.f32.mrf.mxu0  ;;  %4565 = vmatmul.mubr.msk.bf16.gmra.mxu0 %vm904_vm0, %v1798_v44 }
 0x152   : > { %7529 = vst [vmem:[#allocation42_spill] sm:$0xff] %v5899_v14  ;;  %v5902_v39 = vadd.f32 %v1612_v51, %v1185_v2  ;;  %v1622_v23 = vpop.f32.mrf.mxu1  ;;  %4602 = vmatmul.mubr.msk.bf16.gmra.mxu1 %vm904_vm0, %v5507_v55  ;;  %2069 = vmatprep.mubr.bf16.mxu0 %v7473_v29  ;;  %v7532_v2 = vshll.u32 %v5503_v10, 16  ;;  %v7533_v55 = vshrl.u32 %v5503_v10, 16  ;;  %v4912_v10 = vld [vmem:[%s5036_s10 + $0x50] sm:$0xff]  }
 0x153   : > { %v1187_v47 = vpop.f32.mrf.mxu0  ;;  %2808 = vmatprep.mubr.bf16.mxu1 %v7473_v29 }
 0x154   : > { %7530 = vst [vmem:[#allocation43_spill] sm:$0xff] %v5902_v39  ;;  %v5909_v45 = vadd.f32 %v1614_v30, %v1187_v47  ;;  %v1624_v20 = vpop.f32.mrf.mxu1  ;;  %v2548_v44 = vrot.slane %v7532_v2, 2  ;;  %v2547_v56 = vrot.slane %v7533_v55, 1 }
 0x155   : > { %v1189_v51 = vpop.f32.mrf.mxu0 }
 0x156   : > { %7531 = vst [vmem:[#allocation44_spill] sm:$0xff] %v5909_v45  ;;  %v5918_v39 = vadd.f32 %v1616_v32, %v1189_v51  ;;  %v1626_v38 = vpop.f32.mrf.mxu1  ;;  %v1801_v32 = vrot.slane %v4912_v10, 1  ;;  %v2549_v51 = vor.u32 %v2548_v44, %v2547_v56  ;;  %v7538_v44 = vshrl.u32 %v5527_v19, 16 }
 0x157   : > { %v1191_v62 = vpop.f32.mrf.mxu0 }
 0x158   : > { %v5921_v30 = vadd.f32 %v1618_v1, %v1191_v62  ;;  %v1628_v47 = vpop.f32.mrf.mxu1  ;;  %v5934_v55 = vsel %vm2438_vm2, %v2545_v6, %v2549_v51  ;;  %v7537_v62 = vshll.u32 %v5527_v19, 16  ;;  %v2551_v56 = vrot.slane %v7538_v44, 1 }
 0x159   : > { %v1195_v45 = vpop.f32.mrf.mxu0  ;;  %4566 = vmatmul.mubr.msk.bf16.gmra.mxu0 %vm904_vm0, %v1800_v50 }
 0x15a   : > { %v5924_v36 = vadd.f32 %v1622_v23, %v1195_v45  ;;  %v1632_v14 = vpop.f32.mrf.mxu1  ;;  %4603 = vmatmul.mubr.msk.bf16.gmra.mxu1 %vm904_vm0, %v5533_v59  ;;  %2079 = vmatprep.mubr.bf16.mxu0 %v7473_v29  ;;  %v1802_v59 = vsel %vm1781_vm3, %v1799_v18, %v1801_v32  ;;  %v2552_v10 = vrot.slane %v7537_v62, 2  ;;  %v4913_v18 = vld [vmem:[%s5036_s10 + $0x58] sm:$0xff]  }
 0x15b   : > { %v1197_v2 = vpop.f32.mrf.mxu0  ;;  %2818 = vmatprep.mubr.bf16.mxu1 %v7473_v29 }
 0x15c   : > { %7534 = vst [vmem:[#allocation45_spill] sm:$0xff] %v5924_v36  ;;  %v5931_v63 = vadd.f32 %v1624_v20, %v1197_v2  ;;  %v1634_v1 = vpop.f32.mrf.mxu1  ;;  %v2553_v19 = vor.u32 %v2552_v10, %v2551_v56  ;;  %v7543_v56 = vshrl.u32 %v5557_v58, 16 }
 0x15d   : > { %v1199_v23 = vpop.f32.mrf.mxu0 }
 0x15e   : > { %7535 = vst [vmem:[#allocation46_spill] sm:$0xff] %v5931_v63  ;;  %v5936_v45 = vadd.f32 %v1626_v38, %v1199_v23  ;;  %v1636_v50 = vpop.f32.mrf.mxu1  ;;  %v1803_v23 = vrot.slane %v4913_v18, 1 }
 0x15f   : > { %v1201_v36 = vpop.f32.mrf.mxu0 }
 0x160   : > { %7536 = vst [vmem:[#allocation47_spill] sm:$0xff] %v5936_v45  ;;  %v5943_v20 = vadd.f32 %v1628_v47, %v1201_v36  ;;  %v1638_v2 = vpop.f32.mrf.mxu1 }
 0x161   : > { %v1205_v63 = vpop.f32.mrf.mxu0  ;;  %4567 = vmatmul.mubr.msk.bf16.gmra.mxu0 %vm904_vm0, %v1802_v59 }
 0x162   : > { %7539 = vst [vmem:[#allocation48_spill] sm:$0xff] %v5943_v20  ;;  %v5946_v6 = vadd.f32 %v1632_v14, %v1205_v63  ;;  %v1642_v38 = vpop.f32.mrf.mxu1  ;;  %4604 = vmatmul.mubr.msk.bf16.gmra.mxu1 %vm904_vm0, %v5563_v8  ;;  %2089 = vmatprep.mubr.bf16.mxu0 %v7473_v29  ;;  %v5956_v14 = vsel %vm2438_vm2, %v2549_v51, %v2553_v19 }
 0x163   : > { %v1207_v62 = vpop.f32.mrf.mxu0  ;;  %2828 = vmatprep.mubr.bf16.mxu1 %v7473_v29  ;;  %v1804_v8 = vsel %vm1781_vm3, %v1801_v32, %v1803_v23  ;;  %v4914_v32 = vld [vmem:[%s5036_s10 + $0x60] sm:$0xff]  }
 0x164   : > { %7540 = vst [vmem:[#allocation49_spill] sm:$0xff] %v5946_v6  ;;  %v5953_v47 = vadd.f32 %v1634_v1, %v1207_v62  ;;  %v1644_v36 = vpop.f32.mrf.mxu1  ;;  %v7541_v6 = vshll.u32 %v5557_v58, 16  ;;  %v2555_v62 = vrot.slane %v7543_v56, 1 }
 0x165   : > { %v1209_v44 = vpop.f32.mrf.mxu0 }
 0x166   : > { %v5958_v63 = vadd.f32 %v1636_v50, %v1209_v44  ;;  %v1646_v59 = vpop.f32.mrf.mxu1  ;;  %v2556_v18 = vrot.slane %v7541_v6, 2  ;;  %v1805_v6 = vrot.slane %v4914_v32, 1 }
 0x167   : > { %v1211_v20 = vpop.f32.mrf.mxu0 }
 0x168   : > { %v5963_v45 = vadd.f32 %v1638_v2, %v1211_v20  ;;  %v1648_v10 = vpop.f32.mrf.mxu1  ;;  %v5975_v20 = vor.u32 %v2556_v18, %v2555_v62  ;;  %v1806_v56 = vsel %vm1781_vm3, %v1803_v23, %v1805_v6 }
 0x169   : > { %v1215_v1 = vpop.f32.mrf.mxu0  ;;  %4568 = vmatmul.mubr.msk.bf16.gmra.mxu0 %vm904_vm0, %v1804_v8 }
 0x16a   : > { %7542 = vst [vmem:[#allocation50_spill] sm:$0xff] %v5963_v45  ;;  %v5968_v51 = vadd.f32 %v1642_v38, %v1215_v1  ;;  %v1652_v50 = vpop.f32.mrf.mxu1  ;;  %4605 = vmatmul.mubr.msk.bf16.gmra.mxu1 %vm904_vm0, %v5593_v28  ;;  %2099 = vmatprep.mubr.bf16.mxu0 %v7473_v29  ;;  %v5981_v38 = vsel %vm2438_vm2, %v2553_v19, %v5975_v20  ;;  %v4915_v19 = vld [vmem:[%s5036_s10 + $0x68] sm:$0xff]  }
 0x16b   : > { %v1217_v44 = vpop.f32.mrf.mxu0  ;;  %2838 = vmatprep.mubr.bf16.mxu1 %v7473_v29 }
 0x16c   : > { %7544 = vst [vmem:[#allocation51_spill] sm:$0xff] %v5968_v51  ;;  %v5977_v2 = vadd.f32 %v1644_v36, %v1217_v44  ;;  %v1654_v58 = vpop.f32.mrf.mxu1 }
 0x16d   : > { %v1219_v8 = vpop.f32.mrf.mxu0 }
 0x16e   : > { %v5983_v1 = vadd.f32 %v1646_v59, %v1219_v8  ;;  %v1656_v28 = vpop.f32.mrf.mxu1  ;;  %v1807_v59 = vrot.slane %v4915_v19, 1 }
 0x16f   : > { %v1221_v32 = vpop.f32.mrf.mxu0 }
 0x170   : > { %7545 = vst [vmem:[#allocation52_spill] sm:$0xff] %v5983_v1  ;;  %v5986_v51 = vadd.f32 %v1648_v10, %v1221_v32  ;;  %v1658_v45 = vpop.f32.mrf.mxu1 }
 0x171   : > { %v1225_v18 = vpop.f32.mrf.mxu0  ;;  %4569 = vmatmul.mubr.msk.bf16.gmra.mxu0 %vm904_vm0, %v1806_v56  ;;  %v1808_v56 = vsel %vm1781_vm3, %v1805_v6, %v1807_v59 }
 0x172   : > { %7546 = vst [vmem:[#allocation53_spill] sm:$0xff] %v5986_v51  ;;  %v5989_v36 = vadd.f32 %v1652_v50, %v1225_v18  ;;  %v1662_v62 = vpop.f32.mrf.mxu1  ;;  %4606 = vmatmul.mubr.msk.bf16.gmra.mxu1 %vm904_vm0, %v5623_v40  ;;  %2109 = vmatprep.mubr.bf16.mxu0 %v7473_v29 }
 0x173   : > { %v1227_v44 = vpop.f32.mrf.mxu0  ;;  %2848 = vmatprep.mubr.bf16.mxu1 %v7473_v29 }
 0x174   : > { %7547 = vst [vmem:[#allocation54_spill] sm:$0xff] %v5989_v36  ;;  %v5996_v23 = vadd.f32 %v1654_v58, %v1227_v44  ;;  %v1664_v10 = vpop.f32.mrf.mxu1  ;;  %v4916_v58 = vld [vmem:[%s5036_s10 + $0x70] sm:$0xff]  }
 0x175   : > { %v1229_v8 = vpop.f32.mrf.mxu0 }
 0x176   : > { %v5998_v32 = vadd.f32 %v1656_v28, %v1229_v8  ;;  %v1666_v50 = vpop.f32.mrf.mxu1  ;;  %v1809_v28 = vrot.slane %v4916_v58, 1 }
 0x177   : > { %v1231_v18 = vpop.f32.mrf.mxu0 }
 0x178   : > { %7548 = vst [vmem:[#allocation55_spill] sm:$0xff] %v5998_v32  ;;  %v6001_v36 = vadd.f32 %v1658_v45, %v1231_v18  ;;  %v1668_v40 = vpop.f32.mrf.mxu1 }
 0x179   : > { %v1235_v51 = vpop.f32.mrf.mxu0  ;;  %4570 = vmatmul.mubr.msk.bf16.gmra.mxu0 %vm904_vm0, %v1808_v56 }
 0x17a   : > { %7549 = vst [vmem:[#allocation56_spill] sm:$0xff] %v6001_v36  ;;  %v6004_v19 = vadd.f32 %v1662_v62, %v1235_v51  ;;  %v1672_v1 = vpop.f32.mrf.mxu1  ;;  %4607 = vmatmul.mubr.msk.bf16.gmra.mxu1 %vm904_vm0, %v5653_v52  ;;  %2119 = vmatprep.mubr.bf16.mxu0 %v7473_v29  ;;  %v1810_v62 = vsel %vm1781_vm3, %v1807_v59, %v1809_v28 }
 0x17b   : > { %v1237_v44 = vpop.f32.mrf.mxu0  ;;  %2858 = vmatprep.mubr.bf16.mxu1 %v7473_v29 }
 0x17c   : > { %7550 = vst [vmem:[#allocation57_spill] sm:$0xff] %v6004_v19  ;;  %v6011_v45 = vadd.f32 %v1664_v10, %v1237_v44  ;;  %v1674_v6 = vpop.f32.mrf.mxu1  ;;  %v4917_v10 = vld [vmem:[%s5036_s10 + $0x78] sm:$0xff]  }
 0x17d   : > { %v1239_v8 = vpop.f32.mrf.mxu0 }
 0x17e   : > { %v6013_v18 = vadd.f32 %v1666_v50, %v1239_v8  ;;  %v1676_v51 = vpop.f32.mrf.mxu1  ;;  %v1811_v50 = vrot.slane %v4917_v10, 1 }
 0x17f   : > { %v1241_v56 = vpop.f32.mrf.mxu0 }
 0x180   : > { %7551 = vst [vmem:[#allocation58_spill] sm:$0xff] %v6013_v18  ;;  %v6016_v19 = vadd.f32 %v1668_v40, %v1241_v56  ;;  %v1678_v52 = vpop.f32.mrf.mxu1 }
 0x181   : > { %v1245_v36 = vpop.f32.mrf.mxu0  ;;  %4571 = vmatmul.mubr.msk.bf16.gmra.mxu0 %vm904_vm0, %v1810_v62 }
 0x182   : > { %7552 = vst [vmem:[#allocation59_spill] sm:$0xff] %v6016_v19  ;;  %v6019_v58 = vadd.f32 %v1672_v1, %v1245_v36  ;;  %v1682_v32 = vpop.f32.mrf.mxu1  ;;  %4608 = vmatmul.mubr.msk.bf16.gmra.mxu1 %vm904_vm0, %v5683_v57  ;;  %2129 = vmatprep.mubr.bf16.mxu0 %v7473_v29  ;;  %v1812_v36 = vsel %vm1781_vm3, %v1809_v28, %v1811_v50 }
 0x183   : > { %v1247_v44 = vpop.f32.mrf.mxu0  ;;  %2868 = vmatprep.mubr.bf16.mxu1 %v7473_v29 }
 0x184   : > { %7553 = vst [vmem:[#allocation60_spill] sm:$0xff] %v6019_v58  ;;  %v6026_v59 = vadd.f32 %v1674_v6, %v1247_v44  ;;  %v1684_v40 = vpop.f32.mrf.mxu1  ;;  %v4918_v6 = vld [vmem:[%s5097_s24] sm:$0xff]  }
 0x185   : > { %v1249_v8 = vpop.f32.mrf.mxu0 }
 0x186   : > { %v6028_v56 = vadd.f32 %v1676_v51, %v1249_v8  ;;  %v1686_v1 = vpop.f32.mrf.mxu1  ;;  %v1813_v51 = vrot.slane %v4918_v6, 1 }
 0x187   : > { %v1251_v62 = vpop.f32.mrf.mxu0 }
 0x188   : > { %7554 = vst [vmem:[#allocation61_spill] sm:$0xff] %v6028_v56  ;;  %v6031_v58 = vadd.f32 %v1678_v52, %v1251_v62  ;;  %v1688_v57 = vpop.f32.mrf.mxu1 }
 0x189   : > { %v1255_v19 = vpop.f32.mrf.mxu0  ;;  %4572 = vmatmul.mubr.msk.bf16.gmra.mxu0 %vm904_vm0, %v1812_v36 }
 0x18a   : > { %7555 = vst [vmem:[#allocation62_spill] sm:$0xff] %v6031_v58  ;;  %v6034_v10 = vadd.f32 %v1682_v32, %v1255_v19  ;;  %v1692_v18 = vpop.f32.mrf.mxu1  ;;  %4609 = vmatmul.mubr.msk.bf16.gmra.mxu1 %vm904_vm0, %v5709_v22  ;;  %2139 = vmatprep.mubr.bf16.mxu0 %v7473_v29  ;;  %v1814_v19 = vsel %vm1781_vm3, %v1811_v50, %v1813_v51 }
 0x18b   : > { %v1257_v44 = vpop.f32.mrf.mxu0  ;;  %2878 = vmatprep.mubr.bf16.mxu1 %v7473_v29 }
 0x18c   : > { %7556 = vst [vmem:[#allocation63_spill] sm:$0xff] %v6034_v10  ;;  %v6041_v28 = vadd.f32 %v1684_v40, %v1257_v44  ;;  %v1694_v52 = vpop.f32.mrf.mxu1  ;;  %v4919_v40 = vld [vmem:[%s5104_s27] sm:$0xff]   ;;  %v4920_v44 = vld [vmem:[%s5104_s27 + $0x8] sm:$0xff]  }
 0x18d   : > { %v1259_v8 = vpop.f32.mrf.mxu0 }
 0x18e   : > { %7557 = vst [vmem:[#allocation64_spill] sm:$0xff] %v6041_v28  ;;  %v6043_v36 = vadd.f32 %v1686_v1, %v1259_v8  ;;  %v1696_v32 = vpop.f32.mrf.mxu1  ;;  %v1815_v1 = vrot.slane %v4919_v40, 1  ;;  %v1816_v8 = vrot.slane %v4920_v44, 1 }
 0x18f   : > { %v1261_v62 = vpop.f32.mrf.mxu0 }
 0x190   : > { %7558 = vst [vmem:[#allocation65_spill] sm:$0xff] %v6043_v36  ;;  %v6046_v22 = vadd.f32 %v1688_v57, %v1261_v62  ;;  %v1698_v10 = vpop.f32.mrf.mxu1  ;;  %v1817_v62 = vsel %vm1781_vm3, %v1815_v1, %v1816_v8 }
 0x191   : > { %v1265_v56 = vpop.f32.mrf.mxu0  ;;  %4573 = vmatmul.mubr.msk.bf16.gmra.mxu0 %vm904_vm0, %v1814_v19 }
 0x192   : > { %7559 = vst [vmem:[#allocation66_spill] sm:$0xff] %v6046_v22  ;;  %v6049_v6 = vadd.f32 %v1692_v18, %v1265_v56  ;;  %v1702_v58 = vpop.f32.mrf.mxu1  ;;  %4610 = vmatmul.mubr.msk.bf16.gmra.mxu1 %vm904_vm0, %v5736_v54  ;;  %2149 = vmatprep.mubr.bf16.mxu0 %v7473_v29 }
 0x193   : > { %v1267_v50 = vpop.f32.mrf.mxu0  ;;  %2888 = vmatprep.mubr.bf16.mxu1 %v7473_v29 }
 0x194   : > { %7560 = vst [vmem:[#allocation67_spill] sm:$0xff] %v6049_v6  ;;  %v6057_v57 = vadd.f32 %v1694_v52, %v1267_v50  ;;  %v1704_v51 = vpop.f32.mrf.mxu1  ;;  %v4921_v52 = vld [vmem:[%s5104_s27 + $0x10] sm:$0xff]  }
 0x195   : > { %v1269_v19 = vpop.f32.mrf.mxu0 }
 0x196   : > { %7561 = vst [vmem:[#allocation68_spill] sm:$0xff] %v6057_v57  ;;  %v6059_v18 = vadd.f32 %v1696_v32, %v1269_v19  ;;  %v1706_v56 = vpop.f32.mrf.mxu1  ;;  %v1818_v32 = vrot.slane %v4921_v52, 1 }
 0x197   : > { %v1271_v54 = vpop.f32.mrf.mxu0 }
 0x198   : > { %7562 = vst [vmem:[#allocation69_spill] sm:$0xff] %v6059_v18  ;;  %v6062_v6 = vadd.f32 %v1698_v10, %v1271_v54  ;;  %v1708_v22 = vpop.f32.mrf.mxu1 }
 0x199   : > { %v1275_v40 = vpop.f32.mrf.mxu0  ;;  %4574 = vmatmul.mubr.msk.bf16.gmra.mxu0 %vm904_vm0, %v1817_v62  ;;  %v1819_v62 = vsel %vm1781_vm3, %v1816_v8, %v1818_v32 }
 0x19a   : > { %7563 = vst [vmem:[#allocation70_spill] sm:$0xff] %v6062_v6  ;;  %v6065_v44 = vadd.f32 %v1702_v58, %v1275_v40  ;;  %v1712_v36 = vpop.f32.mrf.mxu1  ;;  %4611 = vmatmul.mubr.msk.bf16.gmra.mxu1 %vm904_vm0, %v5758_v60  ;;  %2159 = vmatprep.mubr.bf16.mxu0 %v7473_v29 }
 0x19b   : > { %v1277_v50 = vpop.f32.mrf.mxu0  ;;  %2898 = vmatprep.mubr.bf16.mxu1 %v7473_v29 }
 0x19c   : > { %7564 = vst [vmem:[#allocation71_spill] sm:$0xff] %v6065_v44  ;;  %v6072_v10 = vadd.f32 %v1704_v51, %v1277_v50  ;;  %v1714_v1 = vpop.f32.mrf.mxu1  ;;  %v4922_v51 = vld [vmem:[%s5104_s27 + $0x18] sm:$0xff]  }
 0x19d   : > { %v1279_v19 = vpop.f32.mrf.mxu0 }
 0x19e   : > { %7565 = vst [vmem:[#allocation72_spill] sm:$0xff] %v6072_v10  ;;  %v6074_v54 = vadd.f32 %v1706_v56, %v1279_v19  ;;  %v1716_v58 = vpop.f32.mrf.mxu1  ;;  %v1820_v56 = vrot.slane %v4922_v51, 1 }
 0x19f   : > { %v1281_v40 = vpop.f32.mrf.mxu0 }
 0x1a0   : > { %7566 = vst [vmem:[#allocation73_spill] sm:$0xff] %v6074_v54  ;;  %v6077_v44 = vadd.f32 %v1708_v22, %v1281_v40  ;;  %v1718_v60 = vpop.f32.mrf.mxu1 }
 0x1a1   : > { %v1285_v6 = vpop.f32.mrf.mxu0  ;;  %4575 = vmatmul.mubr.msk.bf16.gmra.mxu0 %vm904_vm0, %v1819_v62 }
 0x1a2   : > { %7567 = vst [vmem:[#allocation74_spill] sm:$0xff] %v6077_v44  ;;  %v6080_v52 = vadd.f32 %v1712_v36, %v1285_v6  ;;  %v1722_v18 = vpop.f32.mrf.mxu1  ;;  %4612 = vmatmul.mubr.msk.bf16.gmra.mxu1 %vm904_vm0, %v5780_v24  ;;  %2169 = vmatprep.mubr.bf16.mxu0 %v7473_v29  ;;  %v1821_v6 = vsel %vm1781_vm3, %v1818_v32, %v1820_v56 }
 0x1a3   : > { %v1287_v50 = vpop.f32.mrf.mxu0  ;;  %2908 = vmatprep.mubr.bf16.mxu1 %v7473_v29 }
 0x1a4   : > { %7568 = vst [vmem:[#allocation75_spill] sm:$0xff] %v6080_v52  ;;  %v6087_v22 = vadd.f32 %v1714_v1, %v1287_v50  ;;  %v1724_v8 = vpop.f32.mrf.mxu1  ;;  %v4923_v1 = vld [vmem:[%s5104_s27 + $0x20] sm:$0xff]  }
 0x1a5   : > { %v1289_v19 = vpop.f32.mrf.mxu0 }
 0x1a6   : > { %7569 = vst [vmem:[#allocation76_spill] sm:$0xff] %v6087_v22  ;;  %v6089_v40 = vadd.f32 %v1716_v58, %v1289_v19  ;;  %v1726_v36 = vpop.f32.mrf.mxu1  ;;  %v1822_v58 = vrot.slane %v4923_v1, 1 }
 0x1a7   : > { %v1291_v62 = vpop.f32.mrf.mxu0 }
 0x1a8   : > { %7570 = vst [vmem:[#allocation77_spill] sm:$0xff] %v6089_v40  ;;  %v6092_v52 = vadd.f32 %v1718_v60, %v1291_v62  ;;  %v1728_v24 = vpop.f32.mrf.mxu1 }
 0x1a9   : > { %v1295_v54 = vpop.f32.mrf.mxu0  ;;  %4576 = vmatmul.mubr.msk.bf16.gmra.mxu0 %vm904_vm0, %v1821_v6 }
 0x1aa   : > { %7571 = vst [vmem:[#allocation78_spill] sm:$0xff] %v6092_v52  ;;  %v6095_v51 = vadd.f32 %v1722_v18, %v1295_v54  ;;  %v1732_v44 = vpop.f32.mrf.mxu1  ;;  %4613 = vmatmul.mubr.msk.bf16.gmra.mxu1 %vm904_vm0, %v5802_v7  ;;  %2179 = vmatprep.mubr.bf16.mxu0 %v7473_v29  ;;  %v1823_v54 = vsel %vm1781_vm3, %v1820_v56, %v1822_v58 }
 0x1ab   : > { %v1297_v50 = vpop.f32.mrf.mxu0  ;;  %2918 = vmatprep.mubr.bf16.mxu1 %v7473_v29 }
 0x1ac   : > { %7572 = vst [vmem:[#allocation79_spill] sm:$0xff] %v6095_v51  ;;  %v6102_v32 = vadd.f32 %v1724_v8, %v1297_v50  ;;  %v1734_v60 = vpop.f32.mrf.mxu1  ;;  %v4924_v8 = vld [vmem:[%s5104_s27 + $0x28] sm:$0xff]  }
 0x1ad   : > { %v1299_v19 = vpop.f32.mrf.mxu0 }
 0x1ae   : > { %7573 = vst [vmem:[#allocation80_spill] sm:$0xff] %v6102_v32  ;;  %v6104_v62 = vadd.f32 %v1726_v36, %v1299_v19  ;;  %v1736_v18 = vpop.f32.mrf.mxu1  ;;  %v1824_v36 = vrot.slane %v4924_v8, 1 }
 0x1af   : > { %v1301_v6 = vpop.f32.mrf.mxu0 }
 0x1b0   : > { %7574 = vst [vmem:[#allocation81_spill] sm:$0xff] %v6104_v62  ;;  %v6107_v51 = vadd.f32 %v1728_v24, %v1301_v6  ;;  %v1738_v7 = vpop.f32.mrf.mxu1 }
 0x1b1   : > { %v1305_v52 = vpop.f32.mrf.mxu0  ;;  %4577 = vmatmul.mubr.msk.bf16.gmra.mxu0 %vm904_vm0, %v1823_v54 }
 0x1b2   : > { %7575 = vst [vmem:[#allocation82_spill] sm:$0xff] %v6107_v51  ;;  %v6110_v1 = vadd.f32 %v1732_v44, %v1305_v52  ;;  %v1742_v40 = vpop.f32.mrf.mxu1  ;;  %4614 = vmatmul.mubr.msk.bf16.gmra.mxu1 %vm904_vm0, %v5824_v31  ;;  %2189 = vmatprep.mubr.bf16.mxu0 %v7473_v29  ;;  %v1825_v52 = vsel %vm1781_vm3, %v1822_v58, %v1824_v36 }
 0x1b3   : > { %v1307_v50 = vpop.f32.mrf.mxu0  ;;  %2928 = vmatprep.mubr.bf16.mxu1 %v7473_v29 }
 0x1b4   : > { %7576 = vst [vmem:[#allocation83_spill] sm:$0xff] %v6110_v1  ;;  %v6117_v56 = vadd.f32 %v1734_v60, %v1307_v50  ;;  %v1744_v24 = vpop.f32.mrf.mxu1  ;;  %v4925_v60 = vld [vmem:[%s5104_s27 + $0x30] sm:$0xff]  }
 0x1b5   : > { %v1309_v19 = vpop.f32.mrf.mxu0 }
 0x1b6   : > { %7577 = vst [vmem:[#allocation84_spill] sm:$0xff] %v6117_v56  ;;  %v6119_v6 = vadd.f32 %v1736_v18, %v1309_v19  ;;  %v1746_v44 = vpop.f32.mrf.mxu1  ;;  %v1826_v18 = vrot.slane %v4925_v60, 1 }
 0x1b7   : > { %v1311_v54 = vpop.f32.mrf.mxu0 }
 0x1b8   : > { %7578 = vst [vmem:[#allocation85_spill] sm:$0xff] %v6119_v6  ;;  %v6122_v1 = vadd.f32 %v1738_v7, %v1311_v54  ;;  %v1748_v31 = vpop.f32.mrf.mxu1 }
 0x1b9   : > { %v1315_v51 = vpop.f32.mrf.mxu0  ;;  %4578 = vmatmul.mubr.msk.bf16.gmra.mxu0 %vm904_vm0, %v1825_v52 }
 0x1ba   : > { %7579 = vst [vmem:[#allocation86_spill] sm:$0xff] %v6122_v1  ;;  %v6125_v8 = vadd.f32 %v1742_v40, %v1315_v51  ;;  %v1752_v62 = vpop.f32.mrf.mxu1  ;;  %4615 = vmatmul.mubr.msk.bf16.gmra.mxu1 %vm904_vm0, %v5846_v13  ;;  %2199 = vmatprep.mubr.bf16.mxu0 %v7473_v29  ;;  %v1827_v51 = vsel %vm1781_vm3, %v1824_v36, %v1826_v18 }
 0x1bb   : > { %v1317_v50 = vpop.f32.mrf.mxu0  ;;  %2938 = vmatprep.mubr.bf16.mxu1 %v7473_v29 }
 0x1bc   : > { %7580 = vst [vmem:[#allocation87_spill] sm:$0xff] %v6125_v8  ;;  %v6132_v58 = vadd.f32 %v1744_v24, %v1317_v50  ;;  %v1754_v7 = vpop.f32.mrf.mxu1  ;;  %v4926_v24 = vld [vmem:[%s5104_s27 + $0x38] sm:$0xff]  }
 0x1bd   : > { %v1319_v19 = vpop.f32.mrf.mxu0 }
 0x1be   : > { %7581 = vst [vmem:[#allocation88_spill] sm:$0xff] %v6132_v58  ;;  %v6134_v54 = vadd.f32 %v1746_v44, %v1319_v19  ;;  %v1756_v40 = vpop.f32.mrf.mxu1  ;;  %v1828_v44 = vrot.slane %v4926_v24, 1 }
 0x1bf   : > { %v1321_v52 = vpop.f32.mrf.mxu0 }
 0x1c0   : > { %7582 = vst [vmem:[#allocation89_spill] sm:$0xff] %v6134_v54  ;;  %v6137_v8 = vadd.f32 %v1748_v31, %v1321_v52  ;;  %v1758_v13 = vpop.f32.mrf.mxu1 }
 0x1c1   : > { %v1325_v1 = vpop.f32.mrf.mxu0  ;;  %4579 = vmatmul.mubr.msk.bf16.gmra.mxu0 %vm904_vm0, %v1827_v51 }
 0x1c2   : > { %7583 = vst [vmem:[#allocation90_spill] sm:$0xff] %v6137_v8  ;;  %v6140_v60 = vadd.f32 %v1752_v62, %v1325_v1  ;;  %v1762_v6 = vpop.f32.mrf.mxu1  ;;  %4616 = vmatmul.mubr.msk.bf16.gmra.mxu1 %vm904_vm0, %v5868_v46  ;;  %2209 = vmatprep.mubr.bf16.mxu0 %v7473_v29  ;;  %v1829_v1 = vsel %vm1781_vm3, %v1826_v18, %v1828_v44 }
 0x1c3   : > { %v1327_v50 = vpop.f32.mrf.mxu0  ;;  %2948 = vmatprep.mubr.bf16.mxu1 %v7473_v29 }
 0x1c4   : > { %7584 = vst [vmem:[#allocation91_spill] sm:$0xff] %v6140_v60  ;;  %v6147_v36 = vadd.f32 %v1754_v7, %v1327_v50  ;;  %v1764_v31 = vpop.f32.mrf.mxu1  ;;  %v4927_v7 = vld [vmem:[%s5104_s27 + $0x40] sm:$0xff]  }
 0x1c5   : > { %v1329_v19 = vpop.f32.mrf.mxu0 }
 0x1c6   : > { %7585 = vst [vmem:[#allocation92_spill] sm:$0xff] %v6147_v36  ;;  %v6149_v52 = vadd.f32 %v1756_v40, %v1329_v19  ;;  %v1766_v62 = vpop.f32.mrf.mxu1  ;;  %v1830_v40 = vrot.slane %v4927_v7, 1 }
 0x1c7   : > { %v1331_v51 = vpop.f32.mrf.mxu0 }
 0x1c8   : > { %7586 = vst [vmem:[#allocation93_spill] sm:$0xff] %v6149_v52  ;;  %v6152_v60 = vadd.f32 %v1758_v13, %v1331_v51  ;;  %v1768_v46 = vpop.f32.mrf.mxu1 }
 0x1c9   : > { %v1335_v8 = vpop.f32.mrf.mxu0  ;;  %4580 = vmatmul.mubr.msk.bf16.gmra.mxu0 %vm904_vm0, %v1829_v1 }
 0x1ca   : > { %7587 = vst [vmem:[#allocation94_spill] sm:$0xff] %v6152_v60  ;;  %v6155_v24 = vadd.f32 %v1762_v6, %v1335_v8  ;;  %v1772_v54 = vpop.f32.mrf.mxu1  ;;  %4617 = vmatmul.mubr.msk.bf16.gmra.mxu1 %vm904_vm0, %v5890_v17  ;;  %2219 = vmatprep.mubr.bf16.mxu0 %v7473_v29  ;;  %v1831_v8 = vsel %vm1781_vm3, %v1828_v44, %v1830_v40 }
 0x1cb   : > { %v1337_v50 = vpop.f32.mrf.mxu0  ;;  %2958 = vmatprep.mubr.bf16.mxu1 %v7473_v29 }
 0x1cc   : > { %7588 = vst [vmem:[#allocation95_spill] sm:$0xff] %v6155_v24  ;;  %v6162_v18 = vadd.f32 %v1764_v31, %v1337_v50  ;;  %v1774_v13 = vpop.f32.mrf.mxu1  ;;  %v4928_v31 = vld [vmem:[%s5104_s27 + $0x48] sm:$0xff]  }
 0x1cd   : > { %v1339_v19 = vpop.f32.mrf.mxu0 }
 0x1ce   : > { %7589 = vst [vmem:[#allocation96_spill] sm:$0xff] %v6162_v18  ;;  %v6164_v51 = vadd.f32 %v1766_v62, %v1339_v19  ;;  %v1776_v6 = vpop.f32.mrf.mxu1  ;;  %v1832_v62 = vrot.slane %v4928_v31, 1 }
 0x1cf   : > { %v1341_v1 = vpop.f32.mrf.mxu0 }
 0x1d0   : > { %7590 = vst [vmem:[#allocation97_spill] sm:$0xff] %v6164_v51  ;;  %v6167_v24 = vadd.f32 %v1768_v46, %v1341_v1  ;;  %v1778_v17 = vpop.f32.mrf.mxu1 }
 0x1d1   : > { %v1345_v60 = vpop.f32.mrf.mxu0  ;;  %4581 = vmatmul.mubr.msk.bf16.gmra.mxu0 %vm904_vm0, %v1831_v8 }
 0x1d2   : > { %7591 = vst [vmem:[#allocation98_spill] sm:$0xff] %v6167_v24  ;;  %v6170_v7 = vadd.f32 %v1772_v54, %v1345_v60  ;;  %v2720_v52 = vpop.f32.mrf.mxu1  ;;  %4618 = vmatmul.mubr.msk.bf16.gmra.mxu1 %vm904_vm0, %v5912_v25  ;;  %2229 = vmatprep.mubr.bf16.mxu0 %v7473_v29  ;;  %v1833_v54 = vsel %vm1781_vm3, %v1830_v40, %v1832_v62 }
 0x1d3   : > { %v1347_v50 = vpop.f32.mrf.mxu0  ;;  %2968 = vmatprep.mubr.bf16.mxu1 %v7473_v29 }
 0x1d4   : > { %7592 = vst [vmem:[#allocation99_spill] sm:$0xff] %v6170_v7  ;;  %v6177_v44 = vadd.f32 %v1774_v13, %v1347_v50  ;;  %v2722_v46 = vpop.f32.mrf.mxu1  ;;  %v4929_v13 = vld [vmem:[%s5104_s27 + $0x50] sm:$0xff]  }
 0x1d5   : > { %v1349_v19 = vpop.f32.mrf.mxu0 }
 0x1d6   : > { %7593 = vst [vmem:[#allocation100_spill] sm:$0xff] %v6177_v44  ;;  %v6179_v1 = vadd.f32 %v1776_v6, %v1349_v19  ;;  %v2724_v60 = vpop.f32.mrf.mxu1  ;;  %v1834_v6 = vrot.slane %v4929_v13, 1 }
 0x1d7   : > { %v1351_v8 = vpop.f32.mrf.mxu0 }
 0x1d8   : > { %7594 = vst [vmem:[#allocation101_spill] sm:$0xff] %v6179_v1  ;;  %v6182_v7 = vadd.f32 %v1778_v17, %v1351_v8  ;;  %v2726_v25 = vpop.f32.mrf.mxu1 }
 0x1d9   : > { %v1991_v24 = vpop.f32.mrf.mxu0  ;;  %4582 = vmatmul.mubr.msk.bf16.gmra.mxu0 %vm904_vm0, %v1833_v54 }
 0x1da   : > { %7595 = vst [vmem:[#allocation102_spill] sm:$0xff] %v6182_v7  ;;  %v2310_v31 = vadd.f32 %v1991_v24, %v5517_v4  ;;  %v2730_v51 = vpop.f32.mrf.mxu1  ;;  %4619 = vmatmul.mubr.msk.bf16.gmra.mxu1 %vm904_vm0, %v5934_v55  ;;  %2239 = vmatprep.mubr.bf16.mxu0 %v7473_v29  ;;  %v1835_v4 = vsel %vm1781_vm3, %v1832_v62, %v1834_v6  ;;  %v4930_v62 = vld [vmem:[%s5104_s27 + $0x58] sm:$0xff]  }
 0x1db   : > { %v1993_v50 = vpop.f32.mrf.mxu0  ;;  %2978 = vmatprep.mubr.bf16.mxu1 %v7473_v29 }
 0x1dc   : > { %v3039_v40 = vadd.f32 %v2720_v52, %v2310_v31  ;;  %v2311_v17 = vadd.f32 %v1993_v50, %v5530_v35  ;;  %v2732_v19 = vpop.f32.mrf.mxu1  ;;  %v1836_v31 = vrot.slane %v4930_v62, 1 }
 0x1dd   : > { %v1995_v8 = vpop.f32.mrf.mxu0 }
 0x1de   : > { %v3040_v7 = vadd.f32 %v2722_v46, %v2311_v17  ;;  %v2312_v54 = vadd.f32 %v1995_v8, %v5539_v37  ;;  %v2734_v24 = vpop.f32.mrf.mxu1  ;;  %v3330_v1 = vmul.f32 %v3039_v40, %v3039_v40 }
 0x1df   : > { %v1997_v55 = vpop.f32.mrf.mxu0 }
 0x1e0   : > { %v3331_v44 = vmul.f32 %v3040_v7, %v3040_v7  ;;  %v3041_v18 = vadd.f32 %v2724_v60, %v2312_v54  ;;  %v2313_v13 = vadd.f32 %v1997_v55, %v5544_v61  ;;  %v2736_v36 = vpop.f32.mrf.mxu1  ;;  %v7596_v54 = vshrl.u32 %v5587_v27, 16 }
 0x1e1   : > { %v2001_v58 = vpop.f32.mrf.mxu0  ;;  %4583 = vmatmul.mubr.msk.bf16.gmra.mxu0 %vm904_vm0, %v1835_v4 }
 0x1e2   : > { %v6196_v35 = vadd.f32 %v3331_v44, %v3330_v1  ;;  %v3042_v52 = vadd.f32 %v2726_v25, %v2313_v13  ;;  %v2314_v46 = vadd.f32 %v2001_v58, %v5547_v15  ;;  %v2740_v37 = vpop.f32.mrf.mxu1  ;;  %4620 = vmatmul.mubr.msk.bf16.gmra.mxu1 %vm904_vm0, %v5956_v14  ;;  %2249 = vmatprep.mubr.bf16.mxu0 %v7473_v29  ;;  %v2559_v4 = vrot.slane %v7596_v54, 1  ;;  %v7599_v54 = vld [vmem:[#allocation3_spill] sm:$0xff] }
 0x1e3   : > { %v2003_v50 = vpop.f32.mrf.mxu0  ;;  %2988 = vmatprep.mubr.bf16.mxu1 %v7473_v29  ;;  %v3360_v61 = vmul.f32 %v3041_v18, %v3041_v18  ;;  %v1837_v58 = vsel %vm1781_vm3, %v1834_v6, %v1836_v31  ;;  %v7597_v18 = vshll.u32 %v5587_v27, 16  ;;  %v4931_v27 = vld [vmem:[%s5104_s27 + $0x60] sm:$0xff]  }
 0x1e4   : > { %v3361_v7 = vmul.f32 %v3042_v52, %v3042_v52  ;;  %v3043_v60 = vadd.f32 %v2730_v51, %v2314_v46  ;;  %v2315_v44 = vadd.f32 %v2003_v50, %v5560_v34  ;;  %v2742_v1 = vpop.f32.mrf.mxu1 }
 0x1e5   : > { %v2005_v25 = vpop.f32.mrf.mxu0  ;;  %v2560_v51 = vrot.slane %v7597_v18, 2 }
 0x1e6   : > { %v6205_v40 = vadd.f32 %v3361_v7, %v3360_v61  ;;  %v3044_v15 = vadd.f32 %v2732_v19, %v2315_v44  ;;  %v2744_v14 = vpop.f32.mrf.mxu1  ;;  %v2316_v17 = vadd.f32 %v2005_v25, %v5569_v43  ;;  %v3390_v55 = vmul.f32 %v3043_v60, %v3043_v60  ;;  %v7598_v25 = vld [vmem:[#allocation2_spill] sm:$0xff] }
 0x1e7   : > { %v2007_v8 = vpop.f32.mrf.mxu0  ;;  %v1838_v61 = vrot.slane %v4931_v27, 1 }
 0x1e8   : > { %v3391_v34 = vmul.f32 %v3044_v15, %v3044_v15  ;;  %v2317_v13 = vadd.f32 %v2007_v8, %v5574_v5  ;;  %v2746_v52 = vpop.f32.mrf.mxu1  ;;  %v3045_v46 = vadd.f32 %v2734_v24, %v2316_v17  ;;  %v2561_v5 = vor.u32 %v2560_v51, %v2559_v4 }
 0x1e9   : > { %v2011_v19 = vpop.f32.mrf.mxu0  ;;  %4584 = vmatmul.mubr.msk.bf16.gmra.mxu0 %vm904_vm0, %v1837_v58  ;;  %v7600_v4 = vshrl.u32 %v5617_v16, 16  ;;  %v7601_v51 = vshll.u32 %v5617_v16, 16  ;;  %v4932_v16 = vld [vmem:[%s5104_s27 + $0x68] sm:$0xff]  }
 0x1ea   : > { %v6215_v6 = vadd.f32 %v3391_v34, %v3390_v55  ;;  %v3046_v43 = vadd.f32 %v2736_v36, %v2317_v13  ;;  %v2318_v62 = vadd.f32 %v2011_v19, %v5577_v26  ;;  %v2750_v50 = vpop.f32.mrf.mxu1  ;;  %4621 = vmatmul.mubr.msk.bf16.gmra.mxu1 %vm904_vm0, %v5981_v38  ;;  %2259 = vmatprep.mubr.bf16.mxu0 %v7473_v29 }
 0x1eb   : > { %v2013_v7 = vpop.f32.mrf.mxu0  ;;  %2998 = vmatprep.mubr.bf16.mxu1 %v7473_v29  ;;  %v3420_v24 = vmul.f32 %v3045_v46, %v3045_v46  ;;  %v1839_v38 = vsel %vm1781_vm3, %v1836_v31, %v1838_v61  ;;  %v2562_v34 = vsel %vm2438_vm2, %v5975_v20, %v2561_v5  ;;  %v2564_v13 = vrot.slane %v7601_v51, 2  ;;  %v7603_v20 = vld [vmem:[#allocation5_spill] sm:$0xff] }
 0x1ec   : > { %v3421_v60 = vmul.f32 %v3046_v43, %v3046_v43  ;;  %v3047_v44 = vadd.f32 %v2740_v37, %v2318_v62  ;;  %v2319_v15 = vadd.f32 %v2013_v7, %v7598_v25  ;;  %v2752_v36 = vpop.f32.mrf.mxu1  ;;  %v2563_v37 = vrot.slane %v7600_v4, 1  ;;  %v7602_v43 = vld [vmem:[#allocation4_spill] sm:$0xff] }
 0x1ed   : > { %v2015_v58 = vpop.f32.mrf.mxu0 }
 0x1ee   : > { %v6224_v26 = vadd.f32 %v3421_v60, %v3420_v24  ;;  %v3048_v17 = vadd.f32 %v2742_v1, %v2319_v15  ;;  %v2754_v8 = vpop.f32.mrf.mxu1  ;;  %v2320_v18 = vadd.f32 %v2015_v58, %v7599_v54  ;;  %v3450_v46 = vmul.f32 %v3047_v44, %v3047_v44 }
 0x1ef   : > { %v2017_v55 = vpop.f32.mrf.mxu0  ;;  %v1840_v44 = vrot.slane %v4932_v16, 1  ;;  %v2565_v58 = vor.u32 %v2564_v13, %v2563_v37  ;;  %v7609_v16 = vld [vmem:[#allocation8_spill] sm:$0xff] }
 0x1f0   : > { %v3451_v19 = vmul.f32 %v3048_v17, %v3048_v17  ;;  %v2321_v1 = vadd.f32 %v2017_v55, %v7602_v43  ;;  %v2756_v62 = vpop.f32.mrf.mxu1  ;;  %v3049_v31 = vadd.f32 %v2744_v14, %v2320_v18 }
 0x1f1   : > { %v2021_v27 = vpop.f32.mrf.mxu0  ;;  %4585 = vmatmul.mubr.msk.bf16.gmra.mxu0 %vm904_vm0, %v1839_v38  ;;  %v7604_v38 = vld [vmem:[#allocation6_spill] sm:$0xff] }
 0x1f2   : > { %v6236_v7 = vadd.f32 %v3451_v19, %v3450_v46  ;;  %v3050_v24 = vadd.f32 %v2746_v52, %v2321_v1  ;;  %v2322_v60 = vadd.f32 %v2021_v27, %v7603_v20  ;;  %v2760_v25 = vpop.f32.mrf.mxu1  ;;  %4622 = vmatmul.mubr.msk.bf16.gmra.mxu1 %vm904_vm0, %v2562_v34  ;;  %2269 = vmatprep.mubr.bf16.mxu0 %v7473_v29  ;;  %v7605_v19 = vld [vmem:[#allocation7_spill] sm:$0xff]  ;;  %v7606_v20 = vld [vmem:[#allocation9_spill] sm:$0xff] }
 0x1f3   : > { %v2023_v15 = vpop.f32.mrf.mxu0  ;;  %3008 = vmatprep.mubr.bf16.mxu1 %v7473_v29  ;;  %v3480_v14 = vmul.f32 %v3049_v31, %v3049_v31  ;;  %v1841_v34 = vsel %vm1781_vm3, %v1838_v61, %v1840_v44  ;;  %v2566_v27 = vsel %vm2438_vm2, %v2561_v5, %v2565_v58  ;;  %v7607_v37 = vshrl.u32 %v7606_v20, 16 }
 0x1f4   : > { %v3481_v17 = vmul.f32 %v3050_v24, %v3050_v24  ;;  %v3051_v54 = vadd.f32 %v2750_v50, %v2322_v60  ;;  %v2323_v18 = vadd.f32 %v2023_v15, %v7604_v38  ;;  %v2762_v55 = vpop.f32.mrf.mxu1  ;;  %v7608_v50 = vshll.u32 %v7606_v20, 16  ;;  %v7610_v38 = vld [vmem:[#allocation10_spill] sm:$0xff] }
 0x1f5   : > { %v2025_v52 = vpop.f32.mrf.mxu0  ;;  %v2567_v13 = vrot.slane %v7607_v37, 1  ;;  %v7611_v37 = vld [vmem:[#allocation11_spill] sm:$0xff] }
 0x1f6   : > { %v6244_v4 = vadd.f32 %v3481_v17, %v3480_v14  ;;  %v3052_v51 = vadd.f32 %v2752_v36, %v2323_v18  ;;  %v2764_v46 = vpop.f32.mrf.mxu1  ;;  %v2324_v43 = vadd.f32 %v2025_v52, %v7605_v19  ;;  %v2568_v31 = vrot.slane %v7608_v50, 2 }
 0x1f7   : > { %v2027_v1 = vpop.f32.mrf.mxu0  ;;  %v3510_v24 = vmul.f32 %v3051_v54, %v3051_v54  ;;  %v4933_v54 = vld [vmem:[%s5104_s27 + $0x70] sm:$0xff]  }
 0x1f8   : > { %v3511_v60 = vmul.f32 %v3052_v51, %v3052_v51  ;;  %v2325_v15 = vadd.f32 %v2027_v1, %v7609_v16  ;;  %v2766_v36 = vpop.f32.mrf.mxu1  ;;  %v3053_v61 = vadd.f32 %v2754_v8, %v2324_v43  ;;  %v1842_v51 = vrot.slane %v4933_v54, 1  ;;  %v6263_v8 = vld [vmem:[%s5152_s30] sm:$0xff]  }
 0x1f9   : > { %v2031_v14 = vpop.f32.mrf.mxu0  ;;  %4586 = vmatmul.mubr.msk.bf16.gmra.mxu0 %vm904_vm0, %v1841_v34  ;;  %v2569_v1 = vor.u32 %v2568_v31, %v2567_v13  ;;  %v2571_v34 = vshrl.u32 %v6263_v8, 16 }
 0x1fa   : > { %v6255_v17 = vadd.f32 %v3511_v60, %v3510_v24  ;;  %v3054_v5 = vadd.f32 %v2756_v62, %v2325_v15  ;;  %v2326_v18 = vadd.f32 %v2031_v14, %v7610_v38  ;;  %v2770_v52 = vpop.f32.mrf.mxu1  ;;  %4623 = vmatmul.mubr.msk.bf16.gmra.mxu1 %vm904_vm0, %v2566_v27  ;;  %2279 = vmatprep.mubr.bf16.mxu0 %v7473_v29  ;;  %v7612_v38 = vld [vmem:[#allocation12_spill] sm:$0xff] }
 0x1fb   : > { %v2033_v19 = vpop.f32.mrf.mxu0  ;;  %3018 = vmatprep.mubr.bf16.mxu1 %v7473_v29  ;;  %v3540_v43 = vmul.f32 %v3053_v61, %v3053_v61  ;;  %v1843_v15 = vsel %vm1781_vm3, %v1840_v44, %v1842_v51  ;;  %v2570_v31 = vsel %vm2438_vm2, %v2565_v58, %v2569_v1  ;;  %v2573_v56 = vrot.slane %v2571_v34, 1  ;;  %v7613_v61 = vld [vmem:[#allocation15_spill] sm:$0xff]  ;;  %v4935_v34 = vld [vmem:[%s5104_s27 + $0x78] sm:$0xff]  }
 0x1fc   : > { %v3541_v20 = vmul.f32 %v3054_v5, %v3054_v5  ;;  %v3055_v62 = vadd.f32 %v2760_v25, %v2326_v18  ;;  %v2327_v50 = vadd.f32 %v2033_v19, %v7611_v37  ;;  %v2772_v24 = vpop.f32.mrf.mxu1  ;;  %v7614_v5 = vshll.u32 %v7613_v61, 16  ;;  %v7615_v37 = vld [vmem:[#allocation13_spill] sm:$0xff] }
 0x1fd   : > { %v2035_v60 = vpop.f32.mrf.mxu0 }
 0x1fe   : > { %v6267_v27 = vadd.f32 %v3541_v20, %v3540_v43  ;;  %v3056_v16 = vadd.f32 %v2762_v55, %v2327_v50  ;;  %v2774_v14 = vpop.f32.mrf.mxu1  ;;  %v2328_v54 = vadd.f32 %v2035_v60, %v7612_v38  ;;  %v2574_v25 = vrot.slane %v7614_v5, 2  ;;  %v7616_v60 = vld [vmem:[#allocation14_spill] sm:$0xff] }
 0x1ff   : > { %v2037_v13 = vpop.f32.mrf.mxu0  ;;  %v3570_v18 = vmul.f32 %v3055_v62, %v3055_v62  ;;  %v1844_v62 = vrot.slane %v4935_v34, 1 }
 0x200   : > { %v3571_v19 = vmul.f32 %v3056_v16, %v3056_v16  ;;  %v2329_v32 = vadd.f32 %v2037_v13, %v7615_v37  ;;  %v2776_v43 = vpop.f32.mrf.mxu1  ;;  %v3057_v20 = vadd.f32 %v2764_v46, %v2328_v54  ;;  %v2575_v13 = vor.u32 %v2574_v25, %v2573_v56  ;;  %v7619_v25 = vld [vmem:[#allocation18_spill] sm:$0xff] }
 0x201   : > { %v2041_v55 = vpop.f32.mrf.mxu0  ;;  %4587 = vmatmul.mubr.msk.bf16.gmra.mxu0 %vm904_vm0, %v1843_v15  ;;  %v7617_v15 = vld [vmem:[#allocation16_spill] sm:$0xff] }
 0x202   : > { %v6276_v44 = vadd.f32 %v3571_v19, %v3570_v18  ;;  %v3058_v50 = vadd.f32 %v2766_v36, %v2329_v32  ;;  %v2330_v38 = vadd.f32 %v2041_v55, %v7616_v60  ;;  %v2780_v58 = vpop.f32.mrf.mxu1  ;;  %4624 = vmatmul.mubr.msk.bf16.gmra.mxu1 %vm904_vm0, %v2570_v31  ;;  %2289 = vmatprep.mubr.bf16.mxu0 %v7473_v29  ;;  %v7618_v55 = vld [vmem:[#allocation17_spill] sm:$0xff] }
 0x203   : > { %v2043_v16 = vpop.f32.mrf.mxu0  ;;  %3028 = vmatprep.mubr.bf16.mxu1 %v7473_v29  ;;  %v3600_v46 = vmul.f32 %v3057_v20, %v3057_v20  ;;  %v1845_v31 = vsel %vm1781_vm3, %v1842_v51, %v1844_v62  ;;  %v2576_v22 = vsel %vm2438_vm2, %v2569_v1, %v2575_v13  ;;  %v1846_v1 = vrot.slane %v6263_v8, 1 }
 0x204   : > { %v3601_v54 = vmul.f32 %v3058_v50, %v3058_v50  ;;  %v3059_v61 = vadd.f32 %v2770_v52, %v2330_v38  ;;  %v2331_v5 = vadd.f32 %v2043_v16, %v7617_v15  ;;  %v2782_v18 = vpop.f32.mrf.mxu1 }
 0x205   : > { %v2045_v32 = vpop.f32.mrf.mxu0 }
 0x206   : > { %v6284_v36 = vadd.f32 %v3601_v54, %v3600_v46  ;;  %v3060_v19 = vadd.f32 %v2772_v24, %v2331_v5  ;;  %v2784_v37 = vpop.f32.mrf.mxu1  ;;  %v2332_v60 = vadd.f32 %v2045_v32, %v7618_v55  ;;  %v3630_v10 = vmul.f32 %v3059_v61, %v3059_v61  ;;  %v7620_v46 = vld [vmem:[#allocation19_spill] sm:$0xff]  ;;  %v7621_v32 = vld [vmem:[#allocation20_spill] sm:$0xff] }
 0x207   : > { %v2047_v34 = vpop.f32.mrf.mxu0  ;;  %v1847_v55 = vsel %vm1781_vm3, %v1844_v62, %v1846_v1 }
 0x208   : > { %v3631_v56 = vmul.f32 %v3060_v19, %v3060_v19  ;;  %v2333_v20 = vadd.f32 %v2047_v34, %v7619_v25  ;;  %v2786_v52 = vpop.f32.mrf.mxu1  ;;  %v3061_v50 = vadd.f32 %v2774_v14, %v2332_v60 }
 0x209   : > { %v2051_v38 = vpop.f32.mrf.mxu0  ;;  %4588 = vmatmul.mubr.msk.bf16.gmra.mxu0 %vm904_vm0, %v1845_v31 }
 0x20a   : > { %v6291_v16 = vadd.f32 %v3631_v56, %v3630_v10  ;;  %v3062_v24 = vadd.f32 %v2776_v43, %v2333_v20  ;;  %v2334_v51 = vadd.f32 %v2051_v38, %v7620_v46  ;;  %v2790_v54 = vpop.f32.mrf.mxu1  ;;  %4625 = vmatmul.mubr.msk.bf16.gmra.mxu1 %vm904_vm0, %v2576_v22  ;;  %2299 = vmatprep.mubr.bf16.mxu0 %v7473_v29 }
 0x20b   : > { %v2053_v13 = vpop.f32.mrf.mxu0  ;;  %v3660_v61 = vmul.f32 %v3061_v50, %v3061_v50 }
 0x20c   : > { %v3661_v15 = vmul.f32 %v3062_v24, %v3062_v24  ;;  %v3063_v5 = vadd.f32 %v2780_v58, %v2334_v51  ;;  %v2792_v14 = vpop.f32.mrf.mxu1  ;;  %v2335_v19 = vadd.f32 %v2053_v13, %v7621_v32 }
 0x20d   : > { %v2055_v31 = vpop.f32.mrf.mxu0 }
 0x20e   : > { %v6298_v10 = vadd.f32 %v3661_v15, %v3660_v61  ;;  %v2336_v43 = vadd.f32 %v2055_v31, %v5717_v0  ;;  %v2794_v60 = vpop.f32.mrf.mxu1  ;;  %v3064_v22 = vadd.f32 %v2782_v18, %v2335_v19  ;;  %v3690_v25 = vmul.f32 %v3063_v5, %v3063_v5  ;;  %v7622_v31 = vld [vmem:[#allocation21_spill] sm:$0xff] }
 0x20f   : > { %v2057_v34 = vpop.f32.mrf.mxu0 }
 0x210   : > { %v3065_v29 = vadd.f32 %v2784_v37, %v2336_v43  ;;  %v2337_v8 = vadd.f32 %v2057_v34, %v5720_v12  ;;  %v2796_v56 = vpop.f32.mrf.mxu1  ;;  %v3691_v20 = vmul.f32 %v3064_v22, %v3064_v22 }
 0x211   : > { %v2061_v58 = vpop.f32.mrf.mxu0  ;;  %4589 = vmatmul.mubr.msk.bf16.gmra.mxu0 %vm904_vm0, %v1847_v55 }
 0x212   : > { %v3066_v50 = vadd.f32 %v2786_v52, %v2337_v8  ;;  %v2338_v38 = vadd.f32 %v2061_v58, %v5726_v33  ;;  %v2800_v24 = vpop.f32.mrf.mxu1  ;;  %v6305_v46 = vadd.f32 %v3691_v20, %v3690_v25  ;;  %v3720_v62 = vmul.f32 %v3065_v29, %v3065_v29  ;;  %v7623_v29 = vld [vmem:[#allocation22_spill] sm:$0xff]  ;;  %v7624_v58 = vld [vmem:[#allocation23_spill] sm:$0xff] }
 0x213   : > { %v2063_v0 = vpop.f32.mrf.mxu0 }
 0x214   : > { %v3721_v51 = vmul.f32 %v3066_v50, %v3066_v50  ;;  %v3067_v18 = vadd.f32 %v2790_v54, %v2338_v38  ;;  %v2339_v37 = vadd.f32 %v2063_v0, %v5733_v21  ;;  %v2802_v1 = vpop.f32.mrf.mxu1 }
 0x215   : > { %v2065_v12 = vpop.f32.mrf.mxu0 }
 0x216   : > { %v6308_v13 = vadd.f32 %v3721_v51, %v3720_v62  ;;  %v3068_v61 = vadd.f32 %v2792_v14, %v2339_v37  ;;  %v2340_v15 = vadd.f32 %v2065_v12, %v5742_v48  ;;  %v2804_v5 = vpop.f32.mrf.mxu1  ;;  %v3750_v32 = vmul.f32 %v3067_v18, %v3067_v18 }
 0x217   : > { %v2067_v52 = vpop.f32.mrf.mxu0 }
 0x218   : > { %v3751_v33 = vmul.f32 %v3068_v61, %v3068_v61  ;;  %v3069_v19 = vadd.f32 %v2794_v60, %v2340_v15  ;;  %v2341_v43 = vadd.f32 %v2067_v52, %v7622_v31  ;;  %v2806_v55 = vpop.f32.mrf.mxu1  ;;  %v7625_v52 = vld [vmem:[#allocation24_spill] sm:$0xff]  ;;  %v7626_v31 = vld [vmem:[#allocation25_spill] sm:$0xff] }
 0x219   : > { %v2071_v22 = vpop.f32.mrf.mxu0 }
 0x21a   : > { %v6312_v34 = vadd.f32 %v3751_v33, %v3750_v32  ;;  %v3070_v54 = vadd.f32 %v2796_v56, %v2341_v43  ;;  %v2810_v21 = vpop.f32.mrf.mxu1  ;;  %v2342_v8 = vadd.f32 %v2071_v22, %v7623_v29  ;;  %v3780_v20 = vmul.f32 %v3069_v19, %v3069_v19 }
 0x21b   : > { %v2073_v25 = vpop.f32.mrf.mxu0 }
 0x21c   : > { %v3781_v14 = vmul.f32 %v3070_v54, %v3070_v54  ;;  %v2343_v48 = vadd.f32 %v2073_v25, %v7624_v58  ;;  %v2812_v50 = vpop.f32.mrf.mxu1  ;;  %v3071_v38 = vadd.f32 %v2800_v24, %v2342_v8 }
 0x21d   : > { %v2075_v0 = vpop.f32.mrf.mxu0 }
 0x21e   : > { %v6316_v62 = vadd.f32 %v3781_v14, %v3780_v20  ;;  %v3072_v60 = vadd.f32 %v2802_v1, %v2343_v48  ;;  %v2344_v51 = vadd.f32 %v2075_v0, %v5764_v49  ;;  %v2814_v18 = vpop.f32.mrf.mxu1  ;;  %v3810_v12 = vmul.f32 %v3071_v38, %v3071_v38  ;;  %v7627_v1 = vld [vmem:[#allocation26_spill] sm:$0xff] }
 0x21f   : > { %v2077_v37 = vpop.f32.mrf.mxu0 }
 0x220   : > { %v3811_v56 = vmul.f32 %v3072_v60, %v3072_v60  ;;  %v3073_v61 = vadd.f32 %v2804_v5, %v2344_v51  ;;  %v2816_v15 = vpop.f32.mrf.mxu1  ;;  %v2345_v32 = vadd.f32 %v2077_v37, %v7625_v52 }
 0x221   : > { %v2081_v33 = vpop.f32.mrf.mxu0 }
 0x222   : > { %v6320_v19 = vadd.f32 %v3811_v56, %v3810_v12  ;;  %v2346_v43 = vadd.f32 %v2081_v33, %v7626_v31  ;;  %v2820_v24 = vpop.f32.mrf.mxu1  ;;  %v3074_v22 = vadd.f32 %v2806_v55, %v2345_v32  ;;  %v3840_v25 = vmul.f32 %v3073_v61, %v3073_v61  ;;  %v7628_v12 = vld [vmem:[#allocation27_spill] sm:$0xff]  ;;  %v7629_v61 = vld [vmem:[#allocation28_spill] sm:$0xff] }
 0x223   : > { %v2083_v54 = vpop.f32.mrf.mxu0 }
 0x224   : > { %v3075_v29 = vadd.f32 %v2810_v21, %v2346_v43  ;;  %v2347_v8 = vadd.f32 %v2083_v54, %v7627_v1  ;;  %v2822_v49 = vpop.f32.mrf.mxu1  ;;  %v3841_v20 = vmul.f32 %v3074_v22, %v3074_v22  ;;  %v7630_v54 = vld [vmem:[#allocation29_spill] sm:$0xff] }
 0x225   : > { %v2085_v14 = vpop.f32.mrf.mxu0 }
 0x226   : > { %v3076_v58 = vadd.f32 %v2812_v50, %v2347_v8  ;;  %v2348_v5 = vadd.f32 %v2085_v14, %v5786_v42  ;;  %v2824_v48 = vpop.f32.mrf.mxu1  ;;  %v6325_v38 = vadd.f32 %v3841_v20, %v3840_v25  ;;  %v3870_v60 = vmul.f32 %v3075_v29, %v3075_v29 }
 0x227   : > { %v2087_v0 = vpop.f32.mrf.mxu0 }
 0x228   : > { %v3871_v51 = vmul.f32 %v3076_v58, %v3076_v58  ;;  %v3077_v37 = vadd.f32 %v2814_v18, %v2348_v5  ;;  %v2349_v55 = vadd.f32 %v2087_v0, %v7628_v12  ;;  %v2826_v56 = vpop.f32.mrf.mxu1  ;;  %v7631_v0 = vld [vmem:[#allocation30_spill] sm:$0xff]  ;;  %v3168_v12 = vlaneseq }
 0x229   : > { %v2091_v21 = vpop.f32.mrf.mxu0 }
 0x22a   : > { %v6328_v52 = vadd.f32 %v3871_v51, %v3870_v60  ;;  %v3078_v32 = vadd.f32 %v2816_v15, %v2349_v55  ;;  %v2350_v33 = vadd.f32 %v2091_v21, %v7629_v61  ;;  %v2830_v31 = vpop.f32.mrf.mxu1  ;;  %v3900_v43 = vmul.f32 %v3077_v37, %v3077_v37 }
 0x22b   : > { %v2093_v50 = vpop.f32.mrf.mxu0 }
 0x22c   : > { %v3901_v42 = vmul.f32 %v3078_v32, %v3078_v32  ;;  %v3079_v22 = vadd.f32 %v2820_v24, %v2350_v33  ;;  %v2351_v1 = vadd.f32 %v2093_v50, %v7630_v54  ;;  %v2832_v8 = vpop.f32.mrf.mxu1  ;;  %v7632_v32 = vld [vmem:[#allocation31_spill] sm:$0xff]  ;;  %v3169_v54 = vshrl.u32 %v3168_v12, 7  ;;  %v7635_v12 = vld [vmem:[#allocation34_spill] sm:$0xff] }
 0x22d   : > { %v2095_v29 = vpop.f32.mrf.mxu0 }
 0x22e   : > { %v6332_v25 = vadd.f32 %v3901_v42, %v3900_v43  ;;  %v3080_v18 = vadd.f32 %v2822_v49, %v2351_v1  ;;  %v2834_v20 = vpop.f32.mrf.mxu1  ;;  %v2352_v14 = vadd.f32 %v2095_v29, %v5808_v11  ;;  %v3930_v5 = vmul.f32 %v3079_v22, %v3079_v22  ;;  %v7633_v22 = vld [vmem:[#allocation32_spill] sm:$0xff] }
 0x22f   : > { %v2097_v58 = vpop.f32.mrf.mxu0 }
 0x230   : > { %v3931_v15 = vmul.f32 %v3080_v18, %v3080_v18  ;;  %v2353_v60 = vadd.f32 %v2097_v58, %v7631_v0  ;;  %v2836_v51 = vpop.f32.mrf.mxu1  ;;  %v3081_v37 = vadd.f32 %v2824_v48, %v2352_v14 }
 0x231   : > { %v2101_v55 = vpop.f32.mrf.mxu0 }
 0x232   : > { %v6336_v24 = vadd.f32 %v3931_v15, %v3930_v5  ;;  %v3082_v21 = vadd.f32 %v2826_v56, %v2353_v60  ;;  %v2354_v61 = vadd.f32 %v2101_v55, %v7632_v32  ;;  %v2840_v33 = vpop.f32.mrf.mxu1  ;;  %v3960_v49 = vmul.f32 %v3081_v37, %v3081_v37  ;;  %v7634_v15 = vld [vmem:[#allocation33_spill] sm:$0xff] }
 0x233   : > { %v2103_v50 = vpop.f32.mrf.mxu0  ;;  %v3177_v55 = vadd.s32 64, %v3169_v54  ;;  %v6352_v54 = vmax.f32 %v6205_v40, 1e-14  ;;  %v6363_v40 = vmax.f32 %v6224_v26, 1e-14 }
 0x234   : > { %v3961_v43 = vmul.f32 %v3082_v21, %v3082_v21  ;;  %v3083_v42 = vadd.f32 %v2830_v31, %v2354_v61  ;;  %v2842_v11 = vpop.f32.mrf.mxu1  ;;  %v2355_v1 = vadd.f32 %v2103_v50, %v7633_v22 }
 0x235   : > { %v2105_v29 = vpop.f32.mrf.mxu0  ;;  %vm3242_vm4 = vcmp.lt.s32.totalorder %v3177_v55, 65 }
 0x236   : > { %v6340_v18 = vadd.f32 %v3961_v43, %v3960_v49  ;;  %v2356_v48 = vadd.f32 %v2105_v29, %v5830_v53  ;;  %v2844_v14 = vpop.f32.mrf.mxu1  ;;  %v3084_v58 = vadd.f32 %v2832_v8, %v2355_v1  ;;  %v3990_v37 = vmul.f32 %v3083_v42, %v3083_v42  ;;  %v7636_v8 = vld [vmem:[#allocation35_spill] sm:$0xff] }
 0x237   : > { %v2107_v5 = vpop.f32.mrf.mxu0 }
 0x238   : > { %v3085_v56 = vadd.f32 %v2834_v20, %v2356_v48  ;;  %v2357_v0 = vadd.f32 %v2107_v5, %v7634_v15  ;;  %v2846_v60 = vpop.f32.mrf.mxu1  ;;  %v3991_v21 = vmul.f32 %v3084_v58, %v3084_v58  ;;  %v6349_v48 = vmax.f32 %v6196_v35, 1e-14  ;;  %v7637_v35 = vld [vmem:[#allocation36_spill] sm:$0xff] }
 0x239   : > { %v2111_v31 = vpop.f32.mrf.mxu0 }
 0x23a   : > { %v3086_v32 = vadd.f32 %v2836_v51, %v2357_v0  ;;  %v2358_v61 = vadd.f32 %v2111_v31, %v7635_v12  ;;  %v2850_v50 = vpop.f32.mrf.mxu1  ;;  %v6345_v22 = vadd.f32 %v3991_v21, %v3990_v37  ;;  %v4020_v43 = vmul.f32 %v3085_v56, %v3085_v56 }
 0x23b   : > { %v2113_v49 = vpop.f32.mrf.mxu0  ;;  %v6358_v56 = vmax.f32 %v6215_v6, 1e-14  ;;  %4710 = vrcp.f32 %v6349_v48  ;;  %v4961_v12 = vmov 0.0  }
 0x23c   : > { %v4021_v53 = vmul.f32 %v3086_v32, %v3086_v32  ;;  %v3087_v29 = vadd.f32 %v2840_v33, %v2358_v61  ;;  %v2359_v1 = vadd.f32 %v2113_v49, %v7636_v8  ;;  %v2852_v20 = vpop.f32.mrf.mxu1  ;;  %4712 = vrcp.f32 %v6352_v54 }
 0x23d   : > { %v2115_v42 = vpop.f32.mrf.mxu0  ;;  %4714 = vrcp.f32 %v6358_v56 }
 0x23e   : > { %v6354_v51 = vadd.f32 %v4021_v53, %v4020_v43  ;;  %v3088_v58 = vadd.f32 %v2842_v11, %v2359_v1  ;;  %v2360_v5 = vadd.f32 %v2115_v42, %v5852_v9  ;;  %v2854_v15 = vpop.f32.mrf.mxu1  ;;  %v4050_v0 = vmul.f32 %v3087_v29, %v3087_v29  ;;  %v7638_v43 = vld [vmem:[#allocation37_spill] sm:$0xff]  ;;  %v7639_v1 = vld [vmem:[#allocation38_spill] sm:$0xff] }
 0x23f   : > { %v2117_v33 = vpop.f32.mrf.mxu0  ;;  %v6366_v11 = vsel %vm3242_vm4, 1.0, %v4961_v12  ;;  %4716 = vrcp.f32 %v6363_v40 }
 0x240   : > { %v4051_v37 = vmul.f32 %v3088_v58, %v3088_v58  ;;  %v3089_v21 = vadd.f32 %v2844_v14, %v2360_v5  ;;  %v2361_v31 = vadd.f32 %v2117_v33, %v7637_v35  ;;  %v2856_v32 = vpop.f32.mrf.mxu1  ;;  %v6373_v14 = vmax.f32 %v6236_v7, 1e-14 }
 0x241   : > { %v2121_v9 = vpop.f32.mrf.mxu0  ;;  %v3573_v55 = vmul.f32 %v6366_v11, %v6276_v44  ;;  %v6384_v5 = vmax.f32 %v6255_v17, 1e-14 }
 0x242   : > { %v6369_v6 = vadd.f32 %v4051_v37, %v4050_v0  ;;  %v3090_v61 = vadd.f32 %v2846_v60, %v2361_v31  ;;  %v2860_v49 = vpop.f32.mrf.mxu1  ;;  %v2362_v53 = vadd.f32 %v2121_v9, %v7638_v43  ;;  %v4080_v29 = vmul.f32 %v3089_v21, %v3089_v21 }
 0x243   : > { %v2123_v26 = vpop.f32.mrf.mxu0  ;;  %v6381_v60 = vmax.f32 %v6244_v4, 1e-14  ;;  %v3603_v0 = vmul.f32 0.0, %v6284_v36  ;;  %4718 = vrcp.f32 %v6373_v14  ;;  %v6392_v31 = vmax.f32 %v6267_v27, 1e-14 }
 0x244   : > { %v4081_v8 = vmul.f32 %v3090_v61, %v3090_v61  ;;  %v2363_v42 = vadd.f32 %v2123_v26, %v7639_v1  ;;  %v2862_v58 = vpop.f32.mrf.mxu1  ;;  %v3091_v7 = vadd.f32 %v2850_v50, %v2362_v53  ;;  %v3633_v4 = vmul.f32 0.0, %v6291_v16  ;;  %v7641_v16 = vld [vmem:[#allocation40_spill] sm:$0xff] }
 0x245   : > { %v2125_v33 = vpop.f32.mrf.mxu0  ;;  %v6395_v17 = vmax.f32 %v3573_v55, 1e-14  ;;  %4720 = vrcp.f32 %v6381_v60  ;;  %v6401_v27 = vmax.f32 %v3603_v0, 1e-14 }
 0x246   : > { %v6387_v37 = vadd.f32 %v4081_v8, %v4080_v29  ;;  %v3092_v44 = vadd.f32 %v2852_v20, %v2363_v42  ;;  %v2364_v21 = vadd.f32 %v2125_v33, %v5874_v41  ;;  %v2864_v35 = vpop.f32.mrf.mxu1  ;;  %v4110_v50 = vmul.f32 %v3091_v7, %v3091_v7  ;;  %v7640_v41 = vld [vmem:[#allocation39_spill] sm:$0xff]  ;;  %v7642_v7 = vld [vmem:[#allocation41_spill] sm:$0xff] }
 0x247   : > { %v2127_v12 = vpop.f32.mrf.mxu0  ;;  %v3663_v20 = vmul.f32 0.0, %v6298_v10  ;;  %4722 = vrcp.f32 %v6384_v5  ;;  %v3693_v8 = vmul.f32 0.0, %v6305_v46  ;;  %v3753_v46 = vmul.f32 0.0, %v6312_v34 }
 0x248   : > { %v4111_v9 = vmul.f32 %v3092_v44, %v3092_v44  ;;  %v3093_v61 = vadd.f32 %v2854_v15, %v2364_v21  ;;  %v2866_v36 = vpop.f32.mrf.mxu1  ;;  %v2365_v43 = vadd.f32 %v2127_v12, %v7640_v41  ;;  %4724 = vrcp.f32 %v6392_v31  ;;  %v6415_v41 = vpop.eup %4710 }
 0x249   : > { %v2131_v53 = vpop.f32.mrf.mxu0  ;;  %v6407_v15 = vmax.f32 %v3633_v4, 1e-14  ;;  %4726 = vrcp.f32 %v6395_v17  ;;  %v6412_v44 = vmax.f32 %v3663_v20, 1e-14  ;;  %v3723_v21 = vmul.f32 0.0, %v6308_v13 }
 0x24a   : > { %v6403_v26 = vadd.f32 %v4111_v9, %v4110_v50  ;;  %v2366_v55 = vadd.f32 %v2131_v53, %v7641_v16  ;;  %v2870_v29 = vpop.f32.mrf.mxu1  ;;  %v3094_v1 = vadd.f32 %v2856_v32, %v2365_v43  ;;  %v4140_v12 = vmul.f32 %v3093_v61, %v3093_v61  ;;  %v6420_v43 = vpop.eup %4712 }
 0x24b   : > { %v2133_v10 = vpop.f32.mrf.mxu0  ;;  %7643 = vst [vmem:[#allocation2_spill] sm:$0xff] %v6412_v44  ;;  %4728 = vrcp.f32 %v6401_v27  ;;  %v6423_v20 = vmax.f32 %v3693_v8, 1e-14  ;;  %v3783_v13 = vmul.f32 0.0, %v6316_v62  ;;  %v6428_v16 = vpop.eup %4714  ;;  %v3813_v8 = vmul.f32 0.0, %v6320_v19 }
 0x24c   : > { %v3095_v42 = vadd.f32 %v2860_v49, %v2366_v55  ;;  %v2367_v33 = vadd.f32 %v2133_v10, %v7642_v7  ;;  %v2872_v0 = vpop.f32.mrf.mxu1  ;;  %v4141_v50 = vmul.f32 %v3094_v1, %v3094_v1  ;;  %4730 = vrcp.f32 %v6407_v15 }
 0x24d   : > { %v2135_v9 = vpop.f32.mrf.mxu0  ;;  %4732 = vrcp.f32 %v6412_v44  ;;  %v6432_v7 = vmax.f32 %v3723_v21, 1e-14  ;;  %v6437_v62 = vmax.f32 %v3753_v46, 1e-14  ;;  %v3843_v21 = vmul.f32 0.0, %v6325_v38  ;;  %v7649_v46 = vld [vmem:[#allocation44_spill] sm:$0xff] }
 0x24e   : > { %v3096_v32 = vadd.f32 %v2862_v58, %v2367_v33  ;;  %v2368_v4 = vadd.f32 %v2135_v9, %v5896_v3  ;;  %v2874_v49 = vpop.f32.mrf.mxu1  ;;  %v6426_v61 = vadd.f32 %v4141_v50, %v4140_v12  ;;  %v4170_v55 = vmul.f32 %v3095_v42, %v3095_v42  ;;  %v7644_v58 = vld [vmem:[#allocation42_spill] sm:$0xff]  ;;  %v6435_v9 = vpop.eup %4716  ;;  %v7647_v42 = vld [vmem:[#allocation43_spill] sm:$0xff] }
 0x24f   : > { %v2137_v53 = vpop.f32.mrf.mxu0  ;;  %7645 = vst [vmem:[#allocation3_spill] sm:$0xff] %v6432_v7  ;;  %7646 = vst [vmem:[#allocation4_spill] sm:$0xff] %v6437_v62  ;;  %4734 = vrcp.f32 %v6423_v20  ;;  %v3903_v38 = vmul.f32 0.0, %v6332_v25 }
 0x250   : > { %v4171_v1 = vmul.f32 %v3096_v32, %v3096_v32  ;;  %v3097_v34 = vadd.f32 %v2864_v35, %v2368_v4  ;;  %v2369_v10 = vadd.f32 %v2137_v53, %v7644_v58  ;;  %v2876_v3 = vpop.f32.mrf.mxu1  ;;  %v6443_v4 = vmax.f32 %v3783_v13, 1e-14  ;;  %v6446_v58 = vpop.eup %4718 }
 0x251   : > { %v2141_v33 = vpop.f32.mrf.mxu0  ;;  %4736 = vrcp.f32 %v6432_v7 }
 0x252   : > { %v6439_v12 = vadd.f32 %v4171_v1, %v4170_v55  ;;  %v3098_v50 = vadd.f32 %v2866_v36, %v2369_v10  ;;  %v2370_v32 = vadd.f32 %v2141_v33, %v7647_v42  ;;  %v2880_v35 = vpop.f32.mrf.mxu1  ;;  %7648 = vst [vmem:[#allocation5_spill] sm:$0xff] %v6443_v4  ;;  %v4200_v19 = vmul.f32 %v3097_v34, %v3097_v34  ;;  %v6453_v13 = vpop.eup %4720 }
 0x253   : > { %v2143_v53 = vpop.f32.mrf.mxu0  ;;  %v6450_v36 = vmax.f32 %v3813_v8, 1e-14  ;;  %v3873_v1 = vmul.f32 0.0, %v6328_v52  ;;  %4738 = vrcp.f32 %v6437_v62  ;;  %v6461_v42 = vmax.f32 %v3843_v21, 1e-14 }
 0x254   : > { %v4201_v44 = vmul.f32 %v3098_v50, %v3098_v50  ;;  %v3099_v57 = vadd.f32 %v2870_v29, %v2370_v32  ;;  %v2371_v28 = vadd.f32 %v2143_v53, %v7649_v46  ;;  %v2882_v55 = vpop.f32.mrf.mxu1  ;;  %v6459_v50 = vpop.eup %4722  ;;  %v3933_v8 = vmul.f32 0.0, %v6336_v24 }
 0x255   : > { %7650 = vst [vmem:[#allocation6_spill] sm:$0xff] %v6450_v36  ;;  %v2145_v10 = vpop.f32.mrf.mxu0  ;;  %7651 = vst [vmem:[#allocation7_spill] sm:$0xff] %v6461_v42  ;;  %v3963_v32 = vmul.f32 0.0, %v6340_v18  ;;  %v6466_v46 = vpop.eup %4724  ;;  %4740 = vrcp.f32 %v6443_v4  ;;  %v6473_v21 = vmax.f32 %v3873_v1, 1e-14  ;;  %v3993_v24 = vmul.f32 0.0, %v6345_v22 }
 0x256   : > { %v6457_v33 = vadd.f32 %v4201_v44, %v4200_v19  ;;  %v3100_v34 = vadd.f32 %v2872_v0, %v2371_v28  ;;  %v2884_v29 = vpop.f32.mrf.mxu1  ;;  %v2372_v52 = vadd.f32 %v2145_v10, %v5918_v39  ;;  %v4230_v25 = vmul.f32 %v3099_v57, %v3099_v57  ;;  %v6470_v19 = vpop.eup %4726  ;;  %v7654_v57 = vld [vmem:[#allocation45_spill] sm:$0xff] }
 0x257   : > { %v2147_v53 = vpop.f32.mrf.mxu0  ;;  %4742 = vrcp.f32 %v6450_v36  ;;  %7652 = vst [vmem:[#allocation9_spill] sm:$0xff] %v6473_v21  ;;  %v6476_v10 = vmax.f32 %v3903_v38, 1e-14  ;;  %v6486_v1 = vmax.f32 %v3963_v32, 1e-14  ;;  %v4023_v22 = vmul.f32 0.0, %v6354_v51 }
 0x258   : > { %v4231_v44 = vmul.f32 %v3100_v34, %v3100_v34  ;;  %v2373_v28 = vadd.f32 %v2147_v53, %v5921_v30  ;;  %v2886_v0 = vpop.f32.mrf.mxu1  ;;  %v3101_v18 = vadd.f32 %v2874_v49, %v2372_v52  ;;  %v6481_v30 = vpop.eup %4728  ;;  %4744 = vrcp.f32 %v6461_v42 }
 0x259   : > { %v2151_v39 = vpop.f32.mrf.mxu0  ;;  %7653 = vst [vmem:[#allocation8_spill] sm:$0xff] %v6476_v10  ;;  %v6484_v53 = vmax.f32 %v3933_v8, 1e-14  ;;  %7656 = vst [vmem:[#allocation11_spill] sm:$0xff] %v6486_v1  ;;  %v6489_v52 = vpop.eup %4730  ;;  %v4053_v38 = vmul.f32 0.0, %v6369_v6  ;;  %4746 = vrcp.f32 %v6473_v21  ;;  %v4083_v8 = vmul.f32 0.0, %v6387_v37 }
 0x25a   : > { %v6478_v62 = vadd.f32 %v4231_v44, %v4230_v25  ;;  %v3102_v4 = vadd.f32 %v2876_v3, %v2373_v28  ;;  %v2374_v34 = vadd.f32 %v2151_v39, %v7654_v57  ;;  %v2890_v7 = vpop.f32.mrf.mxu1  ;;  %v4260_v25 = vmul.f32 %v3101_v18, %v3101_v18  ;;  %v7658_v57 = vld [vmem:[#allocation46_spill] sm:$0xff]  ;;  %v6497_v36 = vpop.eup %4732  ;;  %v7667_v21 = vld [vmem:[#allocation49_spill] sm:$0xff] }
 0x25b   : > { %7655 = vst [vmem:[#allocation10_spill] sm:$0xff] %v6484_v53  ;;  %v2153_v49 = vpop.f32.mrf.mxu0  ;;  %v6493_v39 = vmax.f32 %v3993_v24, 1e-14  ;;  %4748 = vrcp.f32 %v6476_v10  ;;  %v4113_v51 = vmul.f32 0.0, %v6403_v26  ;;  %v6507_v24 = vmax.f32 %v4023_v22, 1e-14 }
 0x25c   : > { %v4261_v3 = vmul.f32 %v3102_v4, %v3102_v4  ;;  %v3103_v44 = vadd.f32 %v2880_v35, %v2374_v34  ;;  %v2892_v28 = vpop.f32.mrf.mxu1  ;;  %v2375_v32 = vadd.f32 %v2153_v49, %v7658_v57  ;;  %v7660_v4 = vld [vmem:[#allocation47_spill] sm:$0xff]  ;;  %4750 = vrcp.f32 %v6484_v53  ;;  %v6509_v49 = vpop.eup %4734  ;;  %v7663_v26 = vld [vmem:[#allocation48_spill] sm:$0xff] }
 0x25d   : > { %7657 = vst [vmem:[#allocation12_spill] sm:$0xff] %v6493_v39  ;;  %v2155_v42 = vpop.f32.mrf.mxu0  ;;  %7661 = vst [vmem:[#allocation13_spill] sm:$0xff] %v6507_v24  ;;  %4752 = vrcp.f32 %v6486_v1  ;;  %v6512_v57 = vmax.f32 %v4053_v38, 1e-14  ;;  %v4143_v1 = vmul.f32 0.0, %v6426_v61 }
 0x25e   : > { %v6501_v6 = vadd.f32 %v4261_v3, %v4260_v25  ;;  %v2376_v35 = vadd.f32 %v2155_v42, %v7660_v4  ;;  %v6504_v18 = vpop.f32.mrf.mxu1  ;;  %v3104_v37 = vadd.f32 %v2882_v55, %v2375_v32  ;;  %4754 = vrcp.f32 %v6493_v39  ;;  %v6520_v55 = vpop.eup %4736 }
 0x25f   : > { %v2157_v34 = vpop.f32.mrf.mxu0  ;;  %7662 = vst [vmem:[#allocation14_spill] sm:$0xff] %v6512_v57  ;;  %v6518_v42 = vmax.f32 %v4083_v8, 1e-14  ;;  %v3334_v4 = vmul.f32 %v3103_v44, %v3103_v44  ;;  %7665 = vst [vmem:[#allocation17_spill] sm:$0xff] %v6520_v55  ;;  %v6522_v32 = vmax.f32 %v4113_v51, 1e-14  ;;  %4756 = vrcp.f32 %v6507_v24 }
 0x260   : > { %7659 = vst [vmem:[#allocation15_spill] sm:$0xff] %v6501_v6  ;;  %v3105_v10 = vadd.f32 %v2884_v29, %v2376_v35  ;;  %v2377_v25 = vadd.f32 %v2157_v34, %v7663_v26  ;;  %v6515_v3 = vpop.f32.mrf.mxu1  ;;  %v3335_v22 = vmul.f32 %v3104_v37, %v3104_v37  ;;  %v6526_v34 = vpop.eup %4738  ;;  %4758 = vrcp.f32 %v6512_v57 }
 0x261   : > { %7664 = vst [vmem:[#allocation16_spill] sm:$0xff] %v6518_v42  ;;  %v2161_v53 = vpop.f32.mrf.mxu0  ;;  %7666 = vst [vmem:[#allocation18_spill] sm:$0xff] %v6522_v32  ;;  %4760 = vrcp.f32 %v6518_v42 }
 0x262   : > { %v3106_v38 = vadd.f32 %v2886_v0, %v2377_v25  ;;  %v2378_v29 = vadd.f32 %v2161_v53, %v7667_v21  ;;  %v2900_v35 = vpop.f32.mrf.mxu1  ;;  %7668 = vst [vmem:[#allocation19_spill] sm:$0xff] %v6526_v34  ;;  %v3336_v26 = vadd.f32 %v3335_v22, %v3334_v4  ;;  %v3364_v44 = vmul.f32 %v3105_v10, %v3105_v10  ;;  %v6533_v6 = vpop.eup %4740 }
 0x263   : > { %v2163_v8 = vpop.f32.mrf.mxu0  ;;  %7669 = vst [vmem:[#allocation20_spill] sm:$0xff] %v6533_v6  ;;  %4762 = vrcp.f32 %v6522_v32  ;;  %v6539_v25 = vmax.f32 %v4143_v1, 1e-14 }
 0x264   : > { %v3365_v37 = vmul.f32 %v3106_v38, %v3106_v38  ;;  %v2379_v39 = vadd.f32 %v2163_v8, %v5953_v47  ;;  %v6531_v51 = vpop.f32.mrf.mxu1  ;;  %v3339_v61 = vmax.f32 %v3336_v26, 1e-14  ;;  %v3107_v0 = vadd.f32 %v2890_v7, %v2378_v29  ;;  %v6536_v53 = vpop.eup %4742 }
 0x265   : > { %v2165_v21 = vpop.f32.mrf.mxu0  ;;  %7670 = vst [vmem:[#allocation21_spill] sm:$0xff] %v6536_v53  ;;  %7671 = vst [vmem:[#allocation22_spill] sm:$0xff] %v6539_v25  ;;  %v4173_v47 = vmul.f32 0.0, %v6439_v12  ;;  %v6549_v42 = vpop.eup %4744 }
 0x266   : > { %v3366_v4 = vadd.f32 %v3365_v37, %v3364_v44  ;;  %v3108_v10 = vadd.f32 %v2892_v28, %v2379_v39  ;;  %v2904_v22 = vpop.f32.mrf.mxu1  ;;  %v6543_v38 = vadd.f32 %v3339_v61, %v6349_v48  ;;  %v6546_v8 = vmul.f32 %v3339_v61, %v6349_v48  ;;  %7672 = vst [vmem:[#allocation23_spill] sm:$0xff] %v6549_v42  ;;  %v6554_v24 = vpop.eup %4746 }
 0x267   : > { %v3354_v7 = vmul.f32 %v6415_v41, %v3339_v61  ;;  %v2167_v29 = vpop.f32.mrf.mxu0  ;;  %v2380_v44 = vadd.f32 %v2165_v21, %v5958_v63  ;;  %v4203_v39 = vmul.f32 0.0, %v6457_v33  ;;  %v3394_v12 = vmul.f32 %v3107_v0, %v3107_v0  ;;  %7673 = vst [vmem:[#allocation24_spill] sm:$0xff] %v6554_v24  ;;  %v7675_v0 = vld [vmem:[#allocation50_spill] sm:$0xff] }
 0x268   : > { %v3369_v57 = vmax.f32 %v3366_v4, 1e-14  ;;  %v3382_v32 = vadd.f32 %v3366_v4, %v3336_v26  ;;  %v3395_v1 = vmul.f32 %v3108_v10, %v3108_v10  ;;  %v2906_v28 = vpop.f32.mrf.mxu1  ;;  %4764 = vrsqrt.f32 %v6546_v8  ;;  %v6565_v63 = vpop.eup %4748  ;;  %v7676_v4 = vld [vmem:[#allocation51_spill] sm:$0xff] }
 0x269   : > { %v2171_v37 = vpop.f32.mrf.mxu0  ;;  %4766 = vlog2.f32 %v3354_v7  ;;  %7674 = vst [vmem:[#allocation25_spill] sm:$0xff] %v6565_v63  ;;  %v2381_v21 = vadd.f32 %v2167_v29, %v7675_v0  ;;  %v6570_v24 = vpop.eup %4750  ;;  %v6572_v42 = vmax.f32 %v4173_v47, 1e-14  ;;  %v6583_v0 = vmax.f32 %v4203_v39, 1e-14 }
 0x26a   : > { %v6557_v48 = vadd.f32 %v3369_v57, %v6352_v54  ;;  %v6560_v41 = vmul.f32 %v3369_v57, %v6352_v54  ;;  %v3384_v26 = vmul.f32 %v6420_v43, %v3369_v57  ;;  %v6563_v61 = vpop.f32.mrf.mxu1  ;;  %4768 = vrcp.f32 %v6539_v25  ;;  %7677 = vst [vmem:[#allocation26_spill] sm:$0xff] %v6570_v24  ;;  %v6578_v57 = vpop.eup %4752  ;;  %v7682_v24 = vld [vmem:[#allocation52_spill] sm:$0xff] }
 0x26b   : > { %v3396_v33 = vadd.f32 %v3395_v1, %v3394_v12  ;;  %v2382_v10 = vadd.f32 %v2171_v37, %v7676_v4  ;;  %v2173_v7 = vpop.f32.mrf.mxu0  ;;  %7678 = vst [vmem:[#allocation27_spill] sm:$0xff] %v6572_v42  ;;  %v3109_v54 = vadd.f32 %v6504_v18, %v2380_v44  ;;  %7679 = vst [vmem:[#allocation28_spill] sm:$0xff] %v6578_v57  ;;  %v6581_v37 = vpop.eup %4754  ;;  %vm3344_vm5 = vcmp.eq.f32.partialorder %v6546_v8, inf }
 0x26c   : > { %4770 = vrsqrt.f32 %v6560_v41  ;;  %v6576_v43 = vpop.f32.mrf.mxu1  ;;  %v3110_v29 = vadd.f32 %v6515_v3, %v2381_v21  ;;  %7680 = vst [vmem:[#allocation29_spill] sm:$0xff] %v6581_v37  ;;  %7681 = vst [vmem:[#allocation30_spill] sm:$0xff] %v6583_v0  ;;  %v2383_v4 = vadd.f32 %v2173_v7, %v5977_v2  ;;  %v6596_v21 = vpop.eup %4756  ;;  %vm3346_vm6 = vcmp.eq.f32.partialorder %v6546_v8, 0.0 }
 0x26d   : > { %4772 = vlog2.f32 %v3384_v26  ;;  %v3399_v25 = vmax.f32 %v3396_v33, 1e-14  ;;  %v3412_v1 = vadd.f32 %v3396_v33, %v3382_v32  ;;  %v2175_v12 = vpop.f32.mrf.mxu0  ;;  %v3111_v47 = vadd.f32 %v2900_v35, %v2382_v10  ;;  %7683 = vst [vmem:[#allocation31_spill] sm:$0xff] %v6596_v21  ;;  %v6603_v7 = vpop.eup %4758 }
 0x26e   : > { %v2384_v63 = vadd.f32 %v2175_v12, %v7682_v24  ;;  %v6587_v18 = vpop.f32.mrf.mxu1  ;;  %v3425_v32 = vmul.f32 %v3110_v29, %v3110_v29  ;;  %4774 = vrcp.f32 %v6572_v42  ;;  %v3424_v35 = vmul.f32 %v3109_v54, %v3109_v54  ;;  %v7684_v24 = vld [vmem:[#allocation53_spill] sm:$0xff]  ;;  %7685 = vst [vmem:[#allocation32_spill] sm:$0xff] %v6603_v7 }
 0x26f   : > { %v6590_v44 = vadd.f32 %v3399_v25, %v6358_v56  ;;  %v6593_v26 = vmul.f32 %v3399_v25, %v6358_v56  ;;  %v3414_v3 = vmul.f32 %v6428_v16, %v3399_v25  ;;  %v2177_v33 = vpop.f32.mrf.mxu0  ;;  %v3112_v2 = vadd.f32 %v6531_v51, %v2383_v4  ;;  %v6606_v16 = vpop.eup %4760 }
 0x270   : > { %v2385_v39 = vadd.f32 %v2177_v33, %v7684_v24  ;;  %v6601_v10 = vpop.f32.mrf.mxu1  ;;  %v3113_v56 = vadd.f32 %v2904_v22, %v2384_v63  ;;  %7686 = vst [vmem:[#allocation33_spill] sm:$0xff] %v6606_v16  ;;  %v3426_v25 = vadd.f32 %v3425_v32, %v3424_v35  ;;  %v3454_v29 = vmul.f32 %v3111_v47, %v3111_v47  ;;  %v6610_v54 = vpop.eup %4762 }
 0x271   : > { %4776 = vrsqrt.f32 %v6593_v26  ;;  %v2181_v12 = vpop.f32.mrf.mxu0  ;;  %v3455_v21 = vmul.f32 %v3112_v2, %v3112_v2  ;;  %7687 = vst [vmem:[#allocation34_spill] sm:$0xff] %v6610_v54  ;;  %v3347_v22 = vand.u32 2147483648, %v6546_v8  ;;  %vm3374_vm7 = vcmp.eq.f32.partialorder %v6560_v41, inf  ;;  %v7688_v2 = vld [vmem:[#allocation54_spill] sm:$0xff] }
 0x272   : > { %4778 = vlog2.f32 %v3414_v3  ;;  %v6608_v42 = vpop.f32.mrf.mxu1  ;;  %v3114_v51 = vadd.f32 %v2906_v28, %v2385_v39  ;;  %v3429_v63 = vmax.f32 %v3426_v25, 1e-14  ;;  %v3442_v33 = vadd.f32 %v3426_v25, %v3412_v1 }
 0x273   : > { %4780 = vrcp.f32 %v6583_v0  ;;  %v2183_v4 = vpop.f32.mrf.mxu0  ;;  %v3456_v3 = vadd.f32 %v3455_v21, %v3454_v29  ;;  %v3484_v47 = vmul.f32 %v3113_v56, %v3113_v56  ;;  %v2386_v24 = vadd.f32 %v2181_v12, %v7688_v2 }
 0x274   : > { %v6616_v32 = vpop.f32.mrf.mxu1  ;;  %v3485_v35 = vmul.f32 %v3114_v51, %v3114_v51  ;;  %v6623_v16 = vadd.f32 %v3429_v63, %v6363_v40  ;;  %v6626_v28 = vmul.f32 %v3429_v63, %v6363_v40  ;;  %v3444_v1 = vmul.f32 %v6435_v9, %v3429_v63 }
 0x275   : > { %v6620_v0 = vpop.f32.mrf.mxu0  ;;  %v4765_v54 = vpop.eup %4764  ;;  %v3459_v21 = vmax.f32 %v3456_v3, 1e-14  ;;  %vm3376_vm8 = vcmp.eq.f32.partialorder %v6560_v41, 0.0  ;;  %v3472_v56 = vadd.f32 %v3456_v3, %v3442_v33  ;;  %v3377_v40 = vand.u32 2147483648, %v6560_v41 }
 0x276   : > { %v4767_v39 = vpop.eup %4766  ;;  %v3343_v25 = vmul.f32 %v4765_v54, %v6546_v8  ;;  %v3486_v29 = vadd.f32 %v3485_v35, %v3484_v47  ;;  %v6633_v51 = vpop.f32.mrf.mxu1  ;;  %vm3404_vm9 = vcmp.eq.f32.partialorder %v6593_v26, inf  ;;  %4782 = vrsqrt.f32 %v6626_v28 }
 0x277   : > { %v6631_v12 = vpop.f32.mrf.mxu0  ;;  %v6635_v2 = vpop.eup %4768  ;;  %v3356_v7 = vmul.f32 0.6931472, %v4767_v39  ;;  %vm3406_vm10 = vcmp.eq.f32.partialorder %v6593_v26, 0.0  ;;  %4784 = vlog2.f32 %v3444_v1  ;;  %v6645_v63 = vadd.f32 %v3459_v21, %v6373_v14 }
 0x278   : > { %7689 = vst [vmem:[#allocation35_spill] sm:$0xff] %v6635_v2  ;;  %v3345_v54 = vsel %vm3344_vm5, %v6546_v8, %v3343_v25  ;;  %v3115_v33 = vadd.f32 %v6563_v61, %v2386_v24  ;;  %v6654_v37 = vmul.f32 %v3459_v21, %v6373_v14  ;;  %v3474_v1 = vmul.f32 %v6446_v58, %v3459_v21  ;;  %v6659_v61 = vpop.f32.mrf.mxu1 }
 0x279   : > { %v4771_v9 = vpop.eup %4770  ;;  %v6648_v3 = vpop.f32.mrf.mxu0  ;;  %v3348_v35 = vsel %vm3346_vm6, %v3347_v22, %v3345_v54  ;;  %v3357_v39 = vand.u32 2147483647, %v3356_v7  ;;  %v3489_v53 = vmax.f32 %v3486_v29, 1e-14  ;;  %v3407_v7 = vand.u32 2147483648, %v6593_v26 }
 0x27a   : > { %v4773_v47 = vpop.eup %4772  ;;  %v3373_v2 = vmul.f32 %v4771_v9, %v6560_v41  ;;  %v3349_v25 = vmul.f32 2.0, %v3348_v35  ;;  %4786 = vrsqrt.f32 %v6654_v37  ;;  %v2387_v14 = vadd.f32 %v2183_v4, %v5996_v23 }
 0x27b   : > { %v3386_v57 = vmul.f32 0.6931472, %v4773_v47  ;;  %v6657_v6 = vpop.f32.mrf.mxu0  ;;  %v6667_v22 = vpop.eup %4774  ;;  %v3514_v9 = vmul.f32 %v3115_v33, %v3115_v33  ;;  %v3358_v35 = vmul.f32 0.5, %v3357_v39  ;;  %4788 = vlog2.f32 %v3474_v1 }
 0x27c   : > { %v3375_v8 = vsel %vm3374_vm7, %v6560_v41, %v3373_v2  ;;  %v3350_v24 = vsub.f32 %v6543_v38, %v3349_v25  ;;  %v6675_v34 = vadd.f32 %v3489_v53, %v6381_v60  ;;  %v6679_v38 = vmul.f32 %v3489_v53, %v6381_v60 }
 0x27d   : > { %v3378_v58 = vsel %vm3376_vm8, %v3377_v40, %v3375_v8  ;;  %v3387_v21 = vand.u32 2147483647, %v3386_v57  ;;  %v6672_v54 = vpop.f32.mrf.mxu0  ;;  %v3502_v41 = vadd.f32 %v3486_v29, %v3472_v56  ;;  %v6681_v40 = vpop.f32.mrf.mxu1  ;;  %v3504_v1 = vmul.f32 %v6453_v13, %v3489_v53 }
 0x27e   : > { %v4777_v47 = vpop.eup %4776  ;;  %v3379_v2 = vmul.f32 2.0, %v3378_v58  ;;  %v3116_v8 = vadd.f32 %v6576_v43, %v2387_v14  ;;  %vm3434_vm11 = vcmp.eq.f32.partialorder %v6626_v28, inf  ;;  %4790 = vrsqrt.f32 %v6679_v38 }
 0x27f   : > { %v4779_v55 = vpop.eup %4778  ;;  %v3388_v23 = vmul.f32 0.5, %v3387_v21  ;;  %v3403_v4 = vmul.f32 %v4777_v47, %v6593_v26  ;;  %v6683_v57 = vpop.f32.mrf.mxu0  ;;  %vm3436_vm12 = vcmp.eq.f32.partialorder %v6626_v28, 0.0  ;;  %v3437_v53 = vand.u32 2147483648, %v6626_v28 }
 0x280   : > { %v6685_v33 = vpop.eup %4780  ;;  %v3380_v39 = vsub.f32 %v6557_v48, %v3379_v2  ;;  %v3416_v25 = vmul.f32 0.6931472, %v4779_v55  ;;  %4792 = vlog2.f32 %v3504_v1  ;;  %v3515_v43 = vmul.f32 %v3116_v8, %v3116_v8  ;;  %v6701_v14 = vpop.f32.mrf.mxu1 }
 0x281   : > { %v3389_v58 = vadd.f32 %v3388_v23, %v3358_v35  ;;  %v3405_v60 = vsel %vm3404_vm9, %v6593_v26, %v3403_v4  ;;  %v6695_v56 = vpop.f32.mrf.mxu0  ;;  %vm3464_vm13 = vcmp.eq.f32.partialorder %v6654_v37, inf  ;;  %v7690_v35 = vld [vmem:[#allocation55_spill] sm:$0xff]  ;;  %v7691_v26 = vld [vmem:[#allocation56_spill] sm:$0xff]  ;;  %vm3466_vm14 = vcmp.eq.f32.partialorder %v6654_v37, 0.0 }
 0x282   : > { %v3381_v29 = vadd.f32 %v3380_v39, %v3350_v24  ;;  %v3408_v48 = vsel %vm3406_vm10, %v3407_v7, %v3405_v60  ;;  %v3417_v55 = vand.u32 2147483647, %v3416_v25  ;;  %v2388_v24 = vadd.f32 %v6620_v0, %v7690_v35 }
 0x283   : > { %v3409_v13 = vmul.f32 2.0, %v3408_v48  ;;  %v6703_v21 = vpop.f32.mrf.mxu0  ;;  %v2389_v7 = vadd.f32 %v6631_v12, %v7691_v26  ;;  %v4783_v2 = vpop.eup %4782  ;;  %v3467_v4 = vand.u32 2147483648, %v6654_v37  ;;  %v3516_v39 = vadd.f32 %v3515_v43, %v3514_v9 }
 0x284   : > { %v3418_v47 = vmul.f32 0.5, %v3417_v55  ;;  %v4785_v1 = vpop.eup %4784  ;;  %v3433_v60 = vmul.f32 %v4783_v2, %v6626_v28  ;;  %v3117_v48 = vadd.f32 %v6587_v18, %v2388_v24  ;;  %vm3494_vm15 = vcmp.eq.f32.partialorder %v6679_v38, inf }
 0x285   : > { %v3410_v23 = vsub.f32 %v6590_v44, %v3409_v13  ;;  %v6713_v25 = vpop.f32.mrf.mxu0  ;;  %v3118_v0 = vadd.f32 %v6601_v10, %v2389_v7  ;;  %v3446_v12 = vmul.f32 0.6931472, %v4785_v1  ;;  %v3519_v35 = vmax.f32 %v3516_v39, 1e-14  ;;  %v6718_v44 = vpop.f32.mrf.mxu1 }
 0x286   : > { %v3419_v8 = vadd.f32 %v3418_v47, %v3389_v58  ;;  %v3532_v26 = vadd.f32 %v3516_v39, %v3502_v41  ;;  %v3435_v9 = vsel %vm3434_vm11, %v6626_v28, %v3433_v60  ;;  %v3544_v58 = vmul.f32 %v3117_v48, %v3117_v48  ;;  %v7692_v47 = vld [vmem:[#allocation57_spill] sm:$0xff] }
 0x287   : > { %v3411_v55 = vadd.f32 %v3410_v23, %v3381_v29  ;;  %v6720_v13 = vpop.f32.mrf.mxu0  ;;  %v3545_v43 = vmul.f32 %v3118_v0, %v3118_v0  ;;  %v2390_v18 = vadd.f32 %v6648_v3, %v7692_v47  ;;  %v4787_v10 = vpop.eup %4786  ;;  %v3438_v29 = vsel %vm3436_vm12, %v3437_v53, %v3435_v9 }
 0x288   : > { %v3447_v41 = vand.u32 2147483647, %v3446_v12  ;;  %v6731_v24 = vadd.f32 %v3519_v35, %v6384_v5  ;;  %v6734_v7 = vmul.f32 %v3519_v35, %v6384_v5  ;;  %v3439_v23 = vmul.f32 2.0, %v3438_v29  ;;  %v4789_v3 = vpop.eup %4788  ;;  %v6744_v0 = vpop.f32.mrf.mxu1 }
 0x289   : > { %v6736_v2 = vpop.f32.mrf.mxu0  ;;  %v3463_v39 = vmul.f32 %v4787_v10, %v6654_v37  ;;  %v3534_v1 = vmul.f32 %v6459_v50, %v3519_v35  ;;  %v3546_v60 = vadd.f32 %v3545_v43, %v3544_v58  ;;  %v3497_v28 = vand.u32 2147483648, %v6679_v38 }
 0x28a   : > { %v3448_v48 = vmul.f32 0.5, %v3447_v41  ;;  %4794 = vrsqrt.f32 %v6734_v7  ;;  %v2391_v53 = vadd.f32 %v6657_v6, %v6011_v45  ;;  %v3440_v5 = vsub.f32 %v6623_v16, %v3439_v23 }
 0x28b   : > { %v3465_v12 = vsel %vm3464_vm13, %v6654_v37, %v3463_v39  ;;  %v3476_v9 = vmul.f32 0.6931472, %v4789_v3  ;;  %v3119_v50 = vadd.f32 %v6608_v42, %v2390_v18  ;;  %4796 = vlog2.f32 %v3534_v1  ;;  %v6753_v47 = vpop.f32.mrf.mxu0  ;;  %v4791_v45 = vpop.eup %4790  ;;  %v7693_v1 = vld [vmem:[#allocation58_spill] sm:$0xff] }
 0x28c   : > { %v3449_v35 = vadd.f32 %v3448_v48, %v3419_v8  ;;  %v3468_v58 = vsel %vm3466_vm14, %v3467_v4, %v3465_v12  ;;  %v3549_v43 = vmax.f32 %v3546_v60, 1e-14  ;;  %v3441_v6 = vadd.f32 %v3440_v5, %v3411_v55  ;;  %v6763_v4 = vpop.f32.mrf.mxu1 }
 0x28d   : > { %v3469_v10 = vmul.f32 2.0, %v3468_v58  ;;  %v3477_v29 = vand.u32 2147483647, %v3476_v9  ;;  %v3562_v16 = vadd.f32 %v3546_v60, %v3532_v26  ;;  %v3493_v41 = vmul.f32 %v4791_v45, %v6679_v38  ;;  %v4793_v8 = vpop.eup %4792  ;;  %v7694_v58 = vld [vmem:[#allocation59_spill] sm:$0xff]  ;;  %v7695_v45 = vld [vmem:[#allocation60_spill] sm:$0xff] }
 0x28e   : > { %v6757_v23 = vadd.f32 %v3549_v43, %v6392_v31  ;;  %v6760_v42 = vmul.f32 %v3549_v43, %v6392_v31  ;;  %v3564_v37 = vmul.f32 %v6466_v46, %v3549_v43  ;;  %v3120_v55 = vadd.f32 %v6616_v32, %v2391_v53  ;;  %v6774_v46 = vpop.f32.mrf.mxu0  ;;  %v6779_v12 = vpop.f32.mrf.mxu1 }
 0x28f   : > { %v3470_v18 = vsub.f32 %v6645_v63, %v3469_v10  ;;  %v3478_v39 = vmul.f32 0.5, %v3477_v29  ;;  %v2392_v26 = vadd.f32 %v6672_v54, %v7693_v1  ;;  %v3495_v60 = vsel %vm3494_vm15, %v6679_v38, %v3493_v41 }
 0x290   : > { %vm3496_vm0 = vcmp.eq.f32.partialorder %v6679_v38, 0.0  ;;  %v3506_v31 = vmul.f32 0.6931472, %v4793_v8  ;;  %4798 = vrsqrt.f32 %v6760_v42  ;;  %v6777_v3 = vmul.f32 0.0, %v6478_v62 }
 0x291   : > { %v3471_v63 = vadd.f32 %v3470_v18, %v3441_v6  ;;  %v3479_v48 = vadd.f32 %v3478_v39, %v3449_v35  ;;  %v3498_v32 = vsel %vm3496_vm0, %v3497_v28, %v3495_v60  ;;  %4800 = vlog2.f32 %v3564_v37  ;;  %v6797_v37 = vpop.f32.mrf.mxu1  ;;  %v7696_v39 = vld [vmem:[#allocation62_spill] sm:$0xff] }
 0x292   : > { %v3499_v53 = vmul.f32 2.0, %v3498_v32  ;;  %v3507_v5 = vand.u32 2147483647, %v3506_v31  ;;  %v3574_v54 = vmul.f32 %v3119_v50, %v3119_v50  ;;  %v3575_v9 = vmul.f32 %v3120_v55, %v3120_v55  ;;  %v6790_v50 = vpop.f32.mrf.mxu0 }
 0x293   : > { %v3121_v38 = vadd.f32 %v6633_v51, %v2392_v26  ;;  %v2393_v43 = vadd.f32 %v6683_v57, %v7694_v58  ;;  %v2394_v10 = vadd.f32 %v6695_v56, %v7695_v45  ;;  %vm3524_vm1 = vcmp.eq.f32.partialorder %v6734_v7, inf }
 0x294   : > { %v3500_v62 = vsub.f32 %v6675_v34, %v3499_v53  ;;  %v3508_v6 = vmul.f32 0.5, %v3507_v5  ;;  %v2395_v28 = vadd.f32 %v6703_v21, %v6026_v59  ;;  %vm3526_vm2 = vcmp.eq.f32.partialorder %v6734_v7, 0.0  ;;  %v6805_v26 = vpop.f32.mrf.mxu0 }
 0x295   : > { %v3576_v35 = vadd.f32 %v3575_v9, %v3574_v54  ;;  %v3122_v51 = vadd.f32 %v6659_v61, %v2393_v43  ;;  %v3123_v57 = vadd.f32 %v6681_v40, %v2394_v10  ;;  %v3527_v56 = vand.u32 2147483648, %v6734_v7  ;;  %v6813_v54 = vpop.f32.mrf.mxu1 }
 0x296   : > { %v3501_v29 = vadd.f32 %v3500_v62, %v3471_v63  ;;  %v3509_v41 = vadd.f32 %v3508_v6, %v3479_v48  ;;  %v3124_v34 = vadd.f32 %v6701_v14, %v2395_v28  ;;  %vm3554_vm3 = vcmp.eq.f32.partialorder %v6760_v42, inf  ;;  %v7697_v48 = vld [vmem:[#allocation61_spill] sm:$0xff]  ;;  %v2223_v62 = vpop.f32.mrf.mxu0  ;;  %v7698_v28 = vld [vmem:[#allocation63_spill] sm:$0xff] }
 0x297   : > { %v4795_v8 = vpop.eup %4794  ;;  %v3577_v59 = vmul.f32 %v6366_v11, %v3576_v35  ;;  %v3604_v21 = vmul.f32 %v3121_v38, %v3121_v38  ;;  %v3605_v18 = vmul.f32 %v3122_v51, %v3122_v51  ;;  %v2397_v61 = vadd.f32 %v6720_v13, %v7696_v39 }
 0x298   : > { %v3523_v40 = vmul.f32 %v4795_v8, %v6734_v7  ;;  %vm3556_vm4 = vcmp.eq.f32.partialorder %v6760_v42, 0.0  ;;  %v3634_v55 = vmul.f32 %v3123_v57, %v3123_v57  ;;  %v3635_v1 = vmul.f32 %v3124_v34, %v3124_v34  ;;  %v4797_v14 = vpop.eup %4796  ;;  %v6831_v57 = vpop.f32.mrf.mxu1 }
 0x299   : > { %v3579_v60 = vmax.f32 %v3577_v59, 1e-14  ;;  %v3592_v31 = vadd.f32 %v3577_v59, %v3562_v16  ;;  %v3606_v63 = vadd.f32 %v3605_v18, %v3604_v21  ;;  %v2396_v11 = vadd.f32 %v6713_v25, %v7697_v48 }
 0x29a   : > { %v3525_v32 = vsel %vm3524_vm1, %v6734_v7, %v3523_v40  ;;  %v3536_v13 = vmul.f32 0.6931472, %v4797_v14  ;;  %v3636_v53 = vadd.f32 %v3635_v1, %v3634_v55  ;;  %v3126_v5 = vadd.f32 %v6744_v0, %v2397_v61  ;;  %v6836_v61 = vpop.f32.mrf.mxu0 }
 0x29b   : > { %v3528_v9 = vsel %vm3526_vm2, %v3527_v56, %v3525_v32  ;;  %v6818_v38 = vadd.f32 %v3579_v60, %v6395_v17  ;;  %v6821_v16 = vmul.f32 %v3579_v60, %v6395_v17  ;;  %v3594_v25 = vmul.f32 %v6470_v19, %v3579_v60 }
 0x29c   : > { %v3529_v58 = vmul.f32 2.0, %v3528_v9  ;;  %v3537_v43 = vand.u32 2147483647, %v3536_v13  ;;  %v3607_v45 = vmul.f32 0.0, %v3606_v63  ;;  %v3637_v10 = vmul.f32 0.0, %v3636_v53 }
 0x29d   : > { %v4799_v6 = vpop.eup %4798  ;;  %v3557_v0 = vand.u32 2147483648, %v6760_v42  ;;  %4802 = vrsqrt.f32 %v6821_v16  ;;  %v3125_v7 = vadd.f32 %v6718_v44, %v2396_v11  ;;  %v2398_v35 = vadd.f32 %v6736_v2, %v7698_v28  ;;  %v7702_v28 = vld [vmem:[#allocation68_spill] sm:$0xff] }
 0x29e   : > { %v3530_v17 = vsub.f32 %v6731_v24, %v3529_v58  ;;  %v3538_v51 = vmul.f32 0.5, %v3537_v43  ;;  %v3553_v19 = vmul.f32 %v4799_v6, %v6760_v42  ;;  %4804 = vlog2.f32 %v3594_v25  ;;  %v4801_v56 = vpop.eup %4800  ;;  %v7700_v25 = vld [vmem:[#allocation65_spill] sm:$0xff]  ;;  %v7701_v43 = vld [vmem:[#allocation66_spill] sm:$0xff] }
 0x29f   : > { %v3609_v34 = vmax.f32 %v3607_v45, 1e-14  ;;  %v3622_v8 = vadd.f32 %v3607_v45, %v3592_v31  ;;  %v3639_v59 = vmax.f32 %v3637_v10, 1e-14  ;;  %v3665_v21 = vmul.f32 %v3126_v5, %v3126_v5  ;;  %v2952_v31 = vpop.f32.mrf.mxu1 }
 0x2a0   : > { %v3531_v18 = vadd.f32 %v3530_v17, %v3501_v29  ;;  %v3539_v39 = vadd.f32 %v3538_v51, %v3509_v41  ;;  %v3555_v44 = vsel %vm3554_vm3, %v6760_v42, %v3553_v19  ;;  %v3566_v2 = vmul.f32 0.6931472, %v4801_v56  ;;  %v7703_v19 = vld [vmem:[#allocation67_spill] sm:$0xff] }
 0x2a1   : > { %v3558_v24 = vsel %vm3556_vm4, %v3557_v0, %v3555_v44  ;;  %v6841_v40 = vadd.f32 %v3609_v34, %v6401_v27  ;;  %v6844_v55 = vmul.f32 %v3609_v34, %v6401_v27  ;;  %v3624_v1 = vmul.f32 %v6481_v30, %v3609_v34  ;;  %v6858_v30 = vpop.f32.mrf.mxu0  ;;  %v6866_v5 = vpop.f32.mrf.mxu1 }
 0x2a2   : > { %v3559_v29 = vmul.f32 2.0, %v3558_v24  ;;  %v3567_v41 = vand.u32 2147483647, %v3566_v2  ;;  %v6848_v14 = vadd.f32 %v3639_v59, %v6407_v15  ;;  %v6851_v60 = vmul.f32 %v3639_v59, %v6407_v15 }
 0x2a3   : > { %v6854_v42 = vmax.f32 %v6777_v3, 1e-14  ;;  %4806 = vrsqrt.f32 %v6844_v55  ;;  %v3664_v48 = vmul.f32 %v3125_v7, %v3125_v7  ;;  %vm3584_vm5 = vcmp.eq.f32.partialorder %v6821_v16, inf  ;;  %v6877_v6 = vpop.f32.mrf.mxu0  ;;  %v6886_v34 = vpop.f32.mrf.mxu1 }
 0x2a4   : > { %v3560_v63 = vsub.f32 %v6757_v23, %v3559_v29  ;;  %v3568_v27 = vmul.f32 0.5, %v3567_v41  ;;  %4808 = vlog2.f32 %v3624_v1  ;;  %v3652_v11 = vadd.f32 %v3637_v10, %v3622_v8  ;;  %v7699_v23 = vld [vmem:[#allocation64_spill] sm:$0xff] }
 0x2a5   : > { %4810 = vrsqrt.f32 %v6851_v60  ;;  %v3127_v15 = vadd.f32 %v6763_v4, %v2398_v35  ;;  %v3654_v13 = vmul.f32 %v6489_v52, %v3639_v59  ;;  %v3666_v53 = vadd.f32 %v3665_v21, %v3664_v48  ;;  %v7704_v21 = vld [vmem:[#allocation2_spill] sm:$0xff] }
 0x2a6   : > { %v6863_v32 = vadd.f32 %v3560_v63, %v3531_v18  ;;  %v3569_v3 = vadd.f32 %v3568_v27, %v3539_v39  ;;  %vm3586_vm6 = vcmp.eq.f32.partialorder %v6821_v16, 0.0  ;;  %v2399_v9 = vadd.f32 %v6753_v47, %v7699_v23  ;;  %v6906_v27 = vpop.f32.mrf.mxu1 }
 0x2a7   : > { %v2400_v58 = vadd.f32 %v6774_v46, %v7700_v25  ;;  %v2401_v45 = vadd.f32 %v6790_v50, %v7701_v43  ;;  %v3587_v4 = vand.u32 2147483648, %v6821_v16  ;;  %v3617_v10 = vand.u32 2147483648, %v6844_v55 }
 0x2a8   : > { %4812 = vlog2.f32 %v3654_v13  ;;  %v3667_v52 = vmul.f32 0.0, %v3666_v53  ;;  %v3128_v0 = vadd.f32 %v6779_v12, %v2399_v9  ;;  %v2403_v35 = vadd.f32 %v2223_v62, %v7702_v28  ;;  %v7705_v53 = vld [vmem:[#allocation69_spill] sm:$0xff]  ;;  %v6917_v28 = vpop.f32.mrf.mxu1 }
 0x2a9   : > { %v3129_v7 = vadd.f32 %v6797_v37, %v2400_v58  ;;  %v3130_v47 = vadd.f32 %v6813_v54, %v2401_v45  ;;  %vm3614_vm7 = vcmp.eq.f32.partialorder %v6844_v55, inf  ;;  %v3694_v51 = vmul.f32 %v3127_v15, %v3127_v15 }
 0x2aa   : > { %v4803_v46 = vpop.eup %4802  ;;  %v3669_v50 = vmax.f32 %v3667_v52, 1e-14  ;;  %v3682_v17 = vadd.f32 %v3667_v52, %v3652_v11  ;;  %v2402_v56 = vadd.f32 %v6805_v26, %v7703_v19  ;;  %vm3616_vm8 = vcmp.eq.f32.partialorder %v6844_v55, 0.0  ;;  %v6897_v26 = vpop.f32.mrf.mxu0 }
 0x2ab   : > { %v4805_v8 = vpop.eup %4804  ;;  %v3583_v12 = vmul.f32 %v4803_v46, %v6821_v16  ;;  %v3695_v37 = vmul.f32 %v3128_v0, %v3128_v0  ;;  %v3724_v54 = vmul.f32 %v3129_v7, %v3129_v7  ;;  %v3725_v59 = vmul.f32 %v3130_v47, %v3130_v47 }
 0x2ac   : > { %v3596_v62 = vmul.f32 0.6931472, %v4805_v8  ;;  %v6891_v18 = vadd.f32 %v3669_v50, %v7704_v21  ;;  %v6894_v39 = vmul.f32 %v3669_v50, %v7704_v21  ;;  %v3684_v44 = vmul.f32 %v6497_v36, %v3669_v50  ;;  %v6912_v23 = vpop.f32.mrf.mxu0 }
 0x2ad   : > { %v3585_v2 = vsel %vm3584_vm5, %v6821_v16, %v3583_v12  ;;  %v3696_v24 = vadd.f32 %v3695_v37, %v3694_v51  ;;  %v3726_v1 = vadd.f32 %v3725_v59, %v3724_v54  ;;  %v3132_v29 = vadd.f32 %v2952_v31, %v2403_v35  ;;  %v7706_v12 = vld [vmem:[#allocation3_spill] sm:$0xff] }
 0x2ae   : > { %v3588_v41 = vsel %vm3586_vm6, %v3587_v4, %v3585_v2  ;;  %v3597_v63 = vand.u32 2147483647, %v3596_v62  ;;  %vm3644_vm9 = vcmp.eq.f32.partialorder %v6851_v60, inf  ;;  %4814 = vrsqrt.f32 %v6894_v39  ;;  %v6932_v51 = vpop.f32.mrf.mxu0  ;;  %v7707_v2 = vld [vmem:[#allocation70_spill] sm:$0xff] }
 0x2af   : > { %v3589_v36 = vmul.f32 2.0, %v3588_v41  ;;  %vm3646_vm10 = vcmp.eq.f32.partialorder %v6851_v60, 0.0  ;;  %v3647_v48 = vand.u32 2147483648, %v6851_v60  ;;  %4816 = vlog2.f32 %v3684_v44 }
 0x2b0   : > { %v4807_v11 = vpop.eup %4806  ;;  %v3598_v15 = vmul.f32 0.5, %v3597_v63  ;;  %v3697_v13 = vmul.f32 0.0, %v3696_v24  ;;  %v3727_v31 = vmul.f32 0.0, %v3726_v1  ;;  %v2404_v16 = vadd.f32 %v6836_v61, %v7705_v53  ;;  %v6950_v1 = vpop.f32.mrf.mxu0 }
 0x2b1   : > { %v4809_v9 = vpop.eup %4808  ;;  %v3590_v25 = vsub.f32 %v6818_v38, %v3589_v36  ;;  %v3613_v58 = vmul.f32 %v4807_v11, %v6844_v55  ;;  %v3131_v43 = vadd.f32 %v6831_v57, %v2402_v56  ;;  %v3755_v45 = vmul.f32 %v3132_v29, %v3132_v29 }
 0x2b2   : > { %v4811_v4 = vpop.eup %4810  ;;  %v3599_v52 = vadd.f32 %v3598_v15, %v3569_v3  ;;  %v3626_v0 = vmul.f32 0.6931472, %v4809_v9  ;;  %v3699_v7 = vmax.f32 %v3697_v13, 1e-14  ;;  %v3712_v47 = vadd.f32 %v3697_v13, %v3682_v17 }
 0x2b3   : > { %v3591_v35 = vadd.f32 %v3590_v25, %v6863_v32  ;;  %v3615_v61 = vsel %vm3614_vm7, %v6844_v55, %v3613_v58  ;;  %v3643_v38 = vmul.f32 %v4811_v4, %v6851_v60  ;;  %v3729_v46 = vmax.f32 %v3727_v31, 1e-14  ;;  %v6963_v58 = vpop.f32.mrf.mxu0 }
 0x2b4   : > { %v3618_v57 = vsel %vm3616_vm8, %v3617_v10, %v3615_v61  ;;  %v3627_v50 = vand.u32 2147483647, %v3626_v0  ;;  %v6927_v3 = vadd.f32 %v3699_v7, %v6423_v20  ;;  %v6930_v17 = vmul.f32 %v3699_v7, %v6423_v20  ;;  %v6944_v20 = vpop.f32.mrf.mxu1 }
 0x2b5   : > { %v4813_v32 = vpop.eup %4812  ;;  %v3619_v19 = vmul.f32 2.0, %v3618_v57  ;;  %v3645_v56 = vsel %vm3644_vm9, %v6851_v60, %v3643_v38  ;;  %v3714_v8 = vmul.f32 %v6509_v49, %v3699_v7  ;;  %v6939_v55 = vadd.f32 %v3729_v46, %v7706_v12  ;;  %v7710_v7 = vld [vmem:[#allocation72_spill] sm:$0xff] }
 0x2b6   : > { %v3628_v10 = vmul.f32 0.5, %v3627_v50  ;;  %v3648_v37 = vsel %vm3646_vm10, %v3647_v48, %v3645_v56  ;;  %v3656_v54 = vmul.f32 0.6931472, %v4813_v32  ;;  %4818 = vrsqrt.f32 %v6930_v17  ;;  %v7708_v48 = vld [vmem:[#allocation17_spill] sm:$0xff]  ;;  %v2966_v13 = vpop.f32.mrf.mxu1 }
 0x2b7   : > { %4820 = vrcp.f32 %v6854_v42  ;;  %v3620_v59 = vsub.f32 %v6841_v40, %v3619_v19  ;;  %v3649_v62 = vmul.f32 2.0, %v3648_v37  ;;  %v3754_v21 = vmul.f32 %v3131_v43, %v3131_v43  ;;  %v6979_v19 = vpop.f32.mrf.mxu0 }
 0x2b8   : > { %v3629_v44 = vadd.f32 %v3628_v10, %v3599_v52  ;;  %v3657_v49 = vand.u32 2147483647, %v3656_v54  ;;  %4822 = vlog2.f32 %v3714_v8  ;;  %v2405_v24 = vadd.f32 %v6858_v30, %v7707_v2  ;;  %v7711_v8 = vld [vmem:[#allocation4_spill] sm:$0xff] }
 0x2b9   : > { %v3621_v60 = vadd.f32 %v3620_v59, %v3591_v35  ;;  %v3650_v29 = vsub.f32 %v6848_v14, %v3649_v62  ;;  %v6954_v41 = vmul.f32 %v3729_v46, %v7706_v12  ;;  %v3742_v63 = vadd.f32 %v3727_v31, %v3712_v47  ;;  %v6973_v35 = vpop.f32.mrf.mxu1  ;;  %v7713_v62 = vld [vmem:[#allocation74_spill] sm:$0xff] }
 0x2ba   : > { %v3658_v36 = vmul.f32 0.5, %v3657_v49  ;;  %v3744_v40 = vmul.f32 %v7708_v48, %v3729_v46  ;;  %v3756_v11 = vadd.f32 %v3755_v45, %v3754_v21  ;;  %v3133_v15 = vadd.f32 %v6866_v5, %v2404_v16  ;;  %v7709_v45 = vld [vmem:[#allocation71_spill] sm:$0xff] }
 0x2bb   : > { %v4815_v53 = vpop.eup %4814  ;;  %v3651_v9 = vadd.f32 %v3650_v29, %v3621_v60  ;;  %vm3674_vm11 = vcmp.eq.f32.partialorder %v6894_v39, inf  ;;  %vm3676_vm12 = vcmp.eq.f32.partialorder %v6894_v39, 0.0  ;;  %4824 = vrsqrt.f32 %v6954_v41  ;;  %v6991_v21 = vpop.f32.mrf.mxu1 }
 0x2bc   : > { %v4817_v14 = vpop.eup %4816  ;;  %v3659_v30 = vadd.f32 %v3658_v36, %v3629_v44  ;;  %v3673_v25 = vmul.f32 %v4815_v53, %v6894_v39  ;;  %v3677_v31 = vand.u32 2147483648, %v6894_v39  ;;  %4826 = vlog2.f32 %v3744_v40  ;;  %v7000_v36 = vpop.f32.mrf.mxu0 }
 0x2bd   : > { %v3686_v43 = vmul.f32 0.6931472, %v4817_v14  ;;  %vm3704_vm13 = vcmp.eq.f32.partialorder %v6930_v17, inf  ;;  %v3757_v5 = vmul.f32 0.0, %v3756_v11  ;;  %v3134_v16 = vadd.f32 %v6886_v34, %v2405_v24  ;;  %v7008_v14 = vpop.f32.mrf.mxu1 }
 0x2be   : > { %v2406_v4 = vadd.f32 %v6877_v6, %v7709_v45  ;;  %v3675_v52 = vsel %vm3674_vm11, %v6894_v39, %v3673_v25  ;;  %vm3706_vm14 = vcmp.eq.f32.partialorder %v6930_v17, 0.0  ;;  %v3784_v0 = vmul.f32 %v3133_v15, %v3133_v15  ;;  %v7712_v39 = vld [vmem:[#allocation19_spill] sm:$0xff] }
 0x2bf   : > { %v2407_v47 = vadd.f32 %v6897_v26, %v7710_v7  ;;  %v3678_v61 = vsel %vm3676_vm12, %v3677_v31, %v3675_v52  ;;  %v3687_v38 = vand.u32 2147483647, %v3686_v43  ;;  %v3759_v46 = vmax.f32 %v3757_v5, 1e-14 }
 0x2c0   : > { %v3772_v57 = vadd.f32 %v3757_v5, %v3742_v63  ;;  %v3679_v34 = vmul.f32 2.0, %v3678_v61  ;;  %v3785_v50 = vmul.f32 %v3134_v16, %v3134_v16  ;;  %v3135_v6 = vadd.f32 %v6906_v27, %v2406_v4  ;;  %v7715_v4 = vld [vmem:[#allocation75_spill] sm:$0xff] }
 0x2c1   : > { %v3136_v32 = vadd.f32 %v6917_v28, %v2407_v47  ;;  %v3688_v56 = vmul.f32 0.5, %v3687_v38  ;;  %v6982_v12 = vadd.f32 %v3759_v46, %v7711_v8  ;;  %v6985_v26 = vmul.f32 %v3759_v46, %v7711_v8  ;;  %v7716_v47 = vld [vmem:[#allocation5_spill] sm:$0xff]  ;;  %v7717_v38 = vld [vmem:[#allocation20_spill] sm:$0xff] }
 0x2c2   : > { %v3774_v10 = vmul.f32 %v7712_v39, %v3759_v46  ;;  %v3680_v37 = vsub.f32 %v6891_v18, %v3679_v34  ;;  %v3786_v54 = vadd.f32 %v3785_v50, %v3784_v0  ;;  %v2409_v27 = vadd.f32 %v6932_v51, %v7713_v62  ;;  %v7714_v18 = vld [vmem:[#allocation73_spill] sm:$0xff]  ;;  %v7015_v0 = vpop.f32.mrf.mxu0  ;;  %v7719_v62 = vld [vmem:[#allocation6_spill] sm:$0xff] }
 0x2c3   : > { %v3815_v59 = vmul.f32 %v3136_v32, %v3136_v32  ;;  %v4819_v28 = vpop.eup %4818  ;;  %v3689_v44 = vadd.f32 %v3688_v56, %v3659_v30  ;;  %v3707_v49 = vand.u32 2147483648, %v6930_v17  ;;  %4828 = vrsqrt.f32 %v6985_v26  ;;  %v7718_v56 = vld [vmem:[#allocation76_spill] sm:$0xff] }
 0x2c4   : > { %v3814_v2 = vmul.f32 %v3135_v6, %v3135_v6  ;;  %v6995_v24 = vpop.eup %4820  ;;  %v3681_v60 = vadd.f32 %v3680_v37, %v3651_v9  ;;  %v3703_v29 = vmul.f32 %v4819_v28, %v6930_v17  ;;  %4830 = vlog2.f32 %v3774_v10  ;;  %v2976_v6 = vpop.f32.mrf.mxu1 }
 0x2c5   : > { %v2408_v63 = vadd.f32 %v6912_v23, %v7714_v18  ;;  %v4823_v51 = vpop.eup %4822  ;;  %vm3734_vm15 = vcmp.eq.f32.partialorder %v6954_v41, inf  ;;  %vm3736_vm0 = vcmp.eq.f32.partialorder %v6954_v41, 0.0  ;;  %v3787_v48 = vmul.f32 0.0, %v3786_v54  ;;  %v7034_v54 = vpop.f32.mrf.mxu0 }
 0x2c6   : > { %v3816_v40 = vadd.f32 %v3815_v59, %v3814_v2  ;;  %v3705_v11 = vsel %vm3704_vm13, %v6930_v17, %v3703_v29  ;;  %v3716_v15 = vmul.f32 0.6931472, %v4823_v51  ;;  %v3737_v53 = vand.u32 2147483648, %v6954_v41 }
 0x2c7   : > { %v3138_v9 = vadd.f32 %v2966_v13, %v2409_v27  ;;  %v3708_v23 = vsel %vm3706_vm14, %v3707_v49, %v3705_v11  ;;  %v3789_v30 = vmax.f32 %v3787_v48, 1e-14  ;;  %v3802_v25 = vadd.f32 %v3787_v48, %v3772_v57 }
 0x2c8   : > { %v3817_v31 = vmul.f32 0.0, %v3816_v40  ;;  %v4825_v43 = vpop.eup %4824  ;;  %v3709_v5 = vmul.f32 2.0, %v3708_v23  ;;  %v3717_v16 = vand.u32 2147483647, %v3716_v15  ;;  %v3137_v45 = vadd.f32 %v6944_v20, %v2408_v63  ;;  %v7721_v40 = vld [vmem:[#allocation15_spill] sm:$0xff] }
 0x2c9   : > { %v2410_v52 = vadd.f32 %v6950_v1, %v7715_v4  ;;  %v4827_v7 = vpop.eup %4826  ;;  %v3733_v13 = vmul.f32 %v4825_v43, %v6954_v41  ;;  %v7019_v61 = vadd.f32 %v3789_v30, %v7716_v47  ;;  %v7022_v17 = vmul.f32 %v3789_v30, %v7716_v47  ;;  %v7723_v4 = vld [vmem:[#allocation78_spill] sm:$0xff] }
 0x2ca   : > { %v3804_v46 = vmul.f32 %v7717_v38, %v3789_v30  ;;  %v3710_v57 = vsub.f32 %v6927_v3, %v3709_v5  ;;  %v3718_v34 = vmul.f32 0.5, %v3717_v16  ;;  %v3746_v20 = vmul.f32 0.6931472, %v4827_v7  ;;  %v7722_v16 = vld [vmem:[#allocation77_spill] sm:$0xff] }
 0x2cb   : > { %v3819_v50 = vmax.f32 %v3817_v31, 1e-14  ;;  %v3735_v1 = vsel %vm3734_vm15, %v6954_v41, %v3733_v13  ;;  %4832 = vrsqrt.f32 %v7022_v17  ;;  %v3845_v32 = vmul.f32 %v3138_v9, %v3138_v9 }
 0x2cc   : > { %v2411_v8 = vadd.f32 %v6963_v58, %v7718_v56  ;;  %v3711_v39 = vadd.f32 %v3710_v57, %v3681_v60  ;;  %v3719_v10 = vadd.f32 %v3718_v34, %v3689_v44  ;;  %v3738_v37 = vsel %vm3736_vm0, %v3737_v53, %v3735_v1  ;;  %v7720_v58 = vld [vmem:[#allocation21_spill] sm:$0xff]  ;;  %v7043_v44 = vpop.f32.mrf.mxu1  ;;  %v7053_v53 = vpop.f32.mrf.mxu0  ;;  %v7725_v56 = vld [vmem:[#allocation23_spill] sm:$0xff] }
 0x2cd   : > { %v3747_v3 = vand.u32 2147483647, %v3746_v20  ;;  %v3739_v59 = vmul.f32 2.0, %v3738_v37  ;;  %4834 = vlog2.f32 %v3804_v46  ;;  %v7037_v27 = vadd.f32 %v3819_v50, %v7719_v62 }
 0x2ce   : > { %v3844_v28 = vmul.f32 %v3137_v45, %v3137_v45  ;;  %v7040_v2 = vmul.f32 %v3819_v50, %v7719_v62  ;;  %v3832_v29 = vadd.f32 %v3817_v31, %v3802_v25  ;;  %v3834_v60 = vmul.f32 %v7720_v58, %v3819_v50  ;;  %v7058_v31 = vpop.f32.mrf.mxu1  ;;  %v7065_v46 = vpop.f32.mrf.mxu0 }
 0x2cf   : > { %v3748_v49 = vmul.f32 0.5, %v3747_v3  ;;  %v3740_v41 = vsub.f32 %v6939_v55, %v3739_v59  ;;  %v3139_v63 = vadd.f32 %v6973_v35, %v2410_v52  ;;  %v3140_v51 = vadd.f32 %v6991_v21, %v2411_v8 }
 0x2d0   : > { %v3846_v18 = vadd.f32 %v3845_v32, %v3844_v28  ;;  %v4829_v48 = vpop.eup %4828  ;;  %v7049_v11 = vmul.f32 0.0, %v7721_v40  ;;  %vm3764_vm1 = vcmp.eq.f32.partialorder %v6985_v26, inf  ;;  %4836 = vrsqrt.f32 %v7040_v2  ;;  %v7075_v8 = vpop.f32.mrf.mxu1 }
 0x2d1   : > { %v3749_v15 = vadd.f32 %v3748_v49, %v3719_v10  ;;  %v4831_v9 = vpop.eup %4830  ;;  %v3741_v23 = vadd.f32 %v3740_v41, %v3711_v39  ;;  %v3763_v55 = vmul.f32 %v4829_v48, %v6985_v26  ;;  %vm3766_vm2 = vcmp.eq.f32.partialorder %v6985_v26, 0.0  ;;  %v7081_v59 = vpop.f32.mrf.mxu0  ;;  %v7726_v41 = vld [vmem:[#allocation79_spill] sm:$0xff] }
 0x2d2   : > { %4838 = vlog2.f32 %v3834_v60  ;;  %v3767_v35 = vand.u32 2147483648, %v6985_v26  ;;  %v3776_v21 = vmul.f32 0.6931472, %v4831_v9  ;;  %v3847_v30 = vmul.f32 0.0, %v3846_v18 }
 0x2d3   : > { %v3875_v25 = vmul.f32 %v3140_v51, %v3140_v51  ;;  %v3765_v43 = vsel %vm3764_vm1, %v6985_v26, %v3763_v55  ;;  %v3874_v5 = vmul.f32 %v3139_v63, %v3139_v63  ;;  %v2412_v45 = vadd.f32 %v6979_v19, %v7722_v16  ;;  %v7724_v26 = vld [vmem:[#allocation7_spill] sm:$0xff]  ;;  %v2986_v63 = vpop.f32.mrf.mxu1 }
 0x2d4   : > { %v2413_v52 = vadd.f32 %v7000_v36, %v7723_v4  ;;  %v3768_v7 = vsel %vm3766_vm2, %v3767_v35, %v3765_v43  ;;  %v3777_v13 = vand.u32 2147483647, %v3776_v21  ;;  %v3849_v47 = vmax.f32 %v3847_v30, 1e-14  ;;  %v2263_v35 = vpop.f32.mrf.mxu0  ;;  %v7729_v4 = vld [vmem:[#allocation80_spill] sm:$0xff] }
 0x2d5   : > { %v3862_v38 = vadd.f32 %v3847_v30, %v3832_v29  ;;  %v3769_v57 = vmul.f32 2.0, %v3768_v7  ;;  %v3876_v34 = vadd.f32 %v3875_v25, %v3874_v5  ;;  %v3141_v20 = vadd.f32 %v7008_v14, %v2412_v45  ;;  %v2990_v7 = vpop.f32.mrf.mxu1 }
 0x2d6   : > { %v3142_v50 = vadd.f32 %v2976_v6, %v2413_v52  ;;  %v3778_v1 = vmul.f32 0.5, %v3777_v13  ;;  %v7069_v32 = vadd.f32 %v3849_v47, %v7724_v26  ;;  %v7072_v19 = vmul.f32 %v3849_v47, %v7724_v26  ;;  %v7113_v26 = vpop.f32.mrf.mxu0 }
 0x2d7   : > { %v3864_v36 = vmul.f32 %v7725_v56, %v3849_v47  ;;  %v3770_v39 = vsub.f32 %v6982_v12, %v3769_v57  ;;  %vm3794_vm3 = vcmp.eq.f32.partialorder %v7022_v17, inf  ;;  %v3877_v10 = vmul.f32 0.0, %v3876_v34  ;;  %v7730_v57 = vld [vmem:[#allocation81_spill] sm:$0xff] }
 0x2d8   : > { %v3905_v37 = vmul.f32 %v3142_v50, %v3142_v50  ;;  %v4833_v3 = vpop.eup %4832  ;;  %v3779_v14 = vadd.f32 %v3778_v1, %v3749_v15  ;;  %vm3796_vm4 = vcmp.eq.f32.partialorder %v7022_v17, 0.0  ;;  %4840 = vrsqrt.f32 %v7072_v19  ;;  %v7727_v15 = vld [vmem:[#allocation9_spill] sm:$0xff] }
 0x2d9   : > { %v3904_v6 = vmul.f32 %v3141_v20, %v3141_v20  ;;  %v3771_v62 = vadd.f32 %v3770_v39, %v3741_v23  ;;  %v3793_v28 = vmul.f32 %v4833_v3, %v7022_v17  ;;  %v3797_v49 = vand.u32 2147483648, %v7022_v17  ;;  %v7731_v39 = vld [vmem:[#allocation8_spill] sm:$0xff] }
 0x2da   : > { %4842 = vlog2.f32 %v3864_v36  ;;  %v4835_v12 = vpop.eup %4834  ;;  %v3879_v29 = vmax.f32 %v3877_v10, 1e-14  ;;  %v3892_v58 = vadd.f32 %v3877_v10, %v3862_v38  ;;  %v2414_v18 = vadd.f32 %v7015_v0, %v7726_v41  ;;  %v7728_v0 = vld [vmem:[#allocation24_spill] sm:$0xff] }
 0x2db   : > { %v3906_v60 = vadd.f32 %v3905_v37, %v3904_v6  ;;  %v3795_v51 = vsel %vm3794_vm3, %v7022_v17, %v3793_v28  ;;  %v3806_v48 = vmul.f32 0.6931472, %v4835_v12  ;;  %vm3824_vm5 = vcmp.eq.f32.partialorder %v7040_v2, inf  ;;  %v7732_v37 = vld [vmem:[#allocation25_spill] sm:$0xff]  ;;  %v2992_v6 = vpop.f32.mrf.mxu1 }
 0x2dc   : > { %vm3826_vm6 = vcmp.eq.f32.partialorder %v7040_v2, 0.0  ;;  %v3798_v40 = vsel %vm3796_vm4, %v3797_v49, %v3795_v51  ;;  %v7095_v9 = vadd.f32 %v3879_v29, %v7727_v15  ;;  %v7098_v23 = vmul.f32 %v3879_v29, %v7727_v15 }
 0x2dd   : > { %v3894_v55 = vmul.f32 %v7728_v0, %v3879_v29  ;;  %v4837_v21 = vpop.eup %4836  ;;  %v3799_v30 = vmul.f32 2.0, %v3798_v40  ;;  %v3807_v25 = vand.u32 2147483647, %v3806_v48  ;;  %v3827_v43 = vand.u32 2147483648, %v7040_v2  ;;  %v2267_v29 = vpop.f32.mrf.mxu0 }
 0x2de   : > { %v3907_v5 = vmul.f32 0.0, %v3906_v60  ;;  %v3823_v45 = vmul.f32 %v4837_v21, %v7040_v2  ;;  %4844 = vrsqrt.f32 %v7098_v23  ;;  %v3143_v17 = vadd.f32 %v7043_v44, %v2414_v18  ;;  %v7735_v21 = vld [vmem:[#allocation84_spill] sm:$0xff] }
 0x2df   : > { %v4839_v16 = vpop.eup %4838  ;;  %v2415_v52 = vadd.f32 %v7034_v54, %v7729_v4  ;;  %v3800_v13 = vsub.f32 %v7019_v61, %v3799_v30  ;;  %v3808_v47 = vmul.f32 0.5, %v3807_v25  ;;  %v2416_v34 = vadd.f32 %v7053_v53, %v7730_v57 }
 0x2e0   : > { %v3836_v38 = vmul.f32 0.6931472, %v4839_v16  ;;  %v3825_v20 = vsel %vm3824_vm5, %v7040_v2, %v3823_v45  ;;  %4846 = vlog2.f32 %v3894_v55  ;;  %v3909_v50 = vmax.f32 %v3907_v5, 1e-14  ;;  %v7734_v55 = vld [vmem:[#allocation83_spill] sm:$0xff]  ;;  %v7143_v16 = vpop.f32.mrf.mxu0 }
 0x2e1   : > { %v3922_v1 = vadd.f32 %v3907_v5, %v3892_v58  ;;  %v3801_v44 = vadd.f32 %v3800_v13, %v3771_v62  ;;  %v3809_v56 = vadd.f32 %v3808_v47, %v3779_v14  ;;  %v3828_v54 = vsel %vm3826_vm6, %v3827_v43, %v3825_v20  ;;  %v7733_v14 = vld [vmem:[#allocation82_spill] sm:$0xff] }
 0x2e2   : > { %v3837_v61 = vand.u32 2147483647, %v3836_v38  ;;  %v3829_v36 = vmul.f32 2.0, %v3828_v54  ;;  %v7118_v10 = vadd.f32 %v3909_v50, %v7731_v39  ;;  %v7121_v53 = vmul.f32 %v3909_v50, %v7731_v39  ;;  %v2273_v54 = vpop.f32.mrf.mxu0  ;;  %v7736_v39 = vld [vmem:[#allocation10_spill] sm:$0xff] }
 0x2e3   : > { %v3924_v3 = vmul.f32 %v7732_v37, %v3909_v50  ;;  %vm3854_vm7 = vcmp.eq.f32.partialorder %v7072_v19, inf  ;;  %v3144_v62 = vadd.f32 %v7058_v31, %v2415_v52  ;;  %v2417_v2 = vadd.f32 %v7065_v46, %v7733_v14 }
 0x2e4   : > { %v3838_v28 = vmul.f32 0.5, %v3837_v61  ;;  %v3830_v49 = vsub.f32 %v7037_v27, %v3829_v36  ;;  %vm3856_vm8 = vcmp.eq.f32.partialorder %v7072_v19, 0.0  ;;  %4848 = vrsqrt.f32 %v7121_v53  ;;  %v7134_v27 = vpop.f32.mrf.mxu1 }
 0x2e5   : > { %v3145_v12 = vadd.f32 %v7075_v8, %v2416_v34  ;;  %v4841_v58 = vpop.eup %4840  ;;  %4850 = vlog2.f32 %v3924_v3  ;;  %v3934_v41 = vmul.f32 %v3143_v17, %v3143_v17  ;;  %v3935_v18 = vmul.f32 %v3144_v62, %v3144_v62 }
 0x2e6   : > { %v3839_v60 = vadd.f32 %v3838_v28, %v3809_v56  ;;  %v3831_v48 = vadd.f32 %v3830_v49, %v3801_v44  ;;  %v3853_v31 = vmul.f32 %v4841_v58, %v7072_v19  ;;  %v3857_v46 = vand.u32 2147483648, %v7072_v19  ;;  %v2996_v13 = vpop.f32.mrf.mxu1  ;;  %v7738_v49 = vld [vmem:[#allocation85_spill] sm:$0xff]  ;;  %v7739_v58 = vld [vmem:[#allocation86_spill] sm:$0xff] }
 0x2e7   : > { %v4843_v51 = vpop.eup %4842  ;;  %v3146_v40 = vadd.f32 %v2986_v63, %v2417_v2  ;;  %v3936_v0 = vadd.f32 %v3935_v18, %v3934_v41  ;;  %v2418_v8 = vadd.f32 %v7081_v59, %v7734_v55  ;;  %v2419_v30 = vadd.f32 %v2263_v35, %v7735_v21 }
 0x2e8   : > { %v3866_v15 = vmul.f32 0.6931472, %v4843_v51  ;;  %v3855_v25 = vsel %vm3854_vm7, %v7072_v19, %v3853_v31  ;;  %vm3884_vm9 = vcmp.eq.f32.partialorder %v7098_v23, inf  ;;  %v3964_v43 = vmul.f32 %v3145_v12, %v3145_v12  ;;  %v3000_v14 = vpop.f32.mrf.mxu1 }
 0x2e9   : > { %v3965_v5 = vmul.f32 %v3146_v40, %v3146_v40  ;;  %v3858_v63 = vsel %vm3856_vm8, %v3857_v46, %v3855_v25  ;;  %vm3886_vm10 = vcmp.eq.f32.partialorder %v7098_v23, 0.0  ;;  %v3937_v17 = vmul.f32 0.0, %v3936_v0  ;;  %v7740_v46 = vld [vmem:[#allocation11_spill] sm:$0xff]  ;;  %v7741_v0 = vld [vmem:[#allocation28_spill] sm:$0xff] }
 0x2ea   : > { %v3867_v45 = vand.u32 2147483647, %v3866_v15  ;;  %v3859_v59 = vmul.f32 2.0, %v3858_v63  ;;  %v3887_v35 = vand.u32 2147483648, %v7098_v23  ;;  %v3148_v52 = vadd.f32 %v2992_v6, %v2419_v30  ;;  %v7737_v6 = vld [vmem:[#allocation26_spill] sm:$0xff]  ;;  %v3002_v25 = vpop.f32.mrf.mxu1 }
 0x2eb   : > { %v3966_v4 = vadd.f32 %v3965_v5, %v3964_v43  ;;  %v4845_v47 = vpop.eup %4844  ;;  %vm3914_vm11 = vcmp.eq.f32.partialorder %v7121_v53, inf  ;;  %v3939_v57 = vmax.f32 %v3937_v17, 1e-14  ;;  %v3952_v34 = vadd.f32 %v3937_v17, %v3922_v1 }
 0x2ec   : > { %v3868_v38 = vmul.f32 0.5, %v3867_v45  ;;  %v3147_v20 = vadd.f32 %v2990_v7, %v2418_v8  ;;  %v3860_v19 = vsub.f32 %v7069_v32, %v3859_v59  ;;  %v3883_v50 = vmul.f32 %v4845_v47, %v7098_v23 }
 0x2ed   : > { %v3967_v44 = vmul.f32 0.0, %v3966_v4  ;;  %v3995_v56 = vmul.f32 %v3148_v52, %v3148_v52  ;;  %v4847_v61 = vpop.eup %4846  ;;  %v7153_v37 = vadd.f32 %v3939_v57, %v7736_v39  ;;  %v7156_v3 = vmul.f32 %v3939_v57, %v7736_v39 }
 0x2ee   : > { %v3869_v36 = vadd.f32 %v3868_v38, %v3839_v60  ;;  %v3954_v28 = vmul.f32 %v7737_v6, %v3939_v57  ;;  %v3861_v62 = vadd.f32 %v3860_v19, %v3831_v48  ;;  %v3885_v32 = vsel %vm3884_vm9, %v7098_v23, %v3883_v50  ;;  %v2275_v48 = vpop.f32.mrf.mxu0  ;;  %v3004_v19 = vpop.f32.mrf.mxu1 }
 0x2ef   : > { %v3896_v7 = vmul.f32 0.6931472, %v4847_v61  ;;  %v3969_v1 = vmax.f32 %v3967_v44, 1e-14  ;;  %v3888_v2 = vsel %vm3886_vm10, %v3887_v35, %v3885_v32  ;;  %4852 = vrsqrt.f32 %v7156_v3 }
 0x2f0   : > { %v2420_v12 = vadd.f32 %v7113_v26, %v7738_v49  ;;  %v2421_v60 = vadd.f32 %v2267_v29, %v7739_v58  ;;  %v3889_v41 = vmul.f32 2.0, %v3888_v2  ;;  %4854 = vlog2.f32 %v3954_v28  ;;  %v2277_v59 = vpop.f32.mrf.mxu0  ;;  %v3006_v49 = vpop.f32.mrf.mxu1 }
 0x2f1   : > { %v3897_v18 = vand.u32 2147483647, %v3896_v7  ;;  %v3994_v51 = vmul.f32 %v3147_v20, %v3147_v20  ;;  %v4849_v31 = vpop.eup %4848  ;;  %v7169_v40 = vadd.f32 %v3969_v1, %v7740_v46  ;;  %v7172_v15 = vmul.f32 %v3969_v1, %v7740_v46 }
 0x2f2   : > { %v3982_v23 = vadd.f32 %v3967_v44, %v3952_v34  ;;  %v3984_v55 = vmul.f32 %v7741_v0, %v3969_v1  ;;  %v4851_v8 = vpop.eup %4850  ;;  %v3890_v26 = vsub.f32 %v7095_v9, %v3889_v41  ;;  %v3913_v29 = vmul.f32 %v4849_v31, %v7121_v53  ;;  %v7742_v34 = vld [vmem:[#allocation87_spill] sm:$0xff]  ;;  %v2281_v28 = vpop.f32.mrf.mxu0 }
 0x2f3   : > { %v3898_v21 = vmul.f32 0.5, %v3897_v18  ;;  %v3996_v30 = vadd.f32 %v3995_v56, %v3994_v51  ;;  %vm3916_vm12 = vcmp.eq.f32.partialorder %v7121_v53, 0.0  ;;  %v3917_v43 = vand.u32 2147483648, %v7121_v53 }
 0x2f4   : > { %v3926_v5 = vmul.f32 0.6931472, %v4851_v8  ;;  %4856 = vrsqrt.f32 %v7172_v15  ;;  %v3891_v63 = vadd.f32 %v3890_v26, %v3861_v62  ;;  %v3915_v17 = vsel %vm3914_vm11, %v7121_v53, %v3913_v29  ;;  %v7743_v53 = vld [vmem:[#allocation88_spill] sm:$0xff]  ;;  %v2283_v51 = vpop.f32.mrf.mxu0 }
 0x2f5   : > { %v3899_v45 = vadd.f32 %v3898_v21, %v3869_v36  ;;  %v3149_v9 = vadd.f32 %v7134_v27, %v2420_v12  ;;  %v3918_v35 = vsel %vm3916_vm12, %v3917_v43, %v3915_v17  ;;  %4858 = vlog2.f32 %v3984_v55  ;;  %v7748_v43 = vld [vmem:[#allocation91_spill] sm:$0xff] }
 0x2f6   : > { %v3927_v4 = vand.u32 2147483647, %v3926_v5  ;;  %v3997_v52 = vmul.f32 0.0, %v3996_v30  ;;  %v7185_v47 = vmax.f32 %v7049_v11, 1e-14  ;;  %v3919_v38 = vmul.f32 2.0, %v3918_v35 }
 0x2f7   : > { %v3150_v57 = vadd.f32 %v2996_v13, %v2421_v60  ;;  %v2422_v20 = vadd.f32 %v7143_v16, %v7742_v34  ;;  %v2423_v61 = vadd.f32 %v2273_v54, %v7743_v53  ;;  %v4024_v36 = vmul.f32 %v3149_v9, %v3149_v9  ;;  %v7744_v11 = vld [vmem:[#allocation12_spill] sm:$0xff]  ;;  %v7745_v16 = vld [vmem:[#allocation29_spill] sm:$0xff] }
 0x2f8   : > { %v3928_v50 = vmul.f32 0.5, %v3927_v4  ;;  %v3999_v44 = vmax.f32 %v3997_v52, 1e-14  ;;  %v4012_v56 = vadd.f32 %v3997_v52, %v3982_v23  ;;  %v3920_v27 = vsub.f32 %v7118_v10, %v3919_v38  ;;  %v7747_v23 = vld [vmem:[#allocation90_spill] sm:$0xff]  ;;  %v7749_v9 = vld [vmem:[#allocation13_spill] sm:$0xff]  ;;  %v2285_v4 = vpop.f32.mrf.mxu0 }
 0x2f9   : > { %v4025_v39 = vmul.f32 %v3150_v57, %v3150_v57  ;;  %v3151_v6 = vadd.f32 %v3000_v14, %v2422_v20  ;;  %vm3944_vm13 = vcmp.eq.f32.partialorder %v7156_v3, inf  ;;  %v3152_v54 = vadd.f32 %v3002_v25, %v2423_v61  ;;  %v7746_v14 = vld [vmem:[#allocation89_spill] sm:$0xff]  ;;  %v7750_v57 = vld [vmem:[#allocation31_spill] sm:$0xff] }
 0x2fa   : > { %v3929_v62 = vadd.f32 %v3928_v50, %v3899_v45  ;;  %v7192_v32 = vadd.f32 %v3999_v44, %v7744_v11  ;;  %v7195_v13 = vmul.f32 %v3999_v44, %v7744_v11  ;;  %v4014_v7 = vmul.f32 %v7745_v16, %v3999_v44  ;;  %v2287_v16 = vpop.f32.mrf.mxu0 }
 0x2fb   : > { %v3921_v1 = vadd.f32 %v3920_v27, %v3891_v63  ;;  %v4026_v2 = vadd.f32 %v4025_v39, %v4024_v36  ;;  %vm3946_vm14 = vcmp.eq.f32.partialorder %v7156_v3, 0.0  ;;  %v3947_v10 = vand.u32 2147483648, %v7156_v3 }
 0x2fc   : > { %4860 = vrsqrt.f32 %v7195_v13  ;;  %v2424_v12 = vadd.f32 %v2275_v48, %v7746_v14  ;;  %v4853_v58 = vpop.eup %4852  ;;  %v4054_v41 = vmul.f32 %v3151_v6, %v3151_v6  ;;  %v4055_v18 = vmul.f32 %v3152_v54, %v3152_v54  ;;  %v3010_v48 = vpop.f32.mrf.mxu1 }
 0x2fd   : > { %4862 = vlog2.f32 %v4014_v7  ;;  %v4027_v60 = vmul.f32 0.0, %v4026_v2  ;;  %v4855_v31 = vpop.eup %4854  ;;  %v3943_v46 = vmul.f32 %v4853_v58, %v7156_v3  ;;  %vm3974_vm15 = vcmp.eq.f32.partialorder %v7172_v15, inf }
 0x2fe   : > { %vm3976_vm0 = vcmp.eq.f32.partialorder %v7172_v15, 0.0  ;;  %v2425_v0 = vadd.f32 %v2277_v59, %v7747_v23  ;;  %v3956_v55 = vmul.f32 0.6931472, %v4855_v31  ;;  %v4056_v21 = vadd.f32 %v4055_v18, %v4054_v41  ;;  %v3012_v44 = vpop.f32.mrf.mxu1 }
 0x2ff   : > { %v4029_v8 = vmax.f32 %v4027_v60, 1e-14  ;;  %v4042_v26 = vadd.f32 %v4027_v60, %v4012_v56  ;;  %v3945_v29 = vsel %vm3944_vm13, %v7156_v3, %v3943_v46  ;;  %v3977_v30 = vand.u32 2147483648, %v7172_v15  ;;  %v7751_v56 = vld [vmem:[#allocation92_spill] sm:$0xff]  ;;  %v2291_v46 = vpop.f32.mrf.mxu0 }
 0x300   : > { %v3153_v25 = vadd.f32 %v3004_v19, %v2424_v12  ;;  %v2426_v5 = vadd.f32 %v2281_v28, %v7748_v43  ;;  %v3948_v45 = vsel %vm3946_vm14, %v3947_v10, %v3945_v29  ;;  %v3957_v17 = vand.u32 2147483647, %v3956_v55  ;;  %v7752_v10 = vld [vmem:[#allocation14_spill] sm:$0xff]  ;;  %v7753_v12 = vld [vmem:[#allocation32_spill] sm:$0xff] }
 0x301   : > { %v4857_v63 = vpop.eup %4856  ;;  %v7215_v59 = vadd.f32 %v4029_v8, %v7749_v9  ;;  %v7218_v35 = vmul.f32 %v4029_v8, %v7749_v9  ;;  %v3949_v52 = vmul.f32 2.0, %v3948_v45  ;;  %v4044_v34 = vmul.f32 %v7750_v57, %v4029_v8 }
 0x302   : > { %v3973_v38 = vmul.f32 %v4857_v63, %v7172_v15  ;;  %v4057_v20 = vmul.f32 0.0, %v4056_v21  ;;  %v4859_v19 = vpop.eup %4858  ;;  %v3958_v50 = vmul.f32 0.5, %v3957_v17  ;;  %v3154_v3 = vadd.f32 %v3006_v49, %v2425_v0 }
 0x303   : > { %4864 = vrsqrt.f32 %v7218_v35  ;;  %v2427_v53 = vadd.f32 %v2283_v51, %v7751_v56  ;;  %v3950_v61 = vsub.f32 %v7153_v37, %v3949_v52  ;;  %v3986_v36 = vmul.f32 0.6931472, %v4859_v19  ;;  %v7756_v19 = vld [vmem:[#allocation95_spill] sm:$0xff] }
 0x304   : > { %v3975_v27 = vsel %vm3974_vm15, %v7172_v15, %v3973_v38  ;;  %v3155_v39 = vadd.f32 %v3010_v48, %v2426_v5  ;;  %v3959_v6 = vadd.f32 %v3958_v50, %v3929_v62  ;;  %4866 = vlog2.f32 %v4044_v34  ;;  %v3014_v62 = vpop.f32.mrf.mxu1  ;;  %v7755_v5 = vld [vmem:[#allocation94_spill] sm:$0xff]  ;;  %v2293_v38 = vpop.f32.mrf.mxu0 }
 0x305   : > { %v3978_v28 = vsel %vm3976_vm0, %v3977_v30, %v3975_v27  ;;  %v4059_v11 = vmax.f32 %v4057_v20, 1e-14  ;;  %v3951_v7 = vadd.f32 %v3950_v61, %v3921_v1  ;;  %v3987_v54 = vand.u32 2147483647, %v3986_v36 }
 0x306   : > { %v3979_v2 = vmul.f32 2.0, %v3978_v28  ;;  %v4072_v49 = vadd.f32 %v4057_v20, %v4042_v26  ;;  %v4085_v60 = vmul.f32 %v3154_v3, %v3154_v3  ;;  %vm4004_vm1 = vcmp.eq.f32.partialorder %v7195_v13, inf  ;;  %v3016_v29 = vpop.f32.mrf.mxu1 }
 0x307   : > { %v7231_v14 = vadd.f32 %v4059_v11, %v7752_v10  ;;  %v7234_v37 = vmul.f32 %v4059_v11, %v7752_v10  ;;  %v4074_v58 = vmul.f32 %v7753_v12, %v4059_v11  ;;  %v3988_v41 = vmul.f32 0.5, %v3987_v54  ;;  %v7759_v10 = vld [vmem:[#allocation33_spill] sm:$0xff] }
 0x308   : > { %v3980_v15 = vsub.f32 %v7169_v40, %v3979_v2  ;;  %v3156_v18 = vadd.f32 %v3012_v44, %v2427_v53  ;;  %vm4006_vm2 = vcmp.eq.f32.partialorder %v7195_v13, 0.0  ;;  %v4007_v51 = vand.u32 2147483648, %v7195_v13 }
 0x309   : > { %v4861_v1 = vpop.eup %4860  ;;  %4868 = vrsqrt.f32 %v7234_v37  ;;  %v4084_v31 = vmul.f32 %v3153_v25, %v3153_v25  ;;  %v3989_v55 = vadd.f32 %v3988_v41, %v3959_v6  ;;  %vm4034_vm3 = vcmp.eq.f32.partialorder %v7218_v35, inf  ;;  %v7754_v25 = vld [vmem:[#allocation93_spill] sm:$0xff] }
 0x30a   : > { %v4863_v23 = vpop.eup %4862  ;;  %v3981_v0 = vadd.f32 %v3980_v15, %v3951_v7  ;;  %v4003_v8 = vmul.f32 %v4861_v1, %v7195_v13  ;;  %4870 = vlog2.f32 %v4074_v58  ;;  %v4114_v21 = vmul.f32 %v3155_v39, %v3155_v39  ;;  %v7757_v39 = vld [vmem:[#allocation96_spill] sm:$0xff] }
 0x30b   : > { %v4016_v40 = vmul.f32 0.6931472, %v4863_v23  ;;  %v4086_v26 = vadd.f32 %v4085_v60, %v4084_v31  ;;  %v4115_v48 = vmul.f32 %v3156_v18, %v3156_v18  ;;  %vm4036_vm4 = vcmp.eq.f32.partialorder %v7218_v35, 0.0  ;;  %v7760_v23 = vld [vmem:[#allocation18_spill] sm:$0xff] }
 0x30c   : > { %v4005_v30 = vsel %vm4004_vm1, %v7195_v13, %v4003_v8  ;;  %v2428_v43 = vadd.f32 %v2285_v4, %v7754_v25  ;;  %v2429_v63 = vadd.f32 %v2287_v16, %v7755_v5  ;;  %v4037_v34 = vand.u32 2147483648, %v7218_v35  ;;  %v3020_v4 = vpop.f32.mrf.mxu1  ;;  %v7758_v16 = vld [vmem:[#allocation16_spill] sm:$0xff] }
 0x30d   : > { %v4008_v45 = vsel %vm4006_vm2, %v4007_v51, %v4005_v30  ;;  %v4017_v17 = vand.u32 2147483647, %v4016_v40  ;;  %v4087_v9 = vmul.f32 0.0, %v4086_v26  ;;  %v4116_v52 = vadd.f32 %v4115_v48, %v4114_v21  ;;  %v7761_v40 = vld [vmem:[#allocation34_spill] sm:$0xff] }
 0x30e   : > { %v4009_v57 = vmul.f32 2.0, %v4008_v45  ;;  %v3158_v20 = vadd.f32 %v3016_v29, %v2429_v63  ;;  %v2430_v50 = vadd.f32 %v2291_v46, %v7756_v19  ;;  %v3157_v13 = vadd.f32 %v3014_v62, %v2428_v43  ;;  %v3022_v41 = vpop.f32.mrf.mxu1  ;;  %v7762_v29 = vld [vmem:[#allocation97_spill] sm:$0xff] }
 0x30f   : > { %v4018_v3 = vmul.f32 0.5, %v4017_v17  ;;  %v4089_v44 = vmax.f32 %v4087_v9, 1e-14  ;;  %v4102_v56 = vadd.f32 %v4087_v9, %v4072_v49  ;;  %v4117_v53 = vmul.f32 0.0, %v4116_v52 }
 0x310   : > { %v4865_v61 = vpop.eup %4864  ;;  %v4010_v27 = vsub.f32 %v7192_v32, %v4009_v57  ;;  %v4145_v36 = vmul.f32 %v3158_v20, %v3158_v20  ;;  %v2431_v6 = vadd.f32 %v2293_v38, %v7757_v39  ;;  %v2295_v32 = vpop.f32.mrf.mxu0  ;;  %vm4064_vm5 = vcmp.eq.f32.partialorder %v7234_v37, inf }
 0x311   : > { %v4019_v28 = vadd.f32 %v4018_v3, %v3989_v55  ;;  %v4033_v11 = vmul.f32 %v4865_v61, %v7218_v35  ;;  %v7258_v7 = vadd.f32 %v4089_v44, %v7758_v16  ;;  %v7261_v2 = vmul.f32 %v4089_v44, %v7758_v16  ;;  %v4867_v54 = vpop.eup %4866  ;;  %v3024_v45 = vpop.f32.mrf.mxu1 }
 0x312   : > { %v4011_v49 = vadd.f32 %v4010_v27, %v3981_v0  ;;  %v4104_v12 = vmul.f32 %v7759_v10, %v4089_v44  ;;  %v4119_v58 = vmax.f32 %v4117_v53, 1e-14  ;;  %v4132_v60 = vadd.f32 %v4117_v53, %v4102_v56 }
 0x313   : > { %v4035_v62 = vsel %vm4034_vm3, %v7218_v35, %v4033_v11  ;;  %v4046_v15 = vmul.f32 0.6931472, %v4867_v54  ;;  %4872 = vrsqrt.f32 %v7261_v2  ;;  %v4144_v1 = vmul.f32 %v3157_v13, %v3157_v13  ;;  %v2297_v35 = vpop.f32.mrf.mxu0  ;;  %v3026_v56 = vpop.f32.mrf.mxu1  ;;  %v7765_v54 = vld [vmem:[#allocation22_spill] sm:$0xff] }
 0x314   : > { %v4038_v18 = vsel %vm4036_vm4, %v4037_v34, %v4035_v62  ;;  %4874 = vlog2.f32 %v4104_v12  ;;  %v3159_v51 = vadd.f32 %v3020_v4, %v2430_v50  ;;  %v7272_v0 = vadd.f32 %v4119_v58, %v7760_v23  ;;  %v7763_v4 = vld [vmem:[#allocation98_spill] sm:$0xff]  ;;  %v7766_v12 = vld [vmem:[#allocation35_spill] sm:$0xff] }
 0x315   : > { %v4039_v31 = vmul.f32 2.0, %v4038_v18  ;;  %v4047_v46 = vand.u32 2147483647, %v4046_v15  ;;  %v7275_v55 = vmul.f32 %v4119_v58, %v7760_v23  ;;  %v4134_v26 = vmul.f32 %v7761_v40, %v4119_v58  ;;  %v2301_v3 = vpop.f32.mrf.mxu0  ;;  %v3030_v15 = vpop.f32.mrf.mxu1 }
 0x316   : > { %v4869_v8 = vpop.eup %4868  ;;  %v4146_v21 = vadd.f32 %v4145_v36, %v4144_v1  ;;  %v3160_v48 = vadd.f32 %v3022_v41, %v2431_v6  ;;  %v2432_v30 = vadd.f32 %v2295_v32, %v7762_v29  ;;  %vm4066_vm6 = vcmp.eq.f32.partialorder %v7234_v37, 0.0 }
 0x317   : > { %v4871_v25 = vpop.eup %4870  ;;  %v4040_v43 = vsub.f32 %v7215_v59, %v4039_v31  ;;  %v4048_v5 = vmul.f32 0.5, %v4047_v46  ;;  %v4063_v63 = vmul.f32 %v4869_v8, %v7234_v37  ;;  %4876 = vrsqrt.f32 %v7275_v55  ;;  %v2303_v41 = vpop.f32.mrf.mxu0 }
 0x318   : > { %v4067_v17 = vand.u32 2147483648, %v7234_v37  ;;  %v4076_v9 = vmul.f32 0.6931472, %v4871_v25  ;;  %v4174_v52 = vmul.f32 %v3159_v51, %v3159_v51  ;;  %4878 = vlog2.f32 %v4134_v26 }
 0x319   : > { %v4041_v38 = vadd.f32 %v4040_v43, %v4011_v49  ;;  %v4049_v57 = vadd.f32 %v4048_v5, %v4019_v28  ;;  %v4065_v34 = vsel %vm4064_vm5, %v7234_v37, %v4063_v63  ;;  %v4147_v19 = vmul.f32 0.0, %v4146_v21  ;;  %v7764_v28 = vld [vmem:[#allocation99_spill] sm:$0xff]  ;;  %v7767_v21 = vld [vmem:[#allocation100_spill] sm:$0xff]  ;;  %v3032_v5 = vpop.f32.mrf.mxu1  ;;  %v2305_v63 = vpop.f32.mrf.mxu0 }
 0x31a   : > { %v4068_v59 = vsel %vm4066_vm6, %v4067_v17, %v4065_v34  ;;  %v4077_v20 = vand.u32 2147483647, %v4076_v9  ;;  %v4175_v50 = vmul.f32 %v3160_v48, %v3160_v48  ;;  %vm4094_vm7 = vcmp.eq.f32.partialorder %v7261_v2, inf }
 0x31b   : > { %v4069_v44 = vmul.f32 2.0, %v4068_v59  ;;  %v3161_v53 = vadd.f32 %v3024_v45, %v2432_v30  ;;  %v2433_v61 = vadd.f32 %v2297_v35, %v7763_v4  ;;  %v4149_v13 = vmax.f32 %v4147_v19, 1e-14  ;;  %v7768_v30 = vld [vmem:[#allocation27_spill] sm:$0xff] }
 0x31c   : > { %v4078_v27 = vmul.f32 0.5, %v4077_v20  ;;  %v4162_v36 = vadd.f32 %v4147_v19, %v4132_v60  ;;  %v4176_v39 = vadd.f32 %v4175_v50, %v4174_v52  ;;  %vm4096_vm8 = vcmp.eq.f32.partialorder %v7261_v2, 0.0  ;;  %v7769_v50 = vld [vmem:[#allocation101_spill] sm:$0xff] }
 0x31d   : > { %v4070_v6 = vsub.f32 %v7231_v14, %v4069_v44  ;;  %v3162_v37 = vadd.f32 %v3026_v56, %v2433_v61  ;;  %v2434_v11 = vadd.f32 %v2301_v3, %v7764_v28  ;;  %v7293_v49 = vadd.f32 %v4149_v13, %v7765_v54  ;;  %v7770_v28 = vld [vmem:[#allocation30_spill] sm:$0xff] }
 0x31e   : > { %v4079_v16 = vadd.f32 %v4078_v27, %v4049_v57  ;;  %v7296_v10 = vmul.f32 %v4149_v13, %v7765_v54  ;;  %v4164_v58 = vmul.f32 %v7766_v12, %v4149_v13  ;;  %v4097_v60 = vand.u32 2147483648, %v7261_v2 }
 0x31f   : > { %v4071_v32 = vadd.f32 %v4070_v6, %v4041_v38  ;;  %v4177_v62 = vmul.f32 0.0, %v4176_v39  ;;  %v4205_v14 = vmul.f32 %v3162_v37, %v3162_v37  ;;  %vm4124_vm9 = vcmp.eq.f32.partialorder %v7275_v55, inf }
 0x320   : > { %v4873_v18 = vpop.eup %4872  ;;  %vm4126_vm10 = vcmp.eq.f32.partialorder %v7275_v55, 0.0  ;;  %4880 = vrsqrt.f32 %v7296_v10  ;;  %v4204_v1 = vmul.f32 %v3161_v53, %v3161_v53  ;;  %v3163_v26 = vadd.f32 %v3030_v15, %v2434_v11 }
 0x321   : > { %v4875_v51 = vpop.eup %4874  ;;  %v4093_v31 = vmul.f32 %v4873_v18, %v7261_v2  ;;  %4882 = vlog2.f32 %v4164_v58  ;;  %v4179_v46 = vmax.f32 %v4177_v62, 1e-14  ;;  %v4192_v23 = vadd.f32 %v4177_v62, %v4162_v36  ;;  %v2307_v36 = vpop.f32.mrf.mxu0 }
 0x322   : > { %v4106_v8 = vmul.f32 0.6931472, %v4875_v51  ;;  %v4206_v40 = vadd.f32 %v4205_v14, %v4204_v1  ;;  %v2435_v48 = vadd.f32 %v2303_v41, %v7767_v21  ;;  %v4127_v59 = vand.u32 2147483648, %v7275_v55 }
 0x323   : > { %v4095_v29 = vsel %vm4094_vm7, %v7261_v2, %v4093_v31  ;;  %v7309_v35 = vadd.f32 %v4179_v46, %v7768_v30  ;;  %v7312_v25 = vmul.f32 %v4179_v46, %v7768_v30  ;;  %v4194_v43 = vmul.f32 %v6667_v22, %v4179_v46 }
 0x324   : > { %v4877_v45 = vpop.eup %4876  ;;  %v4098_v17 = vsel %vm4096_vm8, %v4097_v60, %v4095_v29  ;;  %v4107_v9 = vand.u32 2147483647, %v4106_v8  ;;  %v4207_v52 = vmul.f32 0.0, %v4206_v40  ;;  %v3164_v38 = vadd.f32 %v3032_v5, %v2435_v48  ;;  %v7771_v60 = vld [vmem:[#allocation102_spill] sm:$0xff] }
 0x325   : > { %v4099_v57 = vmul.f32 2.0, %v4098_v17  ;;  %v4123_v34 = vmul.f32 %v4877_v45, %v7275_v55  ;;  %4884 = vrsqrt.f32 %v7312_v25  ;;  %v4879_v20 = vpop.eup %4878  ;;  %v4234_v22 = vmul.f32 %v3163_v26, %v3163_v26 }
 0x326   : > { %v4108_v19 = vmul.f32 0.5, %v4107_v9  ;;  %4886 = vlog2.f32 %v4194_v43  ;;  %v2436_v3 = vadd.f32 %v2305_v63, %v7769_v50  ;;  %v4136_v56 = vmul.f32 0.6931472, %v4879_v20 }
 0x327   : > { %v4100_v44 = vsub.f32 %v7258_v7, %v4099_v57  ;;  %v4125_v2 = vsel %vm4124_vm9, %v7275_v55, %v4123_v34  ;;  %v4209_v53 = vmax.f32 %v4207_v52, 1e-14  ;;  %v4222_v27 = vadd.f32 %v4207_v52, %v4192_v23  ;;  %v3034_v7 = vpop.f32.mrf.mxu1 }
 0x328   : > { %v4109_v4 = vadd.f32 %v4108_v19, %v4079_v16  ;;  %v4128_v61 = vsel %vm4126_vm10, %v4127_v59, %v4125_v2  ;;  %v4235_v13 = vmul.f32 %v3164_v38, %v3164_v38  ;;  %v4137_v37 = vand.u32 2147483647, %v4136_v56 }
 0x329   : > { %v4101_v39 = vadd.f32 %v4100_v44, %v4071_v32  ;;  %v4129_v6 = vmul.f32 2.0, %v4128_v61  ;;  %v7328_v11 = vadd.f32 %v4209_v53, %v7770_v28  ;;  %v7331_v54 = vmul.f32 %v4209_v53, %v7770_v28  ;;  %v3036_v1 = vpop.f32.mrf.mxu1 }
 0x32a   : > { %v4224_v12 = vmul.f32 %v6685_v33, %v4209_v53  ;;  %v4236_v58 = vadd.f32 %v4235_v13, %v4234_v22  ;;  %4888 = vrcp.f32 %v7185_v47  ;;  %v4138_v16 = vmul.f32 0.5, %v4137_v37 }
 0x32b   : > { %v4130_v55 = vsub.f32 %v7272_v0, %v4129_v6  ;;  %v2437_v62 = vadd.f32 %v2307_v36, %v7771_v60  ;;  %4890 = vrsqrt.f32 %v7331_v54  ;;  %v3165_v32 = vadd.f32 %v3034_v7, %v2436_v3 }
 0x32c   : > { %v4139_v41 = vadd.f32 %v4138_v16, %v4109_v4  ;;  %4892 = vlog2.f32 %v4224_v12  ;;  %v4237_v18 = vmul.f32 0.0, %v4236_v58  ;;  %vm4154_vm11 = vcmp.eq.f32.partialorder %v7296_v10, inf }
 0x32d   : > { %v4881_v15 = vpop.eup %4880  ;;  %v4131_v14 = vadd.f32 %v4130_v55, %v4101_v39  ;;  %v3166_v31 = vadd.f32 %v3036_v1, %v2437_v62  ;;  %v4157_v0 = vand.u32 2147483648, %v7296_v10  ;;  %vm4156_vm12 = vcmp.eq.f32.partialorder %v7296_v10, 0.0 }
 0x32e   : > { %v4883_v51 = vpop.eup %4882  ;;  %v4153_v33 = vmul.f32 %v4881_v15, %v7296_v10  ;;  %v4239_v23 = vmax.f32 %v4237_v18, 1e-14  ;;  %v4252_v8 = vadd.f32 %v4237_v18, %v4222_v27  ;;  %v4264_v26 = vmul.f32 %v3165_v32, %v3165_v32 }
 0x32f   : > { %v4166_v46 = vmul.f32 0.6931472, %v4883_v51  ;;  %v4265_v21 = vmul.f32 %v3166_v31, %v3166_v31  ;;  %vm4184_vm13 = vcmp.eq.f32.partialorder %v7312_v25, inf  ;;  %vm4186_vm14 = vcmp.eq.f32.partialorder %v7312_v25, 0.0 }
 0x330   : > { %v4155_v40 = vsel %vm4154_vm11, %v7296_v10, %v4153_v33  ;;  %v7344_v30 = vadd.f32 %v4239_v23, %v6854_v42  ;;  %v4241_v43 = vmul.f32 %v4239_v23, %v6854_v42  ;;  %v4254_v45 = vmul.f32 %v6995_v24, %v4239_v23 }
 0x331   : > { %v4158_v48 = vsel %vm4156_vm12, %v4157_v0, %v4155_v40  ;;  %v4167_v29 = vand.u32 2147483647, %v4166_v46  ;;  %v4266_v17 = vadd.f32 %v4265_v21, %v4264_v26  ;;  %v4187_v57 = vand.u32 2147483648, %v7312_v25 }
 0x332   : > { %v4885_v5 = vpop.eup %4884  ;;  %v4159_v63 = vmul.f32 2.0, %v4158_v48  ;;  %4894 = vrsqrt.f32 %v4241_v43  ;;  %vm4214_vm15 = vcmp.eq.f32.partialorder %v7331_v54, inf  ;;  %v4217_v6 = vand.u32 2147483648, %v7331_v54 }
 0x333   : > { %v4887_v9 = vpop.eup %4886  ;;  %v4168_v52 = vmul.f32 0.5, %v4167_v29  ;;  %v4183_v38 = vmul.f32 %v4885_v5, %v7312_v25  ;;  %4896 = vlog2.f32 %v4254_v45  ;;  %v4267_v24 = vmul.f32 0.0, %v4266_v17 }
 0x334   : > { %v4160_v10 = vsub.f32 %v7293_v49, %v4159_v63  ;;  %v4196_v42 = vmul.f32 0.6931472, %v4887_v9  ;;  %vm4216_vm0 = vcmp.eq.f32.partialorder %v7331_v54, 0.0  ;;  %vm4244_vm1 = vcmp.eq.f32.partialorder %v4241_v43, inf }
 0x335   : > { %v4169_v34 = vadd.f32 %v4168_v52, %v4139_v41  ;;  %v4185_v59 = vsel %vm4184_vm13, %v7312_v25, %v4183_v38  ;;  %v4269_v50 = vmax.f32 %v4267_v24, 1e-14  ;;  %v4282_v3 = vadd.f32 %v4267_v24, %v4252_v8 }
 0x336   : > { %v4161_v20 = vadd.f32 %v4160_v10, %v4131_v14  ;;  %v4188_v19 = vsel %vm4186_vm14, %v4187_v57, %v4185_v59  ;;  %v4197_v22 = vand.u32 2147483647, %v4196_v42  ;;  %v4247_v15 = vand.u32 2147483648, %v4241_v43 }
 0x337   : > { %v4189_v49 = vmul.f32 2.0, %v4188_v19  ;;  %v4889_v44 = vpop.eup %4888  ;;  %v4270_v25 = vadd.f32 %v4269_v50, %v7185_v47  ;;  %v4271_v4 = vmul.f32 %v4269_v50, %v7185_v47  ;;  %4291 = vst [vmem:[%s7358_s8 + $0x8] sm:$0xff] %v4282_v3  ;;  %vm4246_vm2 = vcmp.eq.f32.partialorder %v4241_v43, 0.0 }
 0x338   : > { %v4198_v2 = vmul.f32 0.5, %v4197_v22  ;;  %v4891_v56 = vpop.eup %4890  ;;  %v4284_v61 = vmul.f32 %v4889_v44, %v4269_v50 }
 0x339   : > { %v4190_v53 = vsub.f32 %v7309_v35, %v4189_v49  ;;  %v4893_v27 = vpop.eup %4892  ;;  %v4213_v36 = vmul.f32 %v4891_v56, %v7331_v54  ;;  %4898 = vrsqrt.f32 %v4271_v4  ;;  %vm4274_vm3 = vcmp.eq.f32.partialorder %v4271_v4, inf }
 0x33a   : > { %v4199_v13 = vadd.f32 %v4198_v2, %v4169_v34  ;;  %v4226_v37 = vmul.f32 0.6931472, %v4893_v27  ;;  %4900 = vlog2.f32 %v4284_v61  ;;  %v4277_v8 = vand.u32 2147483648, %v4271_v4 }
 0x33b   : > { %v4191_v39 = vadd.f32 %v4190_v53, %v4161_v20  ;;  %v4215_v28 = vsel %vm4214_vm15, %v7331_v54, %v4213_v36  ;;  %vm4276_vm4 = vcmp.eq.f32.partialorder %v4271_v4, 0.0 }
 0x33c   : > { %v4218_v35 = vsel %vm4216_vm0, %v4217_v6, %v4215_v28  ;;  %v4227_v47 = vand.u32 2147483647, %v4226_v37 }
 0x33d   : > { %v4219_v7 = vmul.f32 2.0, %v4218_v35 }
 0x33e   : > { %v4228_v12 = vmul.f32 0.5, %v4227_v47 }
 0x33f   : > { %v4895_v58 = vpop.eup %4894  ;;  %v4220_v55 = vsub.f32 %v7328_v11, %v4219_v7 }
 0x340   : > { %v4229_v16 = vadd.f32 %v4228_v12, %v4199_v13  ;;  %v4243_v60 = vmul.f32 %v4895_v58, %v4241_v43  ;;  %v4897_v62 = vpop.eup %4896 }
 0x341   : > { %v4221_v32 = vadd.f32 %v4220_v55, %v4191_v39  ;;  %v4256_v41 = vmul.f32 0.6931472, %v4897_v62 }
 0x342   : > { %v4245_v14 = vsel %vm4244_vm1, %v4241_v43, %v4243_v60 }
 0x343   : > { %v4248_v18 = vsel %vm4246_vm2, %v4247_v15, %v4245_v14  ;;  %v4257_v54 = vand.u32 2147483647, %v4256_v41 }
 0x344   : > { %v4249_v1 = vmul.f32 2.0, %v4248_v18 }
 0x345   : > { %v4258_v33 = vmul.f32 0.5, %v4257_v54 }
 0x346   : > { %v4250_v51 = vsub.f32 %v7344_v30, %v4249_v1  ;;  %v4899_v31 = vpop.eup %4898 }
 0x347   : > { %v4901_v0 = vpop.eup %4900  ;;  %v4259_v11 = vadd.f32 %v4258_v33, %v4229_v16  ;;  %v4273_v23 = vmul.f32 %v4899_v31, %v4271_v4 }
 0x348   : > { %v4251_v46 = vadd.f32 %v4250_v51, %v4221_v32  ;;  %v4286_v40 = vmul.f32 0.6931472, %v4901_v0 }
 0x349   : > { %v4275_v26 = vsel %vm4274_vm3, %v4271_v4, %v4273_v23 }
 0x34a   : > { %v4278_v21 = vsel %vm4276_vm4, %v4277_v8, %v4275_v26  ;;  %v4287_v48 = vand.u32 2147483647, %v4286_v40 }
 0x34b   : > { %v4279_v29 = vmul.f32 2.0, %v4278_v21 }
 0x34c   : > { %v4288_v43 = vmul.f32 0.5, %v4287_v48 }
 0x34d   : > { %v4280_v5 = vsub.f32 %v4270_v25, %v4279_v29 }
 0x34e   : > { %v4289_v63 = vadd.f32 %v4288_v43, %v4259_v11 }
 0x34f   : > { %v4281_v30 = vadd.f32 %v4280_v5, %v4251_v46 }
 0x350   : > { %4292 = vst [vmem:[%s7358_s8 + $0x10] sm:$0xff] %v4289_v63 }
 0x351   : > { %4290 = vst [vmem:[%s7358_s8] sm:$0xff] %v4281_v30 }
 0x352 PF: > { %s15_s20 = sadd.s32 1, %s4958_s20   ;;  %s7772_s18 = smov %s4954_s19 }
 0x353   : > { %p12_p5 = scmp.ge.s32.totalorder %s15_s20, 4   ;;  %s7773_s19 = smov %s7775_s21 }
 0x355   :  { %14 = sbr.rel (!%p12_p5) target bundleno = 2 (0x2), region = 82 }

</bundles_post_ra>
